<compile_context>
chip_gen: v6e
topology: v6e:2x2x1
jax: 0.10.0
libtpu: 0.0.40
codegen_flags: <defaults>
</compile_context>

<pallas_src>
import math

import jax
import jax.numpy as jnp
from jax import lax
from jax.experimental import pallas as pl
from jax.experimental.pallas import tpu as pltpu

# ------------------------- config (small, BERT-tiny-like) --------------------
VOCAB = 100
TYPE_VOCAB = 2
MAX_POS = 64
HIDDEN = 128          # lane-dense: every activation uses full 128-lane tiles
NUM_HEADS = 4
HEAD_DIM = HIDDEN // NUM_HEADS
INTER = 512
NUM_LAYERS = 4
BATCH = 2
SEQ = 8
LN_EPS = 1e-12


# ------------------------------ in-kernel helpers ----------------------------
def _layer_norm(x, gamma, beta):
    # x: (S, H) f32; gamma/beta: (1, H) f32
    mu = jnp.mean(x, axis=-1, keepdims=True)
    xc = x - mu
    var = jnp.mean(xc * xc, axis=-1, keepdims=True)
    inv = lax.rsqrt(var + LN_EPS)
    return xc * inv * gamma + beta


def _gelu(x):
    # TODO(synk): BertModel default is erf-GELU; tanh approximation kept for
    # robust Mosaic lowering (numerically very close).
    c = math.sqrt(2.0 / math.pi)
    return 0.5 * x * (1.0 + jnp.tanh(c * (x + 0.044715 * x * x * x)))


# --------------------------- fused encoder kernel ----------------------------
def _encoder_kernel(emb_ref, bias_ref, eg_ref, eb_ref,
                    wqkv_ref, bqkv_ref, wo_ref, bo_ref, g1_ref, b1_ref,
                    wi_ref, bi_ref, wo2_ref, bo2_ref, g2_ref, b2_ref,
                    out_ref):
    # emb_ref : (1, S, H) f32    summed embeddings (pre embedding-LayerNorm)
    # bias_ref: (1, 1, S) f32    additive key mask (0 valid / -1e9 padded)
    # wqkv    : (L, H, 3H) bf16  fused [Wq*scale | Wk | Wv]
    # bqkv    : (L, 1, 3H) f32
    # wo      : (L, H, H)  bf16 ; wi: (L, H, I) bf16 ; wo2: (L, I, H) bf16
    # bo/g1/b1/bo2/g2/b2: (L, 1, H) f32 ; bi: (L, 1, I) f32
    S, H = emb_ref.shape[1], emb_ref.shape[2]
    L = wqkv_ref.shape[0]
    NH = NUM_HEADS
    D = H // NH
    bf = jnp.bfloat16

    att_bias = bias_ref[0]                                    # (1, S) f32

    # hidden_states[0] = embedding output (post embedding LayerNorm)
    x = _layer_norm(emb_ref[0], eg_ref[...], eb_ref[...])     # (S, H) f32

    # Running sum of the last 4 hidden states (torch.sum(last_four, 0)).
    first_kept = max(0, (L + 1) - 4)          # index of first kept hidden state
    acc = x if first_kept == 0 else jnp.zeros_like(x)

    for li in range(L):                        # static unroll; weights stay in VMEM
        # ---- fused Q/K/V projection: one wide MXU push (S,H)@(H,3H) ----
        x_bf = x.astype(bf)
        qkv = (jnp.dot(x_bf, wqkv_ref[li], preferred_element_type=jnp.float32)
               + bqkv_ref[li])                                # (S, 3H) f32
        qkv_bf = qkv.astype(bf)

        # ---- per-head attention (scores are inherently per-head) ----
        ctx_heads = []
        for n in range(NH):
            qn = qkv_bf[:, n * D:(n + 1) * D]                 # (S, D)
            kn = qkv_bf[:, H + n * D:H + (n + 1) * D]         # (S, D)
            vn = qkv_bf[:, 2 * H + n * D:2 * H + (n + 1) * D] # (S, D)

            # q @ k^T without an explicit transpose (contract last dims).
            s = lax.dot_general(qn, kn, (((1,), (1,)), ((), ())),
                                preferred_element_type=jnp.float32)   # (S, S)
            s = s + att_bias
            s = s - jnp.max(s, axis=-1, keepdims=True)
            e = jnp.exp(s)
            # EUP approximate reciprocal; sum >= 1 here so no div-by-zero.
            p = e * pl.reciprocal(jnp.sum(e, axis=-1, keepdims=True), approx=True)

            ctx_heads.append(jnp.dot(p.astype(bf), vn,
                                     preferred_element_type=jnp.float32))  # (S, D)

        # Head merge via lane concatenation + ONE (S,H)@(H,H) output projection:
        # the sum over heads rides the MXU K-accumulation.
        ctx = jnp.concatenate(ctx_heads, axis=-1).astype(bf)   # (S, H)
        attn = (jnp.dot(ctx, wo_ref[li], preferred_element_type=jnp.float32)
                + bo_ref[li])                                  # (S, H)

        h1 = _layer_norm(attn + x, g1_ref[li], b1_ref[li])

        # ---- feed-forward ----
        ff = _gelu(jnp.dot(h1.astype(bf), wi_ref[li],
                           preferred_element_type=jnp.float32) + bi_ref[li])
        ff2 = (jnp.dot(ff.astype(bf), wo2_ref[li],
                       preferred_element_type=jnp.float32) + bo2_ref[li])
        x = _layer_norm(ff2 + h1, g2_ref[li], b2_ref[li])

        if (li + 1) >= first_kept:             # static: layer output in last 4
            acc = acc + x

    out_ref[0] = acc


# ------------------------- parameter prep for the kernel ----------------------
def _stack_layer_params(layers):
    L = len(layers)
    H = layers[0]["wq"].shape[0]
    I = layers[0]["wi"].shape[1]
    st = lambda name: jnp.stack([lp[name] for lp in layers], axis=0)
    scale = 1.0 / math.sqrt(HEAD_DIM)

    # Fuse Q|K|V along the output axis; fold 1/sqrt(head_dim) into the Q slice.
    wqkv = jnp.concatenate([st("wq") * scale, st("wk"), st("wv")],
                           axis=-1).astype(jnp.bfloat16)          # (L, H, 3H)
    bqkv = jnp.concatenate([st("bq") * scale, st("bk"), st("bv")],
                           axis=-1).reshape(L, 1, 3 * H)           # (L, 1, 3H) f32

    wo = st("wo").astype(jnp.bfloat16)                             # (L, H, H)
    bo = st("bo").reshape(L, 1, H)
    g1 = st("ln1_g").reshape(L, 1, H)
    b1 = st("ln1_b").reshape(L, 1, H)
    wi = st("wi").astype(jnp.bfloat16)                             # (L, H, I)
    bi = st("bi").reshape(L, 1, I)
    wo2 = st("wo2").astype(jnp.bfloat16)                           # (L, I, H)
    bo2 = st("bo2").reshape(L, 1, H)
    g2 = st("ln2_g").reshape(L, 1, H)
    b2 = st("ln2_b").reshape(L, 1, H)
    return (wqkv, bqkv, wo, bo, g1, b1, wi, bi, wo2, bo2, g2, b2)


# ------------------------------- parameter setup -----------------------------
def init_params(key):
    def nrm(k, shape, scale=0.02):
        return (scale * jax.random.normal(k, shape)).astype(jnp.float32)

    keys = jax.random.split(key, 4 + NUM_LAYERS)
    params = {
        "word_emb": nrm(keys[0], (VOCAB, HIDDEN)),
        "pos_emb": nrm(keys[1], (MAX_POS, HIDDEN)),
        "type_emb": nrm(keys[2], (TYPE_VOCAB, HIDDEN)),
        "emb_ln_g": jnp.ones((HIDDEN,), jnp.float32),
        "emb_ln_b": jnp.zeros((HIDDEN,), jnp.float32),
        "layers": [],
    }
    for li in range(NUM_LAYERS):
        lk = jax.random.split(keys[4 + li], 8)
        params["layers"].append({
            "wq": nrm(lk[0], (HIDDEN, HIDDEN)), "bq": jnp.zeros((HIDDEN,), jnp.float32),
            "wk": nrm(lk[1], (HIDDEN, HIDDEN)), "bk": jnp.zeros((HIDDEN,), jnp.float32),
            "wv": nrm(lk[2], (HIDDEN, HIDDEN)), "bv": jnp.zeros((HIDDEN,), jnp.float32),
            "wo": nrm(lk[3], (HIDDEN, HIDDEN)), "bo": jnp.zeros((HIDDEN,), jnp.float32),
            "ln1_g": jnp.ones((HIDDEN,), jnp.float32), "ln1_b": jnp.zeros((HIDDEN,), jnp.float32),
            "wi": nrm(lk[4], (HIDDEN, INTER)), "bi": jnp.zeros((INTER,), jnp.float32),
            "wo2": nrm(lk[5], (INTER, HIDDEN)), "bo2": jnp.zeros((HIDDEN,), jnp.float32),
            "ln2_g": jnp.ones((HIDDEN,), jnp.float32), "ln2_b": jnp.zeros((HIDDEN,), jnp.float32),
        })
    return params


# --------------------------------- forward -----------------------------------
def my_bert_encoder_forward(params, src_ids, mask_ids, seg_ids):
    B, S = src_ids.shape
    H = params["word_emb"].shape[1]

    # Embedding lookups (tiny data-dependent gathers) stay in plain JAX as glue.
    pos_ids = jnp.arange(S, dtype=jnp.int32)
    emb = (params["word_emb"][src_ids]
           + params["pos_emb"][pos_ids][None, :, :]
           + params["type_emb"][seg_ids]).astype(jnp.float32)     # (B, S, H)

    # O(S) additive key bias per batch (BERT extended attention mask).
    att_bias = jnp.where(mask_ids[:, None, :] != 0, 0.0, -1e9).astype(jnp.float32)  # (B,1,S)

    stacked = _stack_layer_params(params["layers"])
    eg = params["emb_ln_g"].reshape(1, H)
    eb = params["emb_ln_b"].reshape(1, H)

    # Weights: full-array blocks with a constant index_map -> DMA'd once,
    # VMEM-resident across all grid steps.
    weight_specs = [pl.BlockSpec(a.shape, lambda b: (0, 0, 0)) for a in stacked]

    in_specs = [
        pl.BlockSpec((1, S, H), lambda b: (b, 0, 0)),   # embeddings (per batch)
        pl.BlockSpec((1, 1, S), lambda b: (b, 0, 0)),   # additive key mask
        pl.BlockSpec((1, H), lambda b: (0, 0)),         # emb LN gamma
        pl.BlockSpec((1, H), lambda b: (0, 0)),         # emb LN beta
    ] + weight_specs

    out = pl.pallas_call(
        _encoder_kernel,
        grid=(B,),
        in_specs=in_specs,
        out_specs=pl.BlockSpec((1, S, H), lambda b: (b, 0, 0)),
        out_shape=jax.ShapeDtypeStruct((B, S, H), jnp.float32),
        compiler_params=pltpu.CompilerParams(
            dimension_semantics=("parallel",)),
    )(emb, att_bias, eg, eb, *stacked)

    return out


# ----------------------------------- main ------------------------------------
if __name__ == "__main__":
    key = jax.random.PRNGKey(0)
    pkey, ikey = jax.random.split(key)
    params = init_params(pkey)

    src_ids = jax.random.randint(ikey, (BATCH, SEQ), 0, VOCAB, dtype=jnp.int32)
    mask_ids = jnp.ones((BATCH, SEQ), dtype=jnp.int32).at[1, -2:].set(0)
    seg_ids = jnp.concatenate(
        [jnp.zeros((BATCH, SEQ // 2), jnp.int32), jnp.ones((BATCH, SEQ // 2), jnp.int32)],
        axis=1)

    fwd = jax.jit(my_bert_encoder_forward)
    out = fwd(params, src_ids, mask_ids, seg_ids)
    out = jax.block_until_ready(out)

    assert out.shape == (BATCH, SEQ, HIDDEN), out.shape
    assert bool(jnp.all(jnp.isfinite(out)))
    print("KERNEL_OK")
</pallas_src>

<mosaic_0001>
module attributes {stable_mosaic.version = 11 : i64} {
  func.func @_encoder_kernel(%arg0: i32, %arg1: memref<1x8x128xf32, #tpu.memory_space<vmem>>, %arg2: memref<1x1x8xf32, #tpu.memory_space<vmem>>, %arg3: memref<1x128xf32, #tpu.memory_space<vmem>>, %arg4: memref<1x128xf32, #tpu.memory_space<vmem>>, %arg5: memref<4x128x384xbf16, #tpu.memory_space<vmem>>, %arg6: memref<4x1x384xf32, #tpu.memory_space<vmem>>, %arg7: memref<4x128x128xbf16, #tpu.memory_space<vmem>>, %arg8: memref<4x1x128xf32, #tpu.memory_space<vmem>>, %arg9: memref<4x1x128xf32, #tpu.memory_space<vmem>>, %arg10: memref<4x1x128xf32, #tpu.memory_space<vmem>>, %arg11: memref<4x128x512xbf16, #tpu.memory_space<vmem>>, %arg12: memref<4x1x512xf32, #tpu.memory_space<vmem>>, %arg13: memref<4x512x128xbf16, #tpu.memory_space<vmem>>, %arg14: memref<4x1x128xf32, #tpu.memory_space<vmem>>, %arg15: memref<4x1x128xf32, #tpu.memory_space<vmem>>, %arg16: memref<4x1x128xf32, #tpu.memory_space<vmem>>, %arg17: memref<1x8x128xf32, #tpu.memory_space<vmem>>) attributes {dimension_semantics = [#tpu.dimension_semantics<parallel>], iteration_bounds = array<i64: 2>, scalar_prefetch = 0 : i64, scratch_operands = 0 : i64, tpu.core_type = #tpu.core_type<tc>, window_params = [{transform_indices = @transform_0, window_bounds = array<i64: 1, 8, 128>}, {transform_indices = @transform_1, window_bounds = array<i64: 1, 1, 8>}, {pipeline_mode = #tpu.pipeline_mode<synchronous>, transform_indices = @transform_2, window_bounds = array<i64: 1, 128>}, {pipeline_mode = #tpu.pipeline_mode<synchronous>, transform_indices = @transform_3, window_bounds = array<i64: 1, 128>}, {pipeline_mode = #tpu.pipeline_mode<synchronous>, transform_indices = @transform_4, window_bounds = array<i64: 4, 128, 384>}, {pipeline_mode = #tpu.pipeline_mode<synchronous>, transform_indices = @transform_5, window_bounds = array<i64: 4, 1, 384>}, {pipeline_mode = #tpu.pipeline_mode<synchronous>, transform_indices = @transform_6, window_bounds = array<i64: 4, 128, 128>}, {pipeline_mode = #tpu.pipeline_mode<synchronous>, transform_indices = @transform_7, window_bounds = array<i64: 4, 1, 128>}, {pipeline_mode = #tpu.pipeline_mode<synchronous>, transform_indices = @transform_8, window_bounds = array<i64: 4, 1, 128>}, {pipeline_mode = #tpu.pipeline_mode<synchronous>, transform_indices = @transform_9, window_bounds = array<i64: 4, 1, 128>}, {pipeline_mode = #tpu.pipeline_mode<synchronous>, transform_indices = @transform_10, window_bounds = array<i64: 4, 128, 512>}, {pipeline_mode = #tpu.pipeline_mode<synchronous>, transform_indices = @transform_11, window_bounds = array<i64: 4, 1, 512>}, {pipeline_mode = #tpu.pipeline_mode<synchronous>, transform_indices = @transform_12, window_bounds = array<i64: 4, 512, 128>}, {pipeline_mode = #tpu.pipeline_mode<synchronous>, transform_indices = @transform_13, window_bounds = array<i64: 4, 1, 128>}, {pipeline_mode = #tpu.pipeline_mode<synchronous>, transform_indices = @transform_14, window_bounds = array<i64: 4, 1, 128>}, {pipeline_mode = #tpu.pipeline_mode<synchronous>, transform_indices = @transform_15, window_bounds = array<i64: 4, 1, 128>}, {transform_indices = @transform_16, window_bounds = array<i64: 1, 8, 128>}]} {
    %c0 = arith.constant 0 : index
    %c0_0 = arith.constant 0 : index
    %c0_1 = arith.constant 0 : index
    %0 = vector.load %arg2[%c0, %c0_0, %c0_1] : memref<1x1x8xf32, #tpu.memory_space<vmem>>, vector<1x1x8xf32>
    %1 = vector.shape_cast %0 : vector<1x1x8xf32> to vector<1x8xf32>
    %c0_2 = arith.constant 0 : index
    %c0_3 = arith.constant 0 : index
    %c0_4 = arith.constant 0 : index
    %2 = vector.load %arg1[%c0_2, %c0_3, %c0_4] : memref<1x8x128xf32, #tpu.memory_space<vmem>>, vector<1x8x128xf32>
    %3 = vector.shape_cast %2 : vector<1x8x128xf32> to vector<8x128xf32>
    %c0_5 = arith.constant 0 : index
    %c0_6 = arith.constant 0 : index
    %4 = vector.load %arg3[%c0_5, %c0_6] : memref<1x128xf32, #tpu.memory_space<vmem>>, vector<1x128xf32>
    %c0_7 = arith.constant 0 : index
    %c0_8 = arith.constant 0 : index
    %5 = vector.load %arg4[%c0_7, %c0_8] : memref<1x128xf32, #tpu.memory_space<vmem>>, vector<1x128xf32>
    %cst = arith.constant dense<0.000000e+00> : vector<8xf32>
    %6 = vector.multi_reduction <add>, %3, %cst [1] : vector<8x128xf32> to vector<8xf32>
    %7 = vector.shape_cast %6 : vector<8xf32> to vector<8x1xf32>
    %cst_9 = arith.constant 1.280000e+02 : f32
    %8 = vector.broadcast %cst_9 : f32 to vector<8x1xf32>
    %9 = arith.divf %7, %8 : vector<8x1xf32>
    %10 = vector.broadcast %9 : vector<8x1xf32> to vector<8x128xf32>
    %11 = arith.subf %3, %10 : vector<8x128xf32>
    %12 = arith.mulf %11, %11 : vector<8x128xf32>
    %cst_10 = arith.constant dense<0.000000e+00> : vector<8xf32>
    %13 = vector.multi_reduction <add>, %12, %cst_10 [1] : vector<8x128xf32> to vector<8xf32>
    %14 = vector.shape_cast %13 : vector<8xf32> to vector<8x1xf32>
    %cst_11 = arith.constant 1.280000e+02 : f32
    %15 = vector.broadcast %cst_11 : f32 to vector<8x1xf32>
    %16 = arith.divf %14, %15 : vector<8x1xf32>
    %cst_12 = arith.constant 9.99999996E-13 : f32
    %17 = vector.broadcast %cst_12 : f32 to vector<8x1xf32>
    %18 = arith.addf %16, %17 : vector<8x1xf32>
    %19 = math.rsqrt %18 : vector<8x1xf32>
    %20 = vector.broadcast %19 : vector<8x1xf32> to vector<8x128xf32>
    %21 = arith.mulf %11, %20 : vector<8x128xf32>
    %22 = vector.broadcast %4 : vector<1x128xf32> to vector<8x128xf32>
    %23 = arith.mulf %21, %22 : vector<8x128xf32>
    %24 = vector.broadcast %5 : vector<1x128xf32> to vector<8x128xf32>
    %25 = arith.addf %23, %24 : vector<8x128xf32>
    %cst_13 = arith.constant 0.000000e+00 : f32
    %26 = vector.broadcast %cst_13 : f32 to vector<8x128xf32>
    %27 = arith.truncf %25 : vector<8x128xf32> to vector<8x128xbf16>
    %c0_14 = arith.constant 0 : index
    %c0_15 = arith.constant 0 : index
    %c0_16 = arith.constant 0 : index
    %28 = vector.load %arg5[%c0_14, %c0_15, %c0_16] : memref<4x128x384xbf16, #tpu.memory_space<vmem>>, vector<1x128x384xbf16>
    %29 = vector.shape_cast %28 : vector<1x128x384xbf16> to vector<128x384xbf16>
    %cst_17 = arith.constant dense<0.000000e+00> : vector<8x384xf32>
    %30 = tpu.matmul %27, %29, %cst_17 {dimension_numbers = #tpu.dot_dimension_numbers<[1], [0], [0], [1], [0, 0, 1, 1], [], []>} : vector<8x128xbf16>, vector<128x384xbf16>, vector<8x384xf32> -> vector<8x384xf32>
    %c0_18 = arith.constant 0 : index
    %c0_19 = arith.constant 0 : index
    %c0_20 = arith.constant 0 : index
    %31 = vector.load %arg6[%c0_18, %c0_19, %c0_20] : memref<4x1x384xf32, #tpu.memory_space<vmem>>, vector<1x1x384xf32>
    %32 = vector.shape_cast %31 : vector<1x1x384xf32> to vector<1x384xf32>
    %33 = vector.broadcast %32 : vector<1x384xf32> to vector<8x384xf32>
    %34 = arith.addf %30, %33 : vector<8x384xf32>
    %35 = arith.truncf %34 : vector<8x384xf32> to vector<8x384xbf16>
    %36 = vector.extract_strided_slice %35 {offsets = [0, 0], sizes = [8, 32], strides = [1, 1]} : vector<8x384xbf16> to vector<8x32xbf16>
    %37 = vector.extract_strided_slice %35 {offsets = [0, 128], sizes = [8, 32], strides = [1, 1]} : vector<8x384xbf16> to vector<8x32xbf16>
    %38 = vector.extract_strided_slice %35 {offsets = [0, 256], sizes = [8, 32], strides = [1, 1]} : vector<8x384xbf16> to vector<8x32xbf16>
    %cst_21 = arith.constant dense<0.000000e+00> : vector<8x8xf32>
    %39 = tpu.matmul %36, %37, %cst_21 {dimension_numbers = #tpu.dot_dimension_numbers<[1], [1], [0], [0], [0, 0, 1, 0], [], []>} : vector<8x32xbf16>, vector<8x32xbf16>, vector<8x8xf32> -> vector<8x8xf32>
    %40 = vector.broadcast %1 : vector<1x8xf32> to vector<8x8xf32>
    %41 = arith.addf %39, %40 : vector<8x8xf32>
    %cst_22 = arith.constant dense<0xFF800000> : vector<8xf32>
    %42 = vector.multi_reduction <maximumf>, %41, %cst_22 [1] : vector<8x8xf32> to vector<8xf32>
    %43 = vector.shape_cast %42 : vector<8xf32> to vector<8x1xf32>
    %44 = vector.broadcast %43 : vector<8x1xf32> to vector<8x8xf32>
    %45 = arith.subf %41, %44 : vector<8x8xf32>
    %46 = math.exp %45 : vector<8x8xf32>
    %cst_23 = arith.constant dense<0.000000e+00> : vector<8xf32>
    %47 = vector.multi_reduction <add>, %46, %cst_23 [1] : vector<8x8xf32> to vector<8xf32>
    %48 = vector.shape_cast %47 : vector<8xf32> to vector<8x1xf32>
    %49 = tpu.reciprocal %48 {approx = true} : vector<8x1xf32> -> vector<8x1xf32>
    %50 = vector.broadcast %49 : vector<8x1xf32> to vector<8x8xf32>
    %51 = arith.mulf %46, %50 : vector<8x8xf32>
    %52 = arith.truncf %51 : vector<8x8xf32> to vector<8x8xbf16>
    %cst_24 = arith.constant dense<0.000000e+00> : vector<8x32xf32>
    %53 = tpu.matmul %52, %38, %cst_24 {dimension_numbers = #tpu.dot_dimension_numbers<[1], [0], [0], [1], [0, 0, 1, 1], [], []>} : vector<8x8xbf16>, vector<8x32xbf16>, vector<8x32xf32> -> vector<8x32xf32>
    %54 = vector.extract_strided_slice %35 {offsets = [0, 32], sizes = [8, 32], strides = [1, 1]} : vector<8x384xbf16> to vector<8x32xbf16>
    %55 = vector.extract_strided_slice %35 {offsets = [0, 160], sizes = [8, 32], strides = [1, 1]} : vector<8x384xbf16> to vector<8x32xbf16>
    %56 = vector.extract_strided_slice %35 {offsets = [0, 288], sizes = [8, 32], strides = [1, 1]} : vector<8x384xbf16> to vector<8x32xbf16>
    %cst_25 = arith.constant dense<0.000000e+00> : vector<8x8xf32>
    %57 = tpu.matmul %54, %55, %cst_25 {dimension_numbers = #tpu.dot_dimension_numbers<[1], [1], [0], [0], [0, 0, 1, 0], [], []>} : vector<8x32xbf16>, vector<8x32xbf16>, vector<8x8xf32> -> vector<8x8xf32>
    %58 = vector.broadcast %1 : vector<1x8xf32> to vector<8x8xf32>
    %59 = arith.addf %57, %58 : vector<8x8xf32>
    %cst_26 = arith.constant dense<0xFF800000> : vector<8xf32>
    %60 = vector.multi_reduction <maximumf>, %59, %cst_26 [1] : vector<8x8xf32> to vector<8xf32>
    %61 = vector.shape_cast %60 : vector<8xf32> to vector<8x1xf32>
    %62 = vector.broadcast %61 : vector<8x1xf32> to vector<8x8xf32>
    %63 = arith.subf %59, %62 : vector<8x8xf32>
    %64 = math.exp %63 : vector<8x8xf32>
    %cst_27 = arith.constant dense<0.000000e+00> : vector<8xf32>
    %65 = vector.multi_reduction <add>, %64, %cst_27 [1] : vector<8x8xf32> to vector<8xf32>
    %66 = vector.shape_cast %65 : vector<8xf32> to vector<8x1xf32>
    %67 = tpu.reciprocal %66 {approx = true} : vector<8x1xf32> -> vector<8x1xf32>
    %68 = vector.broadcast %67 : vector<8x1xf32> to vector<8x8xf32>
    %69 = arith.mulf %64, %68 : vector<8x8xf32>
    %70 = arith.truncf %69 : vector<8x8xf32> to vector<8x8xbf16>
    %cst_28 = arith.constant dense<0.000000e+00> : vector<8x32xf32>
    %71 = tpu.matmul %70, %56, %cst_28 {dimension_numbers = #tpu.dot_dimension_numbers<[1], [0], [0], [1], [0, 0, 1, 1], [], []>} : vector<8x8xbf16>, vector<8x32xbf16>, vector<8x32xf32> -> vector<8x32xf32>
    %72 = vector.extract_strided_slice %35 {offsets = [0, 64], sizes = [8, 32], strides = [1, 1]} : vector<8x384xbf16> to vector<8x32xbf16>
    %73 = vector.extract_strided_slice %35 {offsets = [0, 192], sizes = [8, 32], strides = [1, 1]} : vector<8x384xbf16> to vector<8x32xbf16>
    %74 = vector.extract_strided_slice %35 {offsets = [0, 320], sizes = [8, 32], strides = [1, 1]} : vector<8x384xbf16> to vector<8x32xbf16>
    %cst_29 = arith.constant dense<0.000000e+00> : vector<8x8xf32>
    %75 = tpu.matmul %72, %73, %cst_29 {dimension_numbers = #tpu.dot_dimension_numbers<[1], [1], [0], [0], [0, 0, 1, 0], [], []>} : vector<8x32xbf16>, vector<8x32xbf16>, vector<8x8xf32> -> vector<8x8xf32>
    %76 = vector.broadcast %1 : vector<1x8xf32> to vector<8x8xf32>
    %77 = arith.addf %75, %76 : vector<8x8xf32>
    %cst_30 = arith.constant dense<0xFF800000> : vector<8xf32>
    %78 = vector.multi_reduction <maximumf>, %77, %cst_30 [1] : vector<8x8xf32> to vector<8xf32>
    %79 = vector.shape_cast %78 : vector<8xf32> to vector<8x1xf32>
    %80 = vector.broadcast %79 : vector<8x1xf32> to vector<8x8xf32>
    %81 = arith.subf %77, %80 : vector<8x8xf32>
    %82 = math.exp %81 : vector<8x8xf32>
    %cst_31 = arith.constant dense<0.000000e+00> : vector<8xf32>
    %83 = vector.multi_reduction <add>, %82, %cst_31 [1] : vector<8x8xf32> to vector<8xf32>
    %84 = vector.shape_cast %83 : vector<8xf32> to vector<8x1xf32>
    %85 = tpu.reciprocal %84 {approx = true} : vector<8x1xf32> -> vector<8x1xf32>
    %86 = vector.broadcast %85 : vector<8x1xf32> to vector<8x8xf32>
    %87 = arith.mulf %82, %86 : vector<8x8xf32>
    %88 = arith.truncf %87 : vector<8x8xf32> to vector<8x8xbf16>
    %cst_32 = arith.constant dense<0.000000e+00> : vector<8x32xf32>
    %89 = tpu.matmul %88, %74, %cst_32 {dimension_numbers = #tpu.dot_dimension_numbers<[1], [0], [0], [1], [0, 0, 1, 1], [], []>} : vector<8x8xbf16>, vector<8x32xbf16>, vector<8x32xf32> -> vector<8x32xf32>
    %90 = vector.extract_strided_slice %35 {offsets = [0, 96], sizes = [8, 32], strides = [1, 1]} : vector<8x384xbf16> to vector<8x32xbf16>
    %91 = vector.extract_strided_slice %35 {offsets = [0, 224], sizes = [8, 32], strides = [1, 1]} : vector<8x384xbf16> to vector<8x32xbf16>
    %92 = vector.extract_strided_slice %35 {offsets = [0, 352], sizes = [8, 32], strides = [1, 1]} : vector<8x384xbf16> to vector<8x32xbf16>
    %cst_33 = arith.constant dense<0.000000e+00> : vector<8x8xf32>
    %93 = tpu.matmul %90, %91, %cst_33 {dimension_numbers = #tpu.dot_dimension_numbers<[1], [1], [0], [0], [0, 0, 1, 0], [], []>} : vector<8x32xbf16>, vector<8x32xbf16>, vector<8x8xf32> -> vector<8x8xf32>
    %94 = vector.broadcast %1 : vector<1x8xf32> to vector<8x8xf32>
    %95 = arith.addf %93, %94 : vector<8x8xf32>
    %cst_34 = arith.constant dense<0xFF800000> : vector<8xf32>
    %96 = vector.multi_reduction <maximumf>, %95, %cst_34 [1] : vector<8x8xf32> to vector<8xf32>
    %97 = vector.shape_cast %96 : vector<8xf32> to vector<8x1xf32>
    %98 = vector.broadcast %97 : vector<8x1xf32> to vector<8x8xf32>
    %99 = arith.subf %95, %98 : vector<8x8xf32>
    %100 = math.exp %99 : vector<8x8xf32>
    %cst_35 = arith.constant dense<0.000000e+00> : vector<8xf32>
    %101 = vector.multi_reduction <add>, %100, %cst_35 [1] : vector<8x8xf32> to vector<8xf32>
    %102 = vector.shape_cast %101 : vector<8xf32> to vector<8x1xf32>
    %103 = tpu.reciprocal %102 {approx = true} : vector<8x1xf32> -> vector<8x1xf32>
    %104 = vector.broadcast %103 : vector<8x1xf32> to vector<8x8xf32>
    %105 = arith.mulf %100, %104 : vector<8x8xf32>
    %106 = arith.truncf %105 : vector<8x8xf32> to vector<8x8xbf16>
    %cst_36 = arith.constant dense<0.000000e+00> : vector<8x32xf32>
    %107 = tpu.matmul %106, %92, %cst_36 {dimension_numbers = #tpu.dot_dimension_numbers<[1], [0], [0], [1], [0, 0, 1, 1], [], []>} : vector<8x8xbf16>, vector<8x32xbf16>, vector<8x32xf32> -> vector<8x32xf32>
    %108 = tpu.concatenate %53, %71, %89, %107 in 1 : vector<8x32xf32>, vector<8x32xf32>, vector<8x32xf32>, vector<8x32xf32> -> vector<8x128xf32>
    %109 = arith.truncf %108 : vector<8x128xf32> to vector<8x128xbf16>
    %c0_37 = arith.constant 0 : index
    %c0_38 = arith.constant 0 : index
    %c0_39 = arith.constant 0 : index
    %110 = vector.load %arg7[%c0_37, %c0_38, %c0_39] : memref<4x128x128xbf16, #tpu.memory_space<vmem>>, vector<1x128x128xbf16>
    %111 = vector.shape_cast %110 : vector<1x128x128xbf16> to vector<128x128xbf16>
    %cst_40 = arith.constant dense<0.000000e+00> : vector<8x128xf32>
    %112 = tpu.matmul %109, %111, %cst_40 {dimension_numbers = #tpu.dot_dimension_numbers<[1], [0], [0], [1], [0, 0, 1, 1], [], []>} : vector<8x128xbf16>, vector<128x128xbf16>, vector<8x128xf32> -> vector<8x128xf32>
    %c0_41 = arith.constant 0 : index
    %c0_42 = arith.constant 0 : index
    %c0_43 = arith.constant 0 : index
    %113 = vector.load %arg8[%c0_41, %c0_42, %c0_43] : memref<4x1x128xf32, #tpu.memory_space<vmem>>, vector<1x1x128xf32>
    %114 = vector.shape_cast %113 : vector<1x1x128xf32> to vector<1x128xf32>
    %115 = vector.broadcast %114 : vector<1x128xf32> to vector<8x128xf32>
    %116 = arith.addf %112, %115 : vector<8x128xf32>
    %117 = arith.addf %116, %25 : vector<8x128xf32>
    %c0_44 = arith.constant 0 : index
    %c0_45 = arith.constant 0 : index
    %c0_46 = arith.constant 0 : index
    %118 = vector.load %arg9[%c0_44, %c0_45, %c0_46] : memref<4x1x128xf32, #tpu.memory_space<vmem>>, vector<1x1x128xf32>
    %119 = vector.shape_cast %118 : vector<1x1x128xf32> to vector<1x128xf32>
    %c0_47 = arith.constant 0 : index
    %c0_48 = arith.constant 0 : index
    %c0_49 = arith.constant 0 : index
    %120 = vector.load %arg10[%c0_47, %c0_48, %c0_49] : memref<4x1x128xf32, #tpu.memory_space<vmem>>, vector<1x1x128xf32>
    %121 = vector.shape_cast %120 : vector<1x1x128xf32> to vector<1x128xf32>
    %cst_50 = arith.constant dense<0.000000e+00> : vector<8xf32>
    %122 = vector.multi_reduction <add>, %117, %cst_50 [1] : vector<8x128xf32> to vector<8xf32>
    %123 = vector.shape_cast %122 : vector<8xf32> to vector<8x1xf32>
    %cst_51 = arith.constant 1.280000e+02 : f32
    %124 = vector.broadcast %cst_51 : f32 to vector<8x1xf32>
    %125 = arith.divf %123, %124 : vector<8x1xf32>
    %126 = vector.broadcast %125 : vector<8x1xf32> to vector<8x128xf32>
    %127 = arith.subf %117, %126 : vector<8x128xf32>
    %128 = arith.mulf %127, %127 : vector<8x128xf32>
    %cst_52 = arith.constant dense<0.000000e+00> : vector<8xf32>
    %129 = vector.multi_reduction <add>, %128, %cst_52 [1] : vector<8x128xf32> to vector<8xf32>
    %130 = vector.shape_cast %129 : vector<8xf32> to vector<8x1xf32>
    %cst_53 = arith.constant 1.280000e+02 : f32
    %131 = vector.broadcast %cst_53 : f32 to vector<8x1xf32>
    %132 = arith.divf %130, %131 : vector<8x1xf32>
    %cst_54 = arith.constant 9.99999996E-13 : f32
    %133 = vector.broadcast %cst_54 : f32 to vector<8x1xf32>
    %134 = arith.addf %132, %133 : vector<8x1xf32>
    %135 = math.rsqrt %134 : vector<8x1xf32>
    %136 = vector.broadcast %135 : vector<8x1xf32> to vector<8x128xf32>
    %137 = arith.mulf %127, %136 : vector<8x128xf32>
    %138 = vector.broadcast %119 : vector<1x128xf32> to vector<8x128xf32>
    %139 = arith.mulf %137, %138 : vector<8x128xf32>
    %140 = vector.broadcast %121 : vector<1x128xf32> to vector<8x128xf32>
    %141 = arith.addf %139, %140 : vector<8x128xf32>
    %142 = arith.truncf %141 : vector<8x128xf32> to vector<8x128xbf16>
    %c0_55 = arith.constant 0 : index
    %c0_56 = arith.constant 0 : index
    %c0_57 = arith.constant 0 : index
    %143 = vector.load %arg11[%c0_55, %c0_56, %c0_57] : memref<4x128x512xbf16, #tpu.memory_space<vmem>>, vector<1x128x512xbf16>
    %144 = vector.shape_cast %143 : vector<1x128x512xbf16> to vector<128x512xbf16>
    %cst_58 = arith.constant dense<0.000000e+00> : vector<8x512xf32>
    %145 = tpu.matmul %142, %144, %cst_58 {dimension_numbers = #tpu.dot_dimension_numbers<[1], [0], [0], [1], [0, 0, 1, 1], [], []>} : vector<8x128xbf16>, vector<128x512xbf16>, vector<8x512xf32> -> vector<8x512xf32>
    %c0_59 = arith.constant 0 : index
    %c0_60 = arith.constant 0 : index
    %c0_61 = arith.constant 0 : index
    %146 = vector.load %arg12[%c0_59, %c0_60, %c0_61] : memref<4x1x512xf32, #tpu.memory_space<vmem>>, vector<1x1x512xf32>
    %147 = vector.shape_cast %146 : vector<1x1x512xf32> to vector<1x512xf32>
    %148 = vector.broadcast %147 : vector<1x512xf32> to vector<8x512xf32>
    %149 = arith.addf %145, %148 : vector<8x512xf32>
    %cst_62 = arith.constant 5.000000e-01 : f32
    %150 = vector.broadcast %cst_62 : f32 to vector<8x512xf32>
    %151 = arith.mulf %150, %149 : vector<8x512xf32>
    %cst_63 = arith.constant 4.471500e-02 : f32
    %152 = vector.broadcast %cst_63 : f32 to vector<8x512xf32>
    %153 = arith.mulf %152, %149 : vector<8x512xf32>
    %154 = arith.mulf %153, %149 : vector<8x512xf32>
    %155 = arith.mulf %154, %149 : vector<8x512xf32>
    %156 = arith.addf %149, %155 : vector<8x512xf32>
    %cst_64 = arith.constant 0.797884583 : f32
    %157 = vector.broadcast %cst_64 : f32 to vector<8x512xf32>
    %158 = arith.mulf %157, %156 : vector<8x512xf32>
    %159 = math.tanh %158 : vector<8x512xf32>
    %cst_65 = arith.constant 1.000000e+00 : f32
    %160 = vector.broadcast %cst_65 : f32 to vector<8x512xf32>
    %161 = arith.addf %160, %159 : vector<8x512xf32>
    %162 = arith.mulf %151, %161 : vector<8x512xf32>
    %163 = arith.truncf %162 : vector<8x512xf32> to vector<8x512xbf16>
    %c0_66 = arith.constant 0 : index
    %c0_67 = arith.constant 0 : index
    %c0_68 = arith.constant 0 : index
    %164 = vector.load %arg13[%c0_66, %c0_67, %c0_68] : memref<4x512x128xbf16, #tpu.memory_space<vmem>>, vector<1x512x128xbf16>
    %165 = vector.shape_cast %164 : vector<1x512x128xbf16> to vector<512x128xbf16>
    %cst_69 = arith.constant dense<0.000000e+00> : vector<8x128xf32>
    %166 = tpu.matmul %163, %165, %cst_69 {dimension_numbers = #tpu.dot_dimension_numbers<[1], [0], [0], [1], [0, 0, 1, 1], [], []>} : vector<8x512xbf16>, vector<512x128xbf16>, vector<8x128xf32> -> vector<8x128xf32>
    %c0_70 = arith.constant 0 : index
    %c0_71 = arith.constant 0 : index
    %c0_72 = arith.constant 0 : index
    %167 = vector.load %arg14[%c0_70, %c0_71, %c0_72] : memref<4x1x128xf32, #tpu.memory_space<vmem>>, vector<1x1x128xf32>
    %168 = vector.shape_cast %167 : vector<1x1x128xf32> to vector<1x128xf32>
    %169 = vector.broadcast %168 : vector<1x128xf32> to vector<8x128xf32>
    %170 = arith.addf %166, %169 : vector<8x128xf32>
    %171 = arith.addf %170, %141 : vector<8x128xf32>
    %c0_73 = arith.constant 0 : index
    %c0_74 = arith.constant 0 : index
    %c0_75 = arith.constant 0 : index
    %172 = vector.load %arg15[%c0_73, %c0_74, %c0_75] : memref<4x1x128xf32, #tpu.memory_space<vmem>>, vector<1x1x128xf32>
    %173 = vector.shape_cast %172 : vector<1x1x128xf32> to vector<1x128xf32>
    %c0_76 = arith.constant 0 : index
    %c0_77 = arith.constant 0 : index
    %c0_78 = arith.constant 0 : index
    %174 = vector.load %arg16[%c0_76, %c0_77, %c0_78] : memref<4x1x128xf32, #tpu.memory_space<vmem>>, vector<1x1x128xf32>
    %175 = vector.shape_cast %174 : vector<1x1x128xf32> to vector<1x128xf32>
    %cst_79 = arith.constant dense<0.000000e+00> : vector<8xf32>
    %176 = vector.multi_reduction <add>, %171, %cst_79 [1] : vector<8x128xf32> to vector<8xf32>
    %177 = vector.shape_cast %176 : vector<8xf32> to vector<8x1xf32>
    %cst_80 = arith.constant 1.280000e+02 : f32
    %178 = vector.broadcast %cst_80 : f32 to vector<8x1xf32>
    %179 = arith.divf %177, %178 : vector<8x1xf32>
    %180 = vector.broadcast %179 : vector<8x1xf32> to vector<8x128xf32>
    %181 = arith.subf %171, %180 : vector<8x128xf32>
    %182 = arith.mulf %181, %181 : vector<8x128xf32>
    %cst_81 = arith.constant dense<0.000000e+00> : vector<8xf32>
    %183 = vector.multi_reduction <add>, %182, %cst_81 [1] : vector<8x128xf32> to vector<8xf32>
    %184 = vector.shape_cast %183 : vector<8xf32> to vector<8x1xf32>
    %cst_82 = arith.constant 1.280000e+02 : f32
    %185 = vector.broadcast %cst_82 : f32 to vector<8x1xf32>
    %186 = arith.divf %184, %185 : vector<8x1xf32>
    %cst_83 = arith.constant 9.99999996E-13 : f32
    %187 = vector.broadcast %cst_83 : f32 to vector<8x1xf32>
    %188 = arith.addf %186, %187 : vector<8x1xf32>
    %189 = math.rsqrt %188 : vector<8x1xf32>
    %190 = vector.broadcast %189 : vector<8x1xf32> to vector<8x128xf32>
    %191 = arith.mulf %181, %190 : vector<8x128xf32>
    %192 = vector.broadcast %173 : vector<1x128xf32> to vector<8x128xf32>
    %193 = arith.mulf %191, %192 : vector<8x128xf32>
    %194 = vector.broadcast %175 : vector<1x128xf32> to vector<8x128xf32>
    %195 = arith.addf %193, %194 : vector<8x128xf32>
    %196 = arith.addf %26, %195 : vector<8x128xf32>
    %197 = arith.truncf %195 : vector<8x128xf32> to vector<8x128xbf16>
    %c1 = arith.constant 1 : index
    %c0_84 = arith.constant 0 : index
    %c0_85 = arith.constant 0 : index
    %198 = vector.load %arg5[%c1, %c0_84, %c0_85] : memref<4x128x384xbf16, #tpu.memory_space<vmem>>, vector<1x128x384xbf16>
    %199 = vector.shape_cast %198 : vector<1x128x384xbf16> to vector<128x384xbf16>
    %cst_86 = arith.constant dense<0.000000e+00> : vector<8x384xf32>
    %200 = tpu.matmul %197, %199, %cst_86 {dimension_numbers = #tpu.dot_dimension_numbers<[1], [0], [0], [1], [0, 0, 1, 1], [], []>} : vector<8x128xbf16>, vector<128x384xbf16>, vector<8x384xf32> -> vector<8x384xf32>
    %c1_87 = arith.constant 1 : index
    %c0_88 = arith.constant 0 : index
    %c0_89 = arith.constant 0 : index
    %201 = vector.load %arg6[%c1_87, %c0_88, %c0_89] : memref<4x1x384xf32, #tpu.memory_space<vmem>>, vector<1x1x384xf32>
    %202 = vector.shape_cast %201 : vector<1x1x384xf32> to vector<1x384xf32>
    %203 = vector.broadcast %202 : vector<1x384xf32> to vector<8x384xf32>
    %204 = arith.addf %200, %203 : vector<8x384xf32>
    %205 = arith.truncf %204 : vector<8x384xf32> to vector<8x384xbf16>
    %206 = vector.extract_strided_slice %205 {offsets = [0, 0], sizes = [8, 32], strides = [1, 1]} : vector<8x384xbf16> to vector<8x32xbf16>
    %207 = vector.extract_strided_slice %205 {offsets = [0, 128], sizes = [8, 32], strides = [1, 1]} : vector<8x384xbf16> to vector<8x32xbf16>
    %208 = vector.extract_strided_slice %205 {offsets = [0, 256], sizes = [8, 32], strides = [1, 1]} : vector<8x384xbf16> to vector<8x32xbf16>
    %cst_90 = arith.constant dense<0.000000e+00> : vector<8x8xf32>
    %209 = tpu.matmul %206, %207, %cst_90 {dimension_numbers = #tpu.dot_dimension_numbers<[1], [1], [0], [0], [0, 0, 1, 0], [], []>} : vector<8x32xbf16>, vector<8x32xbf16>, vector<8x8xf32> -> vector<8x8xf32>
    %210 = vector.broadcast %1 : vector<1x8xf32> to vector<8x8xf32>
    %211 = arith.addf %209, %210 : vector<8x8xf32>
    %cst_91 = arith.constant dense<0xFF800000> : vector<8xf32>
    %212 = vector.multi_reduction <maximumf>, %211, %cst_91 [1] : vector<8x8xf32> to vector<8xf32>
    %213 = vector.shape_cast %212 : vector<8xf32> to vector<8x1xf32>
    %214 = vector.broadcast %213 : vector<8x1xf32> to vector<8x8xf32>
    %215 = arith.subf %211, %214 : vector<8x8xf32>
    %216 = math.exp %215 : vector<8x8xf32>
    %cst_92 = arith.constant dense<0.000000e+00> : vector<8xf32>
    %217 = vector.multi_reduction <add>, %216, %cst_92 [1] : vector<8x8xf32> to vector<8xf32>
    %218 = vector.shape_cast %217 : vector<8xf32> to vector<8x1xf32>
    %219 = tpu.reciprocal %218 {approx = true} : vector<8x1xf32> -> vector<8x1xf32>
    %220 = vector.broadcast %219 : vector<8x1xf32> to vector<8x8xf32>
    %221 = arith.mulf %216, %220 : vector<8x8xf32>
    %222 = arith.truncf %221 : vector<8x8xf32> to vector<8x8xbf16>
    %cst_93 = arith.constant dense<0.000000e+00> : vector<8x32xf32>
    %223 = tpu.matmul %222, %208, %cst_93 {dimension_numbers = #tpu.dot_dimension_numbers<[1], [0], [0], [1], [0, 0, 1, 1], [], []>} : vector<8x8xbf16>, vector<8x32xbf16>, vector<8x32xf32> -> vector<8x32xf32>
    %224 = vector.extract_strided_slice %205 {offsets = [0, 32], sizes = [8, 32], strides = [1, 1]} : vector<8x384xbf16> to vector<8x32xbf16>
    %225 = vector.extract_strided_slice %205 {offsets = [0, 160], sizes = [8, 32], strides = [1, 1]} : vector<8x384xbf16> to vector<8x32xbf16>
    %226 = vector.extract_strided_slice %205 {offsets = [0, 288], sizes = [8, 32], strides = [1, 1]} : vector<8x384xbf16> to vector<8x32xbf16>
    %cst_94 = arith.constant dense<0.000000e+00> : vector<8x8xf32>
    %227 = tpu.matmul %224, %225, %cst_94 {dimension_numbers = #tpu.dot_dimension_numbers<[1], [1], [0], [0], [0, 0, 1, 0], [], []>} : vector<8x32xbf16>, vector<8x32xbf16>, vector<8x8xf32> -> vector<8x8xf32>
    %228 = vector.broadcast %1 : vector<1x8xf32> to vector<8x8xf32>
    %229 = arith.addf %227, %228 : vector<8x8xf32>
    %cst_95 = arith.constant dense<0xFF800000> : vector<8xf32>
    %230 = vector.multi_reduction <maximumf>, %229, %cst_95 [1] : vector<8x8xf32> to vector<8xf32>
    %231 = vector.shape_cast %230 : vector<8xf32> to vector<8x1xf32>
    %232 = vector.broadcast %231 : vector<8x1xf32> to vector<8x8xf32>
    %233 = arith.subf %229, %232 : vector<8x8xf32>
    %234 = math.exp %233 : vector<8x8xf32>
    %cst_96 = arith.constant dense<0.000000e+00> : vector<8xf32>
    %235 = vector.multi_reduction <add>, %234, %cst_96 [1] : vector<8x8xf32> to vector<8xf32>
    %236 = vector.shape_cast %235 : vector<8xf32> to vector<8x1xf32>
    %237 = tpu.reciprocal %236 {approx = true} : vector<8x1xf32> -> vector<8x1xf32>
    %238 = vector.broadcast %237 : vector<8x1xf32> to vector<8x8xf32>
    %239 = arith.mulf %234, %238 : vector<8x8xf32>
    %240 = arith.truncf %239 : vector<8x8xf32> to vector<8x8xbf16>
    %cst_97 = arith.constant dense<0.000000e+00> : vector<8x32xf32>
    %241 = tpu.matmul %240, %226, %cst_97 {dimension_numbers = #tpu.dot_dimension_numbers<[1], [0], [0], [1], [0, 0, 1, 1], [], []>} : vector<8x8xbf16>, vector<8x32xbf16>, vector<8x32xf32> -> vector<8x32xf32>
    %242 = vector.extract_strided_slice %205 {offsets = [0, 64], sizes = [8, 32], strides = [1, 1]} : vector<8x384xbf16> to vector<8x32xbf16>
    %243 = vector.extract_strided_slice %205 {offsets = [0, 192], sizes = [8, 32], strides = [1, 1]} : vector<8x384xbf16> to vector<8x32xbf16>
    %244 = vector.extract_strided_slice %205 {offsets = [0, 320], sizes = [8, 32], strides = [1, 1]} : vector<8x384xbf16> to vector<8x32xbf16>
    %cst_98 = arith.constant dense<0.000000e+00> : vector<8x8xf32>
    %245 = tpu.matmul %242, %243, %cst_98 {dimension_numbers = #tpu.dot_dimension_numbers<[1], [1], [0], [0], [0, 0, 1, 0], [], []>} : vector<8x32xbf16>, vector<8x32xbf16>, vector<8x8xf32> -> vector<8x8xf32>
    %246 = vector.broadcast %1 : vector<1x8xf32> to vector<8x8xf32>
    %247 = arith.addf %245, %246 : vector<8x8xf32>
    %cst_99 = arith.constant dense<0xFF800000> : vector<8xf32>
    %248 = vector.multi_reduction <maximumf>, %247, %cst_99 [1] : vector<8x8xf32> to vector<8xf32>
    %249 = vector.shape_cast %248 : vector<8xf32> to vector<8x1xf32>
    %250 = vector.broadcast %249 : vector<8x1xf32> to vector<8x8xf32>
    %251 = arith.subf %247, %250 : vector<8x8xf32>
    %252 = math.exp %251 : vector<8x8xf32>
    %cst_100 = arith.constant dense<0.000000e+00> : vector<8xf32>
    %253 = vector.multi_reduction <add>, %252, %cst_100 [1] : vector<8x8xf32> to vector<8xf32>
    %254 = vector.shape_cast %253 : vector<8xf32> to vector<8x1xf32>
    %255 = tpu.reciprocal %254 {approx = true} : vector<8x1xf32> -> vector<8x1xf32>
    %256 = vector.broadcast %255 : vector<8x1xf32> to vector<8x8xf32>
    %257 = arith.mulf %252, %256 : vector<8x8xf32>
    %258 = arith.truncf %257 : vector<8x8xf32> to vector<8x8xbf16>
    %cst_101 = arith.constant dense<0.000000e+00> : vector<8x32xf32>
    %259 = tpu.matmul %258, %244, %cst_101 {dimension_numbers = #tpu.dot_dimension_numbers<[1], [0], [0], [1], [0, 0, 1, 1], [], []>} : vector<8x8xbf16>, vector<8x32xbf16>, vector<8x32xf32> -> vector<8x32xf32>
    %260 = vector.extract_strided_slice %205 {offsets = [0, 96], sizes = [8, 32], strides = [1, 1]} : vector<8x384xbf16> to vector<8x32xbf16>
    %261 = vector.extract_strided_slice %205 {offsets = [0, 224], sizes = [8, 32], strides = [1, 1]} : vector<8x384xbf16> to vector<8x32xbf16>
    %262 = vector.extract_strided_slice %205 {offsets = [0, 352], sizes = [8, 32], strides = [1, 1]} : vector<8x384xbf16> to vector<8x32xbf16>
    %cst_102 = arith.constant dense<0.000000e+00> : vector<8x8xf32>
    %263 = tpu.matmul %260, %261, %cst_102 {dimension_numbers = #tpu.dot_dimension_numbers<[1], [1], [0], [0], [0, 0, 1, 0], [], []>} : vector<8x32xbf16>, vector<8x32xbf16>, vector<8x8xf32> -> vector<8x8xf32>
    %264 = vector.broadcast %1 : vector<1x8xf32> to vector<8x8xf32>
    %265 = arith.addf %263, %264 : vector<8x8xf32>
    %cst_103 = arith.constant dense<0xFF800000> : vector<8xf32>
    %266 = vector.multi_reduction <maximumf>, %265, %cst_103 [1] : vector<8x8xf32> to vector<8xf32>
    %267 = vector.shape_cast %266 : vector<8xf32> to vector<8x1xf32>
    %268 = vector.broadcast %267 : vector<8x1xf32> to vector<8x8xf32>
    %269 = arith.subf %265, %268 : vector<8x8xf32>
    %270 = math.exp %269 : vector<8x8xf32>
    %cst_104 = arith.constant dense<0.000000e+00> : vector<8xf32>
    %271 = vector.multi_reduction <add>, %270, %cst_104 [1] : vector<8x8xf32> to vector<8xf32>
    %272 = vector.shape_cast %271 : vector<8xf32> to vector<8x1xf32>
    %273 = tpu.reciprocal %272 {approx = true} : vector<8x1xf32> -> vector<8x1xf32>
    %274 = vector.broadcast %273 : vector<8x1xf32> to vector<8x8xf32>
    %275 = arith.mulf %270, %274 : vector<8x8xf32>
    %276 = arith.truncf %275 : vector<8x8xf32> to vector<8x8xbf16>
    %cst_105 = arith.constant dense<0.000000e+00> : vector<8x32xf32>
    %277 = tpu.matmul %276, %262, %cst_105 {dimension_numbers = #tpu.dot_dimension_numbers<[1], [0], [0], [1], [0, 0, 1, 1], [], []>} : vector<8x8xbf16>, vector<8x32xbf16>, vector<8x32xf32> -> vector<8x32xf32>
    %278 = tpu.concatenate %223, %241, %259, %277 in 1 : vector<8x32xf32>, vector<8x32xf32>, vector<8x32xf32>, vector<8x32xf32> -> vector<8x128xf32>
    %279 = arith.truncf %278 : vector<8x128xf32> to vector<8x128xbf16>
    %c1_106 = arith.constant 1 : index
    %c0_107 = arith.constant 0 : index
    %c0_108 = arith.constant 0 : index
    %280 = vector.load %arg7[%c1_106, %c0_107, %c0_108] : memref<4x128x128xbf16, #tpu.memory_space<vmem>>, vector<1x128x128xbf16>
    %281 = vector.shape_cast %280 : vector<1x128x128xbf16> to vector<128x128xbf16>
    %cst_109 = arith.constant dense<0.000000e+00> : vector<8x128xf32>
    %282 = tpu.matmul %279, %281, %cst_109 {dimension_numbers = #tpu.dot_dimension_numbers<[1], [0], [0], [1], [0, 0, 1, 1], [], []>} : vector<8x128xbf16>, vector<128x128xbf16>, vector<8x128xf32> -> vector<8x128xf32>
    %c1_110 = arith.constant 1 : index
    %c0_111 = arith.constant 0 : index
    %c0_112 = arith.constant 0 : index
    %283 = vector.load %arg8[%c1_110, %c0_111, %c0_112] : memref<4x1x128xf32, #tpu.memory_space<vmem>>, vector<1x1x128xf32>
    %284 = vector.shape_cast %283 : vector<1x1x128xf32> to vector<1x128xf32>
    %285 = vector.broadcast %284 : vector<1x128xf32> to vector<8x128xf32>
    %286 = arith.addf %282, %285 : vector<8x128xf32>
    %287 = arith.addf %286, %195 : vector<8x128xf32>
    %c1_113 = arith.constant 1 : index
    %c0_114 = arith.constant 0 : index
    %c0_115 = arith.constant 0 : index
    %288 = vector.load %arg9[%c1_113, %c0_114, %c0_115] : memref<4x1x128xf32, #tpu.memory_space<vmem>>, vector<1x1x128xf32>
    %289 = vector.shape_cast %288 : vector<1x1x128xf32> to vector<1x128xf32>
    %c1_116 = arith.constant 1 : index
    %c0_117 = arith.constant 0 : index
    %c0_118 = arith.constant 0 : index
    %290 = vector.load %arg10[%c1_116, %c0_117, %c0_118] : memref<4x1x128xf32, #tpu.memory_space<vmem>>, vector<1x1x128xf32>
    %291 = vector.shape_cast %290 : vector<1x1x128xf32> to vector<1x128xf32>
    %cst_119 = arith.constant dense<0.000000e+00> : vector<8xf32>
    %292 = vector.multi_reduction <add>, %287, %cst_119 [1] : vector<8x128xf32> to vector<8xf32>
    %293 = vector.shape_cast %292 : vector<8xf32> to vector<8x1xf32>
    %cst_120 = arith.constant 1.280000e+02 : f32
    %294 = vector.broadcast %cst_120 : f32 to vector<8x1xf32>
    %295 = arith.divf %293, %294 : vector<8x1xf32>
    %296 = vector.broadcast %295 : vector<8x1xf32> to vector<8x128xf32>
    %297 = arith.subf %287, %296 : vector<8x128xf32>
    %298 = arith.mulf %297, %297 : vector<8x128xf32>
    %cst_121 = arith.constant dense<0.000000e+00> : vector<8xf32>
    %299 = vector.multi_reduction <add>, %298, %cst_121 [1] : vector<8x128xf32> to vector<8xf32>
    %300 = vector.shape_cast %299 : vector<8xf32> to vector<8x1xf32>
    %cst_122 = arith.constant 1.280000e+02 : f32
    %301 = vector.broadcast %cst_122 : f32 to vector<8x1xf32>
    %302 = arith.divf %300, %301 : vector<8x1xf32>
    %cst_123 = arith.constant 9.99999996E-13 : f32
    %303 = vector.broadcast %cst_123 : f32 to vector<8x1xf32>
    %304 = arith.addf %302, %303 : vector<8x1xf32>
    %305 = math.rsqrt %304 : vector<8x1xf32>
    %306 = vector.broadcast %305 : vector<8x1xf32> to vector<8x128xf32>
    %307 = arith.mulf %297, %306 : vector<8x128xf32>
    %308 = vector.broadcast %289 : vector<1x128xf32> to vector<8x128xf32>
    %309 = arith.mulf %307, %308 : vector<8x128xf32>
    %310 = vector.broadcast %291 : vector<1x128xf32> to vector<8x128xf32>
    %311 = arith.addf %309, %310 : vector<8x128xf32>
    %312 = arith.truncf %311 : vector<8x128xf32> to vector<8x128xbf16>
    %c1_124 = arith.constant 1 : index
    %c0_125 = arith.constant 0 : index
    %c0_126 = arith.constant 0 : index
    %313 = vector.load %arg11[%c1_124, %c0_125, %c0_126] : memref<4x128x512xbf16, #tpu.memory_space<vmem>>, vector<1x128x512xbf16>
    %314 = vector.shape_cast %313 : vector<1x128x512xbf16> to vector<128x512xbf16>
    %cst_127 = arith.constant dense<0.000000e+00> : vector<8x512xf32>
    %315 = tpu.matmul %312, %314, %cst_127 {dimension_numbers = #tpu.dot_dimension_numbers<[1], [0], [0], [1], [0, 0, 1, 1], [], []>} : vector<8x128xbf16>, vector<128x512xbf16>, vector<8x512xf32> -> vector<8x512xf32>
    %c1_128 = arith.constant 1 : index
    %c0_129 = arith.constant 0 : index
    %c0_130 = arith.constant 0 : index
    %316 = vector.load %arg12[%c1_128, %c0_129, %c0_130] : memref<4x1x512xf32, #tpu.memory_space<vmem>>, vector<1x1x512xf32>
    %317 = vector.shape_cast %316 : vector<1x1x512xf32> to vector<1x512xf32>
    %318 = vector.broadcast %317 : vector<1x512xf32> to vector<8x512xf32>
    %319 = arith.addf %315, %318 : vector<8x512xf32>
    %cst_131 = arith.constant 5.000000e-01 : f32
    %320 = vector.broadcast %cst_131 : f32 to vector<8x512xf32>
    %321 = arith.mulf %320, %319 : vector<8x512xf32>
    %cst_132 = arith.constant 4.471500e-02 : f32
    %322 = vector.broadcast %cst_132 : f32 to vector<8x512xf32>
    %323 = arith.mulf %322, %319 : vector<8x512xf32>
    %324 = arith.mulf %323, %319 : vector<8x512xf32>
    %325 = arith.mulf %324, %319 : vector<8x512xf32>
    %326 = arith.addf %319, %325 : vector<8x512xf32>
    %cst_133 = arith.constant 0.797884583 : f32
    %327 = vector.broadcast %cst_133 : f32 to vector<8x512xf32>
    %328 = arith.mulf %327, %326 : vector<8x512xf32>
    %329 = math.tanh %328 : vector<8x512xf32>
    %cst_134 = arith.constant 1.000000e+00 : f32
    %330 = vector.broadcast %cst_134 : f32 to vector<8x512xf32>
    %331 = arith.addf %330, %329 : vector<8x512xf32>
    %332 = arith.mulf %321, %331 : vector<8x512xf32>
    %333 = arith.truncf %332 : vector<8x512xf32> to vector<8x512xbf16>
    %c1_135 = arith.constant 1 : index
    %c0_136 = arith.constant 0 : index
    %c0_137 = arith.constant 0 : index
    %334 = vector.load %arg13[%c1_135, %c0_136, %c0_137] : memref<4x512x128xbf16, #tpu.memory_space<vmem>>, vector<1x512x128xbf16>
    %335 = vector.shape_cast %334 : vector<1x512x128xbf16> to vector<512x128xbf16>
    %cst_138 = arith.constant dense<0.000000e+00> : vector<8x128xf32>
    %336 = tpu.matmul %333, %335, %cst_138 {dimension_numbers = #tpu.dot_dimension_numbers<[1], [0], [0], [1], [0, 0, 1, 1], [], []>} : vector<8x512xbf16>, vector<512x128xbf16>, vector<8x128xf32> -> vector<8x128xf32>
    %c1_139 = arith.constant 1 : index
    %c0_140 = arith.constant 0 : index
    %c0_141 = arith.constant 0 : index
    %337 = vector.load %arg14[%c1_139, %c0_140, %c0_141] : memref<4x1x128xf32, #tpu.memory_space<vmem>>, vector<1x1x128xf32>
    %338 = vector.shape_cast %337 : vector<1x1x128xf32> to vector<1x128xf32>
    %339 = vector.broadcast %338 : vector<1x128xf32> to vector<8x128xf32>
    %340 = arith.addf %336, %339 : vector<8x128xf32>
    %341 = arith.addf %340, %311 : vector<8x128xf32>
    %c1_142 = arith.constant 1 : index
    %c0_143 = arith.constant 0 : index
    %c0_144 = arith.constant 0 : index
    %342 = vector.load %arg15[%c1_142, %c0_143, %c0_144] : memref<4x1x128xf32, #tpu.memory_space<vmem>>, vector<1x1x128xf32>
    %343 = vector.shape_cast %342 : vector<1x1x128xf32> to vector<1x128xf32>
    %c1_145 = arith.constant 1 : index
    %c0_146 = arith.constant 0 : index
    %c0_147 = arith.constant 0 : index
    %344 = vector.load %arg16[%c1_145, %c0_146, %c0_147] : memref<4x1x128xf32, #tpu.memory_space<vmem>>, vector<1x1x128xf32>
    %345 = vector.shape_cast %344 : vector<1x1x128xf32> to vector<1x128xf32>
    %cst_148 = arith.constant dense<0.000000e+00> : vector<8xf32>
    %346 = vector.multi_reduction <add>, %341, %cst_148 [1] : vector<8x128xf32> to vector<8xf32>
    %347 = vector.shape_cast %346 : vector<8xf32> to vector<8x1xf32>
    %cst_149 = arith.constant 1.280000e+02 : f32
    %348 = vector.broadcast %cst_149 : f32 to vector<8x1xf32>
    %349 = arith.divf %347, %348 : vector<8x1xf32>
    %350 = vector.broadcast %349 : vector<8x1xf32> to vector<8x128xf32>
    %351 = arith.subf %341, %350 : vector<8x128xf32>
    %352 = arith.mulf %351, %351 : vector<8x128xf32>
    %cst_150 = arith.constant dense<0.000000e+00> : vector<8xf32>
    %353 = vector.multi_reduction <add>, %352, %cst_150 [1] : vector<8x128xf32> to vector<8xf32>
    %354 = vector.shape_cast %353 : vector<8xf32> to vector<8x1xf32>
    %cst_151 = arith.constant 1.280000e+02 : f32
    %355 = vector.broadcast %cst_151 : f32 to vector<8x1xf32>
    %356 = arith.divf %354, %355 : vector<8x1xf32>
    %cst_152 = arith.constant 9.99999996E-13 : f32
    %357 = vector.broadcast %cst_152 : f32 to vector<8x1xf32>
    %358 = arith.addf %356, %357 : vector<8x1xf32>
    %359 = math.rsqrt %358 : vector<8x1xf32>
    %360 = vector.broadcast %359 : vector<8x1xf32> to vector<8x128xf32>
    %361 = arith.mulf %351, %360 : vector<8x128xf32>
    %362 = vector.broadcast %343 : vector<1x128xf32> to vector<8x128xf32>
    %363 = arith.mulf %361, %362 : vector<8x128xf32>
    %364 = vector.broadcast %345 : vector<1x128xf32> to vector<8x128xf32>
    %365 = arith.addf %363, %364 : vector<8x128xf32>
    %366 = arith.addf %196, %365 : vector<8x128xf32>
    %367 = arith.truncf %365 : vector<8x128xf32> to vector<8x128xbf16>
    %c2 = arith.constant 2 : index
    %c0_153 = arith.constant 0 : index
    %c0_154 = arith.constant 0 : index
    %368 = vector.load %arg5[%c2, %c0_153, %c0_154] : memref<4x128x384xbf16, #tpu.memory_space<vmem>>, vector<1x128x384xbf16>
    %369 = vector.shape_cast %368 : vector<1x128x384xbf16> to vector<128x384xbf16>
    %cst_155 = arith.constant dense<0.000000e+00> : vector<8x384xf32>
    %370 = tpu.matmul %367, %369, %cst_155 {dimension_numbers = #tpu.dot_dimension_numbers<[1], [0], [0], [1], [0, 0, 1, 1], [], []>} : vector<8x128xbf16>, vector<128x384xbf16>, vector<8x384xf32> -> vector<8x384xf32>
    %c2_156 = arith.constant 2 : index
    %c0_157 = arith.constant 0 : index
    %c0_158 = arith.constant 0 : index
    %371 = vector.load %arg6[%c2_156, %c0_157, %c0_158] : memref<4x1x384xf32, #tpu.memory_space<vmem>>, vector<1x1x384xf32>
    %372 = vector.shape_cast %371 : vector<1x1x384xf32> to vector<1x384xf32>
    %373 = vector.broadcast %372 : vector<1x384xf32> to vector<8x384xf32>
    %374 = arith.addf %370, %373 : vector<8x384xf32>
    %375 = arith.truncf %374 : vector<8x384xf32> to vector<8x384xbf16>
    %376 = vector.extract_strided_slice %375 {offsets = [0, 0], sizes = [8, 32], strides = [1, 1]} : vector<8x384xbf16> to vector<8x32xbf16>
    %377 = vector.extract_strided_slice %375 {offsets = [0, 128], sizes = [8, 32], strides = [1, 1]} : vector<8x384xbf16> to vector<8x32xbf16>
    %378 = vector.extract_strided_slice %375 {offsets = [0, 256], sizes = [8, 32], strides = [1, 1]} : vector<8x384xbf16> to vector<8x32xbf16>
    %cst_159 = arith.constant dense<0.000000e+00> : vector<8x8xf32>
    %379 = tpu.matmul %376, %377, %cst_159 {dimension_numbers = #tpu.dot_dimension_numbers<[1], [1], [0], [0], [0, 0, 1, 0], [], []>} : vector<8x32xbf16>, vector<8x32xbf16>, vector<8x8xf32> -> vector<8x8xf32>
    %380 = vector.broadcast %1 : vector<1x8xf32> to vector<8x8xf32>
    %381 = arith.addf %379, %380 : vector<8x8xf32>
    %cst_160 = arith.constant dense<0xFF800000> : vector<8xf32>
    %382 = vector.multi_reduction <maximumf>, %381, %cst_160 [1] : vector<8x8xf32> to vector<8xf32>
    %383 = vector.shape_cast %382 : vector<8xf32> to vector<8x1xf32>
    %384 = vector.broadcast %383 : vector<8x1xf32> to vector<8x8xf32>
    %385 = arith.subf %381, %384 : vector<8x8xf32>
    %386 = math.exp %385 : vector<8x8xf32>
    %cst_161 = arith.constant dense<0.000000e+00> : vector<8xf32>
    %387 = vector.multi_reduction <add>, %386, %cst_161 [1] : vector<8x8xf32> to vector<8xf32>
    %388 = vector.shape_cast %387 : vector<8xf32> to vector<8x1xf32>
    %389 = tpu.reciprocal %388 {approx = true} : vector<8x1xf32> -> vector<8x1xf32>
    %390 = vector.broadcast %389 : vector<8x1xf32> to vector<8x8xf32>
    %391 = arith.mulf %386, %390 : vector<8x8xf32>
    %392 = arith.truncf %391 : vector<8x8xf32> to vector<8x8xbf16>
    %cst_162 = arith.constant dense<0.000000e+00> : vector<8x32xf32>
    %393 = tpu.matmul %392, %378, %cst_162 {dimension_numbers = #tpu.dot_dimension_numbers<[1], [0], [0], [1], [0, 0, 1, 1], [], []>} : vector<8x8xbf16>, vector<8x32xbf16>, vector<8x32xf32> -> vector<8x32xf32>
    %394 = vector.extract_strided_slice %375 {offsets = [0, 32], sizes = [8, 32], strides = [1, 1]} : vector<8x384xbf16> to vector<8x32xbf16>
    %395 = vector.extract_strided_slice %375 {offsets = [0, 160], sizes = [8, 32], strides = [1, 1]} : vector<8x384xbf16> to vector<8x32xbf16>
    %396 = vector.extract_strided_slice %375 {offsets = [0, 288], sizes = [8, 32], strides = [1, 1]} : vector<8x384xbf16> to vector<8x32xbf16>
    %cst_163 = arith.constant dense<0.000000e+00> : vector<8x8xf32>
    %397 = tpu.matmul %394, %395, %cst_163 {dimension_numbers = #tpu.dot_dimension_numbers<[1], [1], [0], [0], [0, 0, 1, 0], [], []>} : vector<8x32xbf16>, vector<8x32xbf16>, vector<8x8xf32> -> vector<8x8xf32>
    %398 = vector.broadcast %1 : vector<1x8xf32> to vector<8x8xf32>
    %399 = arith.addf %397, %398 : vector<8x8xf32>
    %cst_164 = arith.constant dense<0xFF800000> : vector<8xf32>
    %400 = vector.multi_reduction <maximumf>, %399, %cst_164 [1] : vector<8x8xf32> to vector<8xf32>
    %401 = vector.shape_cast %400 : vector<8xf32> to vector<8x1xf32>
    %402 = vector.broadcast %401 : vector<8x1xf32> to vector<8x8xf32>
    %403 = arith.subf %399, %402 : vector<8x8xf32>
    %404 = math.exp %403 : vector<8x8xf32>
    %cst_165 = arith.constant dense<0.000000e+00> : vector<8xf32>
    %405 = vector.multi_reduction <add>, %404, %cst_165 [1] : vector<8x8xf32> to vector<8xf32>
    %406 = vector.shape_cast %405 : vector<8xf32> to vector<8x1xf32>
    %407 = tpu.reciprocal %406 {approx = true} : vector<8x1xf32> -> vector<8x1xf32>
    %408 = vector.broadcast %407 : vector<8x1xf32> to vector<8x8xf32>
    %409 = arith.mulf %404, %408 : vector<8x8xf32>
    %410 = arith.truncf %409 : vector<8x8xf32> to vector<8x8xbf16>
    %cst_166 = arith.constant dense<0.000000e+00> : vector<8x32xf32>
    %411 = tpu.matmul %410, %396, %cst_166 {dimension_numbers = #tpu.dot_dimension_numbers<[1], [0], [0], [1], [0, 0, 1, 1], [], []>} : vector<8x8xbf16>, vector<8x32xbf16>, vector<8x32xf32> -> vector<8x32xf32>
    %412 = vector.extract_strided_slice %375 {offsets = [0, 64], sizes = [8, 32], strides = [1, 1]} : vector<8x384xbf16> to vector<8x32xbf16>
    %413 = vector.extract_strided_slice %375 {offsets = [0, 192], sizes = [8, 32], strides = [1, 1]} : vector<8x384xbf16> to vector<8x32xbf16>
    %414 = vector.extract_strided_slice %375 {offsets = [0, 320], sizes = [8, 32], strides = [1, 1]} : vector<8x384xbf16> to vector<8x32xbf16>
    %cst_167 = arith.constant dense<0.000000e+00> : vector<8x8xf32>
    %415 = tpu.matmul %412, %413, %cst_167 {dimension_numbers = #tpu.dot_dimension_numbers<[1], [1], [0], [0], [0, 0, 1, 0], [], []>} : vector<8x32xbf16>, vector<8x32xbf16>, vector<8x8xf32> -> vector<8x8xf32>
    %416 = vector.broadcast %1 : vector<1x8xf32> to vector<8x8xf32>
    %417 = arith.addf %415, %416 : vector<8x8xf32>
    %cst_168 = arith.constant dense<0xFF800000> : vector<8xf32>
    %418 = vector.multi_reduction <maximumf>, %417, %cst_168 [1] : vector<8x8xf32> to vector<8xf32>
    %419 = vector.shape_cast %418 : vector<8xf32> to vector<8x1xf32>
    %420 = vector.broadcast %419 : vector<8x1xf32> to vector<8x8xf32>
    %421 = arith.subf %417, %420 : vector<8x8xf32>
    %422 = math.exp %421 : vector<8x8xf32>
    %cst_169 = arith.constant dense<0.000000e+00> : vector<8xf32>
    %423 = vector.multi_reduction <add>, %422, %cst_169 [1] : vector<8x8xf32> to vector<8xf32>
    %424 = vector.shape_cast %423 : vector<8xf32> to vector<8x1xf32>
    %425 = tpu.reciprocal %424 {approx = true} : vector<8x1xf32> -> vector<8x1xf32>
    %426 = vector.broadcast %425 : vector<8x1xf32> to vector<8x8xf32>
    %427 = arith.mulf %422, %426 : vector<8x8xf32>
    %428 = arith.truncf %427 : vector<8x8xf32> to vector<8x8xbf16>
    %cst_170 = arith.constant dense<0.000000e+00> : vector<8x32xf32>
    %429 = tpu.matmul %428, %414, %cst_170 {dimension_numbers = #tpu.dot_dimension_numbers<[1], [0], [0], [1], [0, 0, 1, 1], [], []>} : vector<8x8xbf16>, vector<8x32xbf16>, vector<8x32xf32> -> vector<8x32xf32>
    %430 = vector.extract_strided_slice %375 {offsets = [0, 96], sizes = [8, 32], strides = [1, 1]} : vector<8x384xbf16> to vector<8x32xbf16>
    %431 = vector.extract_strided_slice %375 {offsets = [0, 224], sizes = [8, 32], strides = [1, 1]} : vector<8x384xbf16> to vector<8x32xbf16>
    %432 = vector.extract_strided_slice %375 {offsets = [0, 352], sizes = [8, 32], strides = [1, 1]} : vector<8x384xbf16> to vector<8x32xbf16>
    %cst_171 = arith.constant dense<0.000000e+00> : vector<8x8xf32>
    %433 = tpu.matmul %430, %431, %cst_171 {dimension_numbers = #tpu.dot_dimension_numbers<[1], [1], [0], [0], [0, 0, 1, 0], [], []>} : vector<8x32xbf16>, vector<8x32xbf16>, vector<8x8xf32> -> vector<8x8xf32>
    %434 = vector.broadcast %1 : vector<1x8xf32> to vector<8x8xf32>
    %435 = arith.addf %433, %434 : vector<8x8xf32>
    %cst_172 = arith.constant dense<0xFF800000> : vector<8xf32>
    %436 = vector.multi_reduction <maximumf>, %435, %cst_172 [1] : vector<8x8xf32> to vector<8xf32>
    %437 = vector.shape_cast %436 : vector<8xf32> to vector<8x1xf32>
    %438 = vector.broadcast %437 : vector<8x1xf32> to vector<8x8xf32>
    %439 = arith.subf %435, %438 : vector<8x8xf32>
    %440 = math.exp %439 : vector<8x8xf32>
    %cst_173 = arith.constant dense<0.000000e+00> : vector<8xf32>
    %441 = vector.multi_reduction <add>, %440, %cst_173 [1] : vector<8x8xf32> to vector<8xf32>
    %442 = vector.shape_cast %441 : vector<8xf32> to vector<8x1xf32>
    %443 = tpu.reciprocal %442 {approx = true} : vector<8x1xf32> -> vector<8x1xf32>
    %444 = vector.broadcast %443 : vector<8x1xf32> to vector<8x8xf32>
    %445 = arith.mulf %440, %444 : vector<8x8xf32>
    %446 = arith.truncf %445 : vector<8x8xf32> to vector<8x8xbf16>
    %cst_174 = arith.constant dense<0.000000e+00> : vector<8x32xf32>
    %447 = tpu.matmul %446, %432, %cst_174 {dimension_numbers = #tpu.dot_dimension_numbers<[1], [0], [0], [1], [0, 0, 1, 1], [], []>} : vector<8x8xbf16>, vector<8x32xbf16>, vector<8x32xf32> -> vector<8x32xf32>
    %448 = tpu.concatenate %393, %411, %429, %447 in 1 : vector<8x32xf32>, vector<8x32xf32>, vector<8x32xf32>, vector<8x32xf32> -> vector<8x128xf32>
    %449 = arith.truncf %448 : vector<8x128xf32> to vector<8x128xbf16>
    %c2_175 = arith.constant 2 : index
    %c0_176 = arith.constant 0 : index
    %c0_177 = arith.constant 0 : index
    %450 = vector.load %arg7[%c2_175, %c0_176, %c0_177] : memref<4x128x128xbf16, #tpu.memory_space<vmem>>, vector<1x128x128xbf16>
    %451 = vector.shape_cast %450 : vector<1x128x128xbf16> to vector<128x128xbf16>
    %cst_178 = arith.constant dense<0.000000e+00> : vector<8x128xf32>
    %452 = tpu.matmul %449, %451, %cst_178 {dimension_numbers = #tpu.dot_dimension_numbers<[1], [0], [0], [1], [0, 0, 1, 1], [], []>} : vector<8x128xbf16>, vector<128x128xbf16>, vector<8x128xf32> -> vector<8x128xf32>
    %c2_179 = arith.constant 2 : index
    %c0_180 = arith.constant 0 : index
    %c0_181 = arith.constant 0 : index
    %453 = vector.load %arg8[%c2_179, %c0_180, %c0_181] : memref<4x1x128xf32, #tpu.memory_space<vmem>>, vector<1x1x128xf32>
    %454 = vector.shape_cast %453 : vector<1x1x128xf32> to vector<1x128xf32>
    %455 = vector.broadcast %454 : vector<1x128xf32> to vector<8x128xf32>
    %456 = arith.addf %452, %455 : vector<8x128xf32>
    %457 = arith.addf %456, %365 : vector<8x128xf32>
    %c2_182 = arith.constant 2 : index
    %c0_183 = arith.constant 0 : index
    %c0_184 = arith.constant 0 : index
    %458 = vector.load %arg9[%c2_182, %c0_183, %c0_184] : memref<4x1x128xf32, #tpu.memory_space<vmem>>, vector<1x1x128xf32>
    %459 = vector.shape_cast %458 : vector<1x1x128xf32> to vector<1x128xf32>
    %c2_185 = arith.constant 2 : index
    %c0_186 = arith.constant 0 : index
    %c0_187 = arith.constant 0 : index
    %460 = vector.load %arg10[%c2_185, %c0_186, %c0_187] : memref<4x1x128xf32, #tpu.memory_space<vmem>>, vector<1x1x128xf32>
    %461 = vector.shape_cast %460 : vector<1x1x128xf32> to vector<1x128xf32>
    %cst_188 = arith.constant dense<0.000000e+00> : vector<8xf32>
    %462 = vector.multi_reduction <add>, %457, %cst_188 [1] : vector<8x128xf32> to vector<8xf32>
    %463 = vector.shape_cast %462 : vector<8xf32> to vector<8x1xf32>
    %cst_189 = arith.constant 1.280000e+02 : f32
    %464 = vector.broadcast %cst_189 : f32 to vector<8x1xf32>
    %465 = arith.divf %463, %464 : vector<8x1xf32>
    %466 = vector.broadcast %465 : vector<8x1xf32> to vector<8x128xf32>
    %467 = arith.subf %457, %466 : vector<8x128xf32>
    %468 = arith.mulf %467, %467 : vector<8x128xf32>
    %cst_190 = arith.constant dense<0.000000e+00> : vector<8xf32>
    %469 = vector.multi_reduction <add>, %468, %cst_190 [1] : vector<8x128xf32> to vector<8xf32>
    %470 = vector.shape_cast %469 : vector<8xf32> to vector<8x1xf32>
    %cst_191 = arith.constant 1.280000e+02 : f32
    %471 = vector.broadcast %cst_191 : f32 to vector<8x1xf32>
    %472 = arith.divf %470, %471 : vector<8x1xf32>
    %cst_192 = arith.constant 9.99999996E-13 : f32
    %473 = vector.broadcast %cst_192 : f32 to vector<8x1xf32>
    %474 = arith.addf %472, %473 : vector<8x1xf32>
    %475 = math.rsqrt %474 : vector<8x1xf32>
    %476 = vector.broadcast %475 : vector<8x1xf32> to vector<8x128xf32>
    %477 = arith.mulf %467, %476 : vector<8x128xf32>
    %478 = vector.broadcast %459 : vector<1x128xf32> to vector<8x128xf32>
    %479 = arith.mulf %477, %478 : vector<8x128xf32>
    %480 = vector.broadcast %461 : vector<1x128xf32> to vector<8x128xf32>
    %481 = arith.addf %479, %480 : vector<8x128xf32>
    %482 = arith.truncf %481 : vector<8x128xf32> to vector<8x128xbf16>
    %c2_193 = arith.constant 2 : index
    %c0_194 = arith.constant 0 : index
    %c0_195 = arith.constant 0 : index
    %483 = vector.load %arg11[%c2_193, %c0_194, %c0_195] : memref<4x128x512xbf16, #tpu.memory_space<vmem>>, vector<1x128x512xbf16>
    %484 = vector.shape_cast %483 : vector<1x128x512xbf16> to vector<128x512xbf16>
    %cst_196 = arith.constant dense<0.000000e+00> : vector<8x512xf32>
    %485 = tpu.matmul %482, %484, %cst_196 {dimension_numbers = #tpu.dot_dimension_numbers<[1], [0], [0], [1], [0, 0, 1, 1], [], []>} : vector<8x128xbf16>, vector<128x512xbf16>, vector<8x512xf32> -> vector<8x512xf32>
    %c2_197 = arith.constant 2 : index
    %c0_198 = arith.constant 0 : index
    %c0_199 = arith.constant 0 : index
    %486 = vector.load %arg12[%c2_197, %c0_198, %c0_199] : memref<4x1x512xf32, #tpu.memory_space<vmem>>, vector<1x1x512xf32>
    %487 = vector.shape_cast %486 : vector<1x1x512xf32> to vector<1x512xf32>
    %488 = vector.broadcast %487 : vector<1x512xf32> to vector<8x512xf32>
    %489 = arith.addf %485, %488 : vector<8x512xf32>
    %cst_200 = arith.constant 5.000000e-01 : f32
    %490 = vector.broadcast %cst_200 : f32 to vector<8x512xf32>
    %491 = arith.mulf %490, %489 : vector<8x512xf32>
    %cst_201 = arith.constant 4.471500e-02 : f32
    %492 = vector.broadcast %cst_201 : f32 to vector<8x512xf32>
    %493 = arith.mulf %492, %489 : vector<8x512xf32>
    %494 = arith.mulf %493, %489 : vector<8x512xf32>
    %495 = arith.mulf %494, %489 : vector<8x512xf32>
    %496 = arith.addf %489, %495 : vector<8x512xf32>
    %cst_202 = arith.constant 0.797884583 : f32
    %497 = vector.broadcast %cst_202 : f32 to vector<8x512xf32>
    %498 = arith.mulf %497, %496 : vector<8x512xf32>
    %499 = math.tanh %498 : vector<8x512xf32>
    %cst_203 = arith.constant 1.000000e+00 : f32
    %500 = vector.broadcast %cst_203 : f32 to vector<8x512xf32>
    %501 = arith.addf %500, %499 : vector<8x512xf32>
    %502 = arith.mulf %491, %501 : vector<8x512xf32>
    %503 = arith.truncf %502 : vector<8x512xf32> to vector<8x512xbf16>
    %c2_204 = arith.constant 2 : index
    %c0_205 = arith.constant 0 : index
    %c0_206 = arith.constant 0 : index
    %504 = vector.load %arg13[%c2_204, %c0_205, %c0_206] : memref<4x512x128xbf16, #tpu.memory_space<vmem>>, vector<1x512x128xbf16>
    %505 = vector.shape_cast %504 : vector<1x512x128xbf16> to vector<512x128xbf16>
    %cst_207 = arith.constant dense<0.000000e+00> : vector<8x128xf32>
    %506 = tpu.matmul %503, %505, %cst_207 {dimension_numbers = #tpu.dot_dimension_numbers<[1], [0], [0], [1], [0, 0, 1, 1], [], []>} : vector<8x512xbf16>, vector<512x128xbf16>, vector<8x128xf32> -> vector<8x128xf32>
    %c2_208 = arith.constant 2 : index
    %c0_209 = arith.constant 0 : index
    %c0_210 = arith.constant 0 : index
    %507 = vector.load %arg14[%c2_208, %c0_209, %c0_210] : memref<4x1x128xf32, #tpu.memory_space<vmem>>, vector<1x1x128xf32>
    %508 = vector.shape_cast %507 : vector<1x1x128xf32> to vector<1x128xf32>
    %509 = vector.broadcast %508 : vector<1x128xf32> to vector<8x128xf32>
    %510 = arith.addf %506, %509 : vector<8x128xf32>
    %511 = arith.addf %510, %481 : vector<8x128xf32>
    %c2_211 = arith.constant 2 : index
    %c0_212 = arith.constant 0 : index
    %c0_213 = arith.constant 0 : index
    %512 = vector.load %arg15[%c2_211, %c0_212, %c0_213] : memref<4x1x128xf32, #tpu.memory_space<vmem>>, vector<1x1x128xf32>
    %513 = vector.shape_cast %512 : vector<1x1x128xf32> to vector<1x128xf32>
    %c2_214 = arith.constant 2 : index
    %c0_215 = arith.constant 0 : index
    %c0_216 = arith.constant 0 : index
    %514 = vector.load %arg16[%c2_214, %c0_215, %c0_216] : memref<4x1x128xf32, #tpu.memory_space<vmem>>, vector<1x1x128xf32>
    %515 = vector.shape_cast %514 : vector<1x1x128xf32> to vector<1x128xf32>
    %cst_217 = arith.constant dense<0.000000e+00> : vector<8xf32>
    %516 = vector.multi_reduction <add>, %511, %cst_217 [1] : vector<8x128xf32> to vector<8xf32>
    %517 = vector.shape_cast %516 : vector<8xf32> to vector<8x1xf32>
    %cst_218 = arith.constant 1.280000e+02 : f32
    %518 = vector.broadcast %cst_218 : f32 to vector<8x1xf32>
    %519 = arith.divf %517, %518 : vector<8x1xf32>
    %520 = vector.broadcast %519 : vector<8x1xf32> to vector<8x128xf32>
    %521 = arith.subf %511, %520 : vector<8x128xf32>
    %522 = arith.mulf %521, %521 : vector<8x128xf32>
    %cst_219 = arith.constant dense<0.000000e+00> : vector<8xf32>
    %523 = vector.multi_reduction <add>, %522, %cst_219 [1] : vector<8x128xf32> to vector<8xf32>
    %524 = vector.shape_cast %523 : vector<8xf32> to vector<8x1xf32>
    %cst_220 = arith.constant 1.280000e+02 : f32
    %525 = vector.broadcast %cst_220 : f32 to vector<8x1xf32>
    %526 = arith.divf %524, %525 : vector<8x1xf32>
    %cst_221 = arith.constant 9.99999996E-13 : f32
    %527 = vector.broadcast %cst_221 : f32 to vector<8x1xf32>
    %528 = arith.addf %526, %527 : vector<8x1xf32>
    %529 = math.rsqrt %528 : vector<8x1xf32>
    %530 = vector.broadcast %529 : vector<8x1xf32> to vector<8x128xf32>
    %531 = arith.mulf %521, %530 : vector<8x128xf32>
    %532 = vector.broadcast %513 : vector<1x128xf32> to vector<8x128xf32>
    %533 = arith.mulf %531, %532 : vector<8x128xf32>
    %534 = vector.broadcast %515 : vector<1x128xf32> to vector<8x128xf32>
    %535 = arith.addf %533, %534 : vector<8x128xf32>
    %536 = arith.addf %366, %535 : vector<8x128xf32>
    %537 = arith.truncf %535 : vector<8x128xf32> to vector<8x128xbf16>
    %c3 = arith.constant 3 : index
    %c0_222 = arith.constant 0 : index
    %c0_223 = arith.constant 0 : index
    %538 = vector.load %arg5[%c3, %c0_222, %c0_223] : memref<4x128x384xbf16, #tpu.memory_space<vmem>>, vector<1x128x384xbf16>
    %539 = vector.shape_cast %538 : vector<1x128x384xbf16> to vector<128x384xbf16>
    %cst_224 = arith.constant dense<0.000000e+00> : vector<8x384xf32>
    %540 = tpu.matmul %537, %539, %cst_224 {dimension_numbers = #tpu.dot_dimension_numbers<[1], [0], [0], [1], [0, 0, 1, 1], [], []>} : vector<8x128xbf16>, vector<128x384xbf16>, vector<8x384xf32> -> vector<8x384xf32>
    %c3_225 = arith.constant 3 : index
    %c0_226 = arith.constant 0 : index
    %c0_227 = arith.constant 0 : index
    %541 = vector.load %arg6[%c3_225, %c0_226, %c0_227] : memref<4x1x384xf32, #tpu.memory_space<vmem>>, vector<1x1x384xf32>
    %542 = vector.shape_cast %541 : vector<1x1x384xf32> to vector<1x384xf32>
    %543 = vector.broadcast %542 : vector<1x384xf32> to vector<8x384xf32>
    %544 = arith.addf %540, %543 : vector<8x384xf32>
    %545 = arith.truncf %544 : vector<8x384xf32> to vector<8x384xbf16>
    %546 = vector.extract_strided_slice %545 {offsets = [0, 0], sizes = [8, 32], strides = [1, 1]} : vector<8x384xbf16> to vector<8x32xbf16>
    %547 = vector.extract_strided_slice %545 {offsets = [0, 128], sizes = [8, 32], strides = [1, 1]} : vector<8x384xbf16> to vector<8x32xbf16>
    %548 = vector.extract_strided_slice %545 {offsets = [0, 256], sizes = [8, 32], strides = [1, 1]} : vector<8x384xbf16> to vector<8x32xbf16>
    %cst_228 = arith.constant dense<0.000000e+00> : vector<8x8xf32>
    %549 = tpu.matmul %546, %547, %cst_228 {dimension_numbers = #tpu.dot_dimension_numbers<[1], [1], [0], [0], [0, 0, 1, 0], [], []>} : vector<8x32xbf16>, vector<8x32xbf16>, vector<8x8xf32> -> vector<8x8xf32>
    %550 = vector.broadcast %1 : vector<1x8xf32> to vector<8x8xf32>
    %551 = arith.addf %549, %550 : vector<8x8xf32>
    %cst_229 = arith.constant dense<0xFF800000> : vector<8xf32>
    %552 = vector.multi_reduction <maximumf>, %551, %cst_229 [1] : vector<8x8xf32> to vector<8xf32>
    %553 = vector.shape_cast %552 : vector<8xf32> to vector<8x1xf32>
    %554 = vector.broadcast %553 : vector<8x1xf32> to vector<8x8xf32>
    %555 = arith.subf %551, %554 : vector<8x8xf32>
    %556 = math.exp %555 : vector<8x8xf32>
    %cst_230 = arith.constant dense<0.000000e+00> : vector<8xf32>
    %557 = vector.multi_reduction <add>, %556, %cst_230 [1] : vector<8x8xf32> to vector<8xf32>
    %558 = vector.shape_cast %557 : vector<8xf32> to vector<8x1xf32>
    %559 = tpu.reciprocal %558 {approx = true} : vector<8x1xf32> -> vector<8x1xf32>
    %560 = vector.broadcast %559 : vector<8x1xf32> to vector<8x8xf32>
    %561 = arith.mulf %556, %560 : vector<8x8xf32>
    %562 = arith.truncf %561 : vector<8x8xf32> to vector<8x8xbf16>
    %cst_231 = arith.constant dense<0.000000e+00> : vector<8x32xf32>
    %563 = tpu.matmul %562, %548, %cst_231 {dimension_numbers = #tpu.dot_dimension_numbers<[1], [0], [0], [1], [0, 0, 1, 1], [], []>} : vector<8x8xbf16>, vector<8x32xbf16>, vector<8x32xf32> -> vector<8x32xf32>
    %564 = vector.extract_strided_slice %545 {offsets = [0, 32], sizes = [8, 32], strides = [1, 1]} : vector<8x384xbf16> to vector<8x32xbf16>
    %565 = vector.extract_strided_slice %545 {offsets = [0, 160], sizes = [8, 32], strides = [1, 1]} : vector<8x384xbf16> to vector<8x32xbf16>
    %566 = vector.extract_strided_slice %545 {offsets = [0, 288], sizes = [8, 32], strides = [1, 1]} : vector<8x384xbf16> to vector<8x32xbf16>
    %cst_232 = arith.constant dense<0.000000e+00> : vector<8x8xf32>
    %567 = tpu.matmul %564, %565, %cst_232 {dimension_numbers = #tpu.dot_dimension_numbers<[1], [1], [0], [0], [0, 0, 1, 0], [], []>} : vector<8x32xbf16>, vector<8x32xbf16>, vector<8x8xf32> -> vector<8x8xf32>
    %568 = vector.broadcast %1 : vector<1x8xf32> to vector<8x8xf32>
    %569 = arith.addf %567, %568 : vector<8x8xf32>
    %cst_233 = arith.constant dense<0xFF800000> : vector<8xf32>
    %570 = vector.multi_reduction <maximumf>, %569, %cst_233 [1] : vector<8x8xf32> to vector<8xf32>
    %571 = vector.shape_cast %570 : vector<8xf32> to vector<8x1xf32>
    %572 = vector.broadcast %571 : vector<8x1xf32> to vector<8x8xf32>
    %573 = arith.subf %569, %572 : vector<8x8xf32>
    %574 = math.exp %573 : vector<8x8xf32>
    %cst_234 = arith.constant dense<0.000000e+00> : vector<8xf32>
    %575 = vector.multi_reduction <add>, %574, %cst_234 [1] : vector<8x8xf32> to vector<8xf32>
    %576 = vector.shape_cast %575 : vector<8xf32> to vector<8x1xf32>
    %577 = tpu.reciprocal %576 {approx = true} : vector<8x1xf32> -> vector<8x1xf32>
    %578 = vector.broadcast %577 : vector<8x1xf32> to vector<8x8xf32>
    %579 = arith.mulf %574, %578 : vector<8x8xf32>
    %580 = arith.truncf %579 : vector<8x8xf32> to vector<8x8xbf16>
    %cst_235 = arith.constant dense<0.000000e+00> : vector<8x32xf32>
    %581 = tpu.matmul %580, %566, %cst_235 {dimension_numbers = #tpu.dot_dimension_numbers<[1], [0], [0], [1], [0, 0, 1, 1], [], []>} : vector<8x8xbf16>, vector<8x32xbf16>, vector<8x32xf32> -> vector<8x32xf32>
    %582 = vector.extract_strided_slice %545 {offsets = [0, 64], sizes = [8, 32], strides = [1, 1]} : vector<8x384xbf16> to vector<8x32xbf16>
    %583 = vector.extract_strided_slice %545 {offsets = [0, 192], sizes = [8, 32], strides = [1, 1]} : vector<8x384xbf16> to vector<8x32xbf16>
    %584 = vector.extract_strided_slice %545 {offsets = [0, 320], sizes = [8, 32], strides = [1, 1]} : vector<8x384xbf16> to vector<8x32xbf16>
    %cst_236 = arith.constant dense<0.000000e+00> : vector<8x8xf32>
    %585 = tpu.matmul %582, %583, %cst_236 {dimension_numbers = #tpu.dot_dimension_numbers<[1], [1], [0], [0], [0, 0, 1, 0], [], []>} : vector<8x32xbf16>, vector<8x32xbf16>, vector<8x8xf32> -> vector<8x8xf32>
    %586 = vector.broadcast %1 : vector<1x8xf32> to vector<8x8xf32>
    %587 = arith.addf %585, %586 : vector<8x8xf32>
    %cst_237 = arith.constant dense<0xFF800000> : vector<8xf32>
    %588 = vector.multi_reduction <maximumf>, %587, %cst_237 [1] : vector<8x8xf32> to vector<8xf32>
    %589 = vector.shape_cast %588 : vector<8xf32> to vector<8x1xf32>
    %590 = vector.broadcast %589 : vector<8x1xf32> to vector<8x8xf32>
    %591 = arith.subf %587, %590 : vector<8x8xf32>
    %592 = math.exp %591 : vector<8x8xf32>
    %cst_238 = arith.constant dense<0.000000e+00> : vector<8xf32>
    %593 = vector.multi_reduction <add>, %592, %cst_238 [1] : vector<8x8xf32> to vector<8xf32>
    %594 = vector.shape_cast %593 : vector<8xf32> to vector<8x1xf32>
    %595 = tpu.reciprocal %594 {approx = true} : vector<8x1xf32> -> vector<8x1xf32>
    %596 = vector.broadcast %595 : vector<8x1xf32> to vector<8x8xf32>
    %597 = arith.mulf %592, %596 : vector<8x8xf32>
    %598 = arith.truncf %597 : vector<8x8xf32> to vector<8x8xbf16>
    %cst_239 = arith.constant dense<0.000000e+00> : vector<8x32xf32>
    %599 = tpu.matmul %598, %584, %cst_239 {dimension_numbers = #tpu.dot_dimension_numbers<[1], [0], [0], [1], [0, 0, 1, 1], [], []>} : vector<8x8xbf16>, vector<8x32xbf16>, vector<8x32xf32> -> vector<8x32xf32>
    %600 = vector.extract_strided_slice %545 {offsets = [0, 96], sizes = [8, 32], strides = [1, 1]} : vector<8x384xbf16> to vector<8x32xbf16>
    %601 = vector.extract_strided_slice %545 {offsets = [0, 224], sizes = [8, 32], strides = [1, 1]} : vector<8x384xbf16> to vector<8x32xbf16>
    %602 = vector.extract_strided_slice %545 {offsets = [0, 352], sizes = [8, 32], strides = [1, 1]} : vector<8x384xbf16> to vector<8x32xbf16>
    %cst_240 = arith.constant dense<0.000000e+00> : vector<8x8xf32>
    %603 = tpu.matmul %600, %601, %cst_240 {dimension_numbers = #tpu.dot_dimension_numbers<[1], [1], [0], [0], [0, 0, 1, 0], [], []>} : vector<8x32xbf16>, vector<8x32xbf16>, vector<8x8xf32> -> vector<8x8xf32>
    %604 = vector.broadcast %1 : vector<1x8xf32> to vector<8x8xf32>
    %605 = arith.addf %603, %604 : vector<8x8xf32>
    %cst_241 = arith.constant dense<0xFF800000> : vector<8xf32>
    %606 = vector.multi_reduction <maximumf>, %605, %cst_241 [1] : vector<8x8xf32> to vector<8xf32>
    %607 = vector.shape_cast %606 : vector<8xf32> to vector<8x1xf32>
    %608 = vector.broadcast %607 : vector<8x1xf32> to vector<8x8xf32>
    %609 = arith.subf %605, %608 : vector<8x8xf32>
    %610 = math.exp %609 : vector<8x8xf32>
    %cst_242 = arith.constant dense<0.000000e+00> : vector<8xf32>
    %611 = vector.multi_reduction <add>, %610, %cst_242 [1] : vector<8x8xf32> to vector<8xf32>
    %612 = vector.shape_cast %611 : vector<8xf32> to vector<8x1xf32>
    %613 = tpu.reciprocal %612 {approx = true} : vector<8x1xf32> -> vector<8x1xf32>
    %614 = vector.broadcast %613 : vector<8x1xf32> to vector<8x8xf32>
    %615 = arith.mulf %610, %614 : vector<8x8xf32>
    %616 = arith.truncf %615 : vector<8x8xf32> to vector<8x8xbf16>
    %cst_243 = arith.constant dense<0.000000e+00> : vector<8x32xf32>
    %617 = tpu.matmul %616, %602, %cst_243 {dimension_numbers = #tpu.dot_dimension_numbers<[1], [0], [0], [1], [0, 0, 1, 1], [], []>} : vector<8x8xbf16>, vector<8x32xbf16>, vector<8x32xf32> -> vector<8x32xf32>
    %618 = tpu.concatenate %563, %581, %599, %617 in 1 : vector<8x32xf32>, vector<8x32xf32>, vector<8x32xf32>, vector<8x32xf32> -> vector<8x128xf32>
    %619 = arith.truncf %618 : vector<8x128xf32> to vector<8x128xbf16>
    %c3_244 = arith.constant 3 : index
    %c0_245 = arith.constant 0 : index
    %c0_246 = arith.constant 0 : index
    %620 = vector.load %arg7[%c3_244, %c0_245, %c0_246] : memref<4x128x128xbf16, #tpu.memory_space<vmem>>, vector<1x128x128xbf16>
    %621 = vector.shape_cast %620 : vector<1x128x128xbf16> to vector<128x128xbf16>
    %cst_247 = arith.constant dense<0.000000e+00> : vector<8x128xf32>
    %622 = tpu.matmul %619, %621, %cst_247 {dimension_numbers = #tpu.dot_dimension_numbers<[1], [0], [0], [1], [0, 0, 1, 1], [], []>} : vector<8x128xbf16>, vector<128x128xbf16>, vector<8x128xf32> -> vector<8x128xf32>
    %c3_248 = arith.constant 3 : index
    %c0_249 = arith.constant 0 : index
    %c0_250 = arith.constant 0 : index
    %623 = vector.load %arg8[%c3_248, %c0_249, %c0_250] : memref<4x1x128xf32, #tpu.memory_space<vmem>>, vector<1x1x128xf32>
    %624 = vector.shape_cast %623 : vector<1x1x128xf32> to vector<1x128xf32>
    %625 = vector.broadcast %624 : vector<1x128xf32> to vector<8x128xf32>
    %626 = arith.addf %622, %625 : vector<8x128xf32>
    %627 = arith.addf %626, %535 : vector<8x128xf32>
    %c3_251 = arith.constant 3 : index
    %c0_252 = arith.constant 0 : index
    %c0_253 = arith.constant 0 : index
    %628 = vector.load %arg9[%c3_251, %c0_252, %c0_253] : memref<4x1x128xf32, #tpu.memory_space<vmem>>, vector<1x1x128xf32>
    %629 = vector.shape_cast %628 : vector<1x1x128xf32> to vector<1x128xf32>
    %c3_254 = arith.constant 3 : index
    %c0_255 = arith.constant 0 : index
    %c0_256 = arith.constant 0 : index
    %630 = vector.load %arg10[%c3_254, %c0_255, %c0_256] : memref<4x1x128xf32, #tpu.memory_space<vmem>>, vector<1x1x128xf32>
    %631 = vector.shape_cast %630 : vector<1x1x128xf32> to vector<1x128xf32>
    %cst_257 = arith.constant dense<0.000000e+00> : vector<8xf32>
    %632 = vector.multi_reduction <add>, %627, %cst_257 [1] : vector<8x128xf32> to vector<8xf32>
    %633 = vector.shape_cast %632 : vector<8xf32> to vector<8x1xf32>
    %cst_258 = arith.constant 1.280000e+02 : f32
    %634 = vector.broadcast %cst_258 : f32 to vector<8x1xf32>
    %635 = arith.divf %633, %634 : vector<8x1xf32>
    %636 = vector.broadcast %635 : vector<8x1xf32> to vector<8x128xf32>
    %637 = arith.subf %627, %636 : vector<8x128xf32>
    %638 = arith.mulf %637, %637 : vector<8x128xf32>
    %cst_259 = arith.constant dense<0.000000e+00> : vector<8xf32>
    %639 = vector.multi_reduction <add>, %638, %cst_259 [1] : vector<8x128xf32> to vector<8xf32>
    %640 = vector.shape_cast %639 : vector<8xf32> to vector<8x1xf32>
    %cst_260 = arith.constant 1.280000e+02 : f32
    %641 = vector.broadcast %cst_260 : f32 to vector<8x1xf32>
    %642 = arith.divf %640, %641 : vector<8x1xf32>
    %cst_261 = arith.constant 9.99999996E-13 : f32
    %643 = vector.broadcast %cst_261 : f32 to vector<8x1xf32>
    %644 = arith.addf %642, %643 : vector<8x1xf32>
    %645 = math.rsqrt %644 : vector<8x1xf32>
    %646 = vector.broadcast %645 : vector<8x1xf32> to vector<8x128xf32>
    %647 = arith.mulf %637, %646 : vector<8x128xf32>
    %648 = vector.broadcast %629 : vector<1x128xf32> to vector<8x128xf32>
    %649 = arith.mulf %647, %648 : vector<8x128xf32>
    %650 = vector.broadcast %631 : vector<1x128xf32> to vector<8x128xf32>
    %651 = arith.addf %649, %650 : vector<8x128xf32>
    %652 = arith.truncf %651 : vector<8x128xf32> to vector<8x128xbf16>
    %c3_262 = arith.constant 3 : index
    %c0_263 = arith.constant 0 : index
    %c0_264 = arith.constant 0 : index
    %653 = vector.load %arg11[%c3_262, %c0_263, %c0_264] : memref<4x128x512xbf16, #tpu.memory_space<vmem>>, vector<1x128x512xbf16>
    %654 = vector.shape_cast %653 : vector<1x128x512xbf16> to vector<128x512xbf16>
    %cst_265 = arith.constant dense<0.000000e+00> : vector<8x512xf32>
    %655 = tpu.matmul %652, %654, %cst_265 {dimension_numbers = #tpu.dot_dimension_numbers<[1], [0], [0], [1], [0, 0, 1, 1], [], []>} : vector<8x128xbf16>, vector<128x512xbf16>, vector<8x512xf32> -> vector<8x512xf32>
    %c3_266 = arith.constant 3 : index
    %c0_267 = arith.constant 0 : index
    %c0_268 = arith.constant 0 : index
    %656 = vector.load %arg12[%c3_266, %c0_267, %c0_268] : memref<4x1x512xf32, #tpu.memory_space<vmem>>, vector<1x1x512xf32>
    %657 = vector.shape_cast %656 : vector<1x1x512xf32> to vector<1x512xf32>
    %658 = vector.broadcast %657 : vector<1x512xf32> to vector<8x512xf32>
    %659 = arith.addf %655, %658 : vector<8x512xf32>
    %cst_269 = arith.constant 5.000000e-01 : f32
    %660 = vector.broadcast %cst_269 : f32 to vector<8x512xf32>
    %661 = arith.mulf %660, %659 : vector<8x512xf32>
    %cst_270 = arith.constant 4.471500e-02 : f32
    %662 = vector.broadcast %cst_270 : f32 to vector<8x512xf32>
    %663 = arith.mulf %662, %659 : vector<8x512xf32>
    %664 = arith.mulf %663, %659 : vector<8x512xf32>
    %665 = arith.mulf %664, %659 : vector<8x512xf32>
    %666 = arith.addf %659, %665 : vector<8x512xf32>
    %cst_271 = arith.constant 0.797884583 : f32
    %667 = vector.broadcast %cst_271 : f32 to vector<8x512xf32>
    %668 = arith.mulf %667, %666 : vector<8x512xf32>
    %669 = math.tanh %668 : vector<8x512xf32>
    %cst_272 = arith.constant 1.000000e+00 : f32
    %670 = vector.broadcast %cst_272 : f32 to vector<8x512xf32>
    %671 = arith.addf %670, %669 : vector<8x512xf32>
    %672 = arith.mulf %661, %671 : vector<8x512xf32>
    %673 = arith.truncf %672 : vector<8x512xf32> to vector<8x512xbf16>
    %c3_273 = arith.constant 3 : index
    %c0_274 = arith.constant 0 : index
    %c0_275 = arith.constant 0 : index
    %674 = vector.load %arg13[%c3_273, %c0_274, %c0_275] : memref<4x512x128xbf16, #tpu.memory_space<vmem>>, vector<1x512x128xbf16>
    %675 = vector.shape_cast %674 : vector<1x512x128xbf16> to vector<512x128xbf16>
    %cst_276 = arith.constant dense<0.000000e+00> : vector<8x128xf32>
    %676 = tpu.matmul %673, %675, %cst_276 {dimension_numbers = #tpu.dot_dimension_numbers<[1], [0], [0], [1], [0, 0, 1, 1], [], []>} : vector<8x512xbf16>, vector<512x128xbf16>, vector<8x128xf32> -> vector<8x128xf32>
    %c3_277 = arith.constant 3 : index
    %c0_278 = arith.constant 0 : index
    %c0_279 = arith.constant 0 : index
    %677 = vector.load %arg14[%c3_277, %c0_278, %c0_279] : memref<4x1x128xf32, #tpu.memory_space<vmem>>, vector<1x1x128xf32>
    %678 = vector.shape_cast %677 : vector<1x1x128xf32> to vector<1x128xf32>
    %679 = vector.broadcast %678 : vector<1x128xf32> to vector<8x128xf32>
    %680 = arith.addf %676, %679 : vector<8x128xf32>
    %681 = arith.addf %680, %651 : vector<8x128xf32>
    %c3_280 = arith.constant 3 : index
    %c0_281 = arith.constant 0 : index
    %c0_282 = arith.constant 0 : index
    %682 = vector.load %arg15[%c3_280, %c0_281, %c0_282] : memref<4x1x128xf32, #tpu.memory_space<vmem>>, vector<1x1x128xf32>
    %683 = vector.shape_cast %682 : vector<1x1x128xf32> to vector<1x128xf32>
    %c3_283 = arith.constant 3 : index
    %c0_284 = arith.constant 0 : index
    %c0_285 = arith.constant 0 : index
    %684 = vector.load %arg16[%c3_283, %c0_284, %c0_285] : memref<4x1x128xf32, #tpu.memory_space<vmem>>, vector<1x1x128xf32>
    %685 = vector.shape_cast %684 : vector<1x1x128xf32> to vector<1x128xf32>
    %cst_286 = arith.constant dense<0.000000e+00> : vector<8xf32>
    %686 = vector.multi_reduction <add>, %681, %cst_286 [1] : vector<8x128xf32> to vector<8xf32>
    %687 = vector.shape_cast %686 : vector<8xf32> to vector<8x1xf32>
    %cst_287 = arith.constant 1.280000e+02 : f32
    %688 = vector.broadcast %cst_287 : f32 to vector<8x1xf32>
    %689 = arith.divf %687, %688 : vector<8x1xf32>
    %690 = vector.broadcast %689 : vector<8x1xf32> to vector<8x128xf32>
    %691 = arith.subf %681, %690 : vector<8x128xf32>
    %692 = arith.mulf %691, %691 : vector<8x128xf32>
    %cst_288 = arith.constant dense<0.000000e+00> : vector<8xf32>
    %693 = vector.multi_reduction <add>, %692, %cst_288 [1] : vector<8x128xf32> to vector<8xf32>
    %694 = vector.shape_cast %693 : vector<8xf32> to vector<8x1xf32>
    %cst_289 = arith.constant 1.280000e+02 : f32
    %695 = vector.broadcast %cst_289 : f32 to vector<8x1xf32>
    %696 = arith.divf %694, %695 : vector<8x1xf32>
    %cst_290 = arith.constant 9.99999996E-13 : f32
    %697 = vector.broadcast %cst_290 : f32 to vector<8x1xf32>
    %698 = arith.addf %696, %697 : vector<8x1xf32>
    %699 = math.rsqrt %698 : vector<8x1xf32>
    %700 = vector.broadcast %699 : vector<8x1xf32> to vector<8x128xf32>
    %701 = arith.mulf %691, %700 : vector<8x128xf32>
    %702 = vector.broadcast %683 : vector<1x128xf32> to vector<8x128xf32>
    %703 = arith.mulf %701, %702 : vector<8x128xf32>
    %704 = vector.broadcast %685 : vector<1x128xf32> to vector<8x128xf32>
    %705 = arith.addf %703, %704 : vector<8x128xf32>
    %706 = arith.addf %536, %705 : vector<8x128xf32>
    %c0_291 = arith.constant 0 : index
    %c0_292 = arith.constant 0 : index
    %c0_293 = arith.constant 0 : index
    %707 = vector.load %arg17[%c0_291, %c0_292, %c0_293] : memref<1x8x128xf32, #tpu.memory_space<vmem>>, vector<1x8x128xf32>
    %708 = vector.shape_cast %707 : vector<1x8x128xf32> to vector<8x128xf32>
    %709 = vector.shape_cast %706 : vector<8x128xf32> to vector<1x8x128xf32>
    tpu.vector_store %arg17[%c0_291, %c0_292, %c0_293], %709 {strides = array<i32>} : memref<1x8x128xf32, #tpu.memory_space<vmem>>, vector<1x8x128xf32>,
    return
  }
  func.func @transform_0(%arg0: i32) -> (i32, i32, i32) {
    %c0_i32 = arith.constant 0 : i32
    %c0_i32_0 = arith.constant 0 : i32
    %c0_i32_1 = arith.constant 0 : i32
    return %arg0, %c0_i32, %c0_i32_0 : i32, i32, i32
  }
  func.func @transform_1(%arg0: i32) -> (i32, i32, i32) {
    %c0_i32 = arith.constant 0 : i32
    %c0_i32_0 = arith.constant 0 : i32
    %c0_i32_1 = arith.constant 0 : i32
    return %arg0, %c0_i32, %c0_i32_0 : i32, i32, i32
  }
  func.func @transform_2(%arg0: i32) -> (i32, i32) {
    %c0_i32 = arith.constant 0 : i32
    %c0_i32_0 = arith.constant 0 : i32
    %c0_i32_1 = arith.constant 0 : i32
    return %c0_i32, %c0_i32_0 : i32, i32
  }
  func.func @transform_3(%arg0: i32) -> (i32, i32) {
    %c0_i32 = arith.constant 0 : i32
    %c0_i32_0 = arith.constant 0 : i32
    %c0_i32_1 = arith.constant 0 : i32
    return %c0_i32, %c0_i32_0 : i32, i32
  }
  func.func @transform_4(%arg0: i32) -> (i32, i32, i32) {
    %c0_i32 = arith.constant 0 : i32
    %c0_i32_0 = arith.constant 0 : i32
    %c0_i32_1 = arith.constant 0 : i32
    %c0_i32_2 = arith.constant 0 : i32
    return %c0_i32, %c0_i32_0, %c0_i32_1 : i32, i32, i32
  }
  func.func @transform_5(%arg0: i32) -> (i32, i32, i32) {
    %c0_i32 = arith.constant 0 : i32
    %c0_i32_0 = arith.constant 0 : i32
    %c0_i32_1 = arith.constant 0 : i32
    %c0_i32_2 = arith.constant 0 : i32
    return %c0_i32, %c0_i32_0, %c0_i32_1 : i32, i32, i32
  }
  func.func @transform_6(%arg0: i32) -> (i32, i32, i32) {
    %c0_i32 = arith.constant 0 : i32
    %c0_i32_0 = arith.constant 0 : i32
    %c0_i32_1 = arith.constant 0 : i32
    %c0_i32_2 = arith.constant 0 : i32
    return %c0_i32, %c0_i32_0, %c0_i32_1 : i32, i32, i32
  }
  func.func @transform_7(%arg0: i32) -> (i32, i32, i32) {
    %c0_i32 = arith.constant 0 : i32
    %c0_i32_0 = arith.constant 0 : i32
    %c0_i32_1 = arith.constant 0 : i32
    %c0_i32_2 = arith.constant 0 : i32
    return %c0_i32, %c0_i32_0, %c0_i32_1 : i32, i32, i32
  }
  func.func @transform_8(%arg0: i32) -> (i32, i32, i32) {
    %c0_i32 = arith.constant 0 : i32
    %c0_i32_0 = arith.constant 0 : i32
    %c0_i32_1 = arith.constant 0 : i32
    %c0_i32_2 = arith.constant 0 : i32
    return %c0_i32, %c0_i32_0, %c0_i32_1 : i32, i32, i32
  }
  func.func @transform_9(%arg0: i32) -> (i32, i32, i32) {
    %c0_i32 = arith.constant 0 : i32
    %c0_i32_0 = arith.constant 0 : i32
    %c0_i32_1 = arith.constant 0 : i32
    %c0_i32_2 = arith.constant 0 : i32
    return %c0_i32, %c0_i32_0, %c0_i32_1 : i32, i32, i32
  }
  func.func @transform_10(%arg0: i32) -> (i32, i32, i32) {
    %c0_i32 = arith.constant 0 : i32
    %c0_i32_0 = arith.constant 0 : i32
    %c0_i32_1 = arith.constant 0 : i32
    %c0_i32_2 = arith.constant 0 : i32
    return %c0_i32, %c0_i32_0, %c0_i32_1 : i32, i32, i32
  }
  func.func @transform_11(%arg0: i32) -> (i32, i32, i32) {
    %c0_i32 = arith.constant 0 : i32
    %c0_i32_0 = arith.constant 0 : i32
    %c0_i32_1 = arith.constant 0 : i32
    %c0_i32_2 = arith.constant 0 : i32
    return %c0_i32, %c0_i32_0, %c0_i32_1 : i32, i32, i32
  }
  func.func @transform_12(%arg0: i32) -> (i32, i32, i32) {
    %c0_i32 = arith.constant 0 : i32
    %c0_i32_0 = arith.constant 0 : i32
    %c0_i32_1 = arith.constant 0 : i32
    %c0_i32_2 = arith.constant 0 : i32
    return %c0_i32, %c0_i32_0, %c0_i32_1 : i32, i32, i32
  }
  func.func @transform_13(%arg0: i32) -> (i32, i32, i32) {
    %c0_i32 = arith.constant 0 : i32
    %c0_i32_0 = arith.constant 0 : i32
    %c0_i32_1 = arith.constant 0 : i32
    %c0_i32_2 = arith.constant 0 : i32
    return %c0_i32, %c0_i32_0, %c0_i32_1 : i32, i32, i32
  }
  func.func @transform_14(%arg0: i32) -> (i32, i32, i32) {
    %c0_i32 = arith.constant 0 : i32
    %c0_i32_0 = arith.constant 0 : i32
    %c0_i32_1 = arith.constant 0 : i32
    %c0_i32_2 = arith.constant 0 : i32
    return %c0_i32, %c0_i32_0, %c0_i32_1 : i32, i32, i32
  }
  func.func @transform_15(%arg0: i32) -> (i32, i32, i32) {
    %c0_i32 = arith.constant 0 : i32
    %c0_i32_0 = arith.constant 0 : i32
    %c0_i32_1 = arith.constant 0 : i32
    %c0_i32_2 = arith.constant 0 : i32
    return %c0_i32, %c0_i32_0, %c0_i32_1 : i32, i32, i32
  }
  func.func @transform_16(%arg0: i32) -> (i32, i32, i32) {
    %c0_i32 = arith.constant 0 : i32
    %c0_i32_0 = arith.constant 0 : i32
    %c0_i32_1 = arith.constant 0 : i32
    return %arg0, %c0_i32, %c0_i32_0 : i32, i32, i32
  }
}

</mosaic_0001>

<bundles_post_ra>
// kernel: my_bert_encoder_forward.1
= control target key start
LH: loop header
LB: loop body
LE: loop exit
PB: predicated region body
PF: predicated region fallthrough
CT: control target
= control target key end

     0   :  { %s11156_s0 = inlined_call_operand.vmem [shape: f32[2,8,128], index: 0, kind: input, shape index: {}]   ;;  %s11157_s1 = inlined_call_operand.vmem [shape: f32[2,1,8], index: 1, kind: input, shape index: {}]   ;;  %s11158_s2 = inlined_call_operand.vmem [shape: f32[1,128], index: 2, kind: input, shape index: {}]   ;;  %s11159_s3 = inlined_call_operand.vmem [shape: f32[1,128], index: 3, kind: input, shape index: {}]   ;;  %s11160_s4 = inlined_call_operand.vmem [shape: bf16[4,128,384], index: 4, kind: input, shape index: {}]   ;;  %s11161_s5 = inlined_call_operand.vmem [shape: f32[4,1,384], index: 5, kind: input, shape index: {}]   ;;  %s11162_s6 = inlined_call_operand.vmem [shape: bf16[4,128,128], index: 6, kind: input, shape index: {}]   ;;  %s11163_s7 = inlined_call_operand.vmem [shape: f32[4,1,128], index: 7, kind: input, shape index: {}]   ;;  %s11164_s8 = inlined_call_operand.vmem [shape: f32[4,1,128], index: 8, kind: input, shape index: {}]   ;;  %s11165_s9 = inlined_call_operand.vmem [shape: f32[4,1,128], index: 9, kind: input, shape index: {}]   ;;  %s11166_s10 = inlined_call_operand.vmem [shape: bf16[4,128,512], index: 10, kind: input, shape index: {}]   ;;  %s11167_s11 = inlined_call_operand.vmem [shape: f32[4,1,512], index: 11, kind: input, shape index: {}]   ;;  %s11168_s12 = inlined_call_operand.vmem [shape: bf16[4,512,128], index: 12, kind: input, shape index: {}]   ;;  %s11169_s13 = inlined_call_operand.vmem [shape: f32[4,1,128], index: 13, kind: input, shape index: {}]   ;;  %s11170_s14 = inlined_call_operand.vmem [shape: f32[4,1,128], index: 14, kind: input, shape index: {}]   ;;  %s11171_s15 = inlined_call_operand.vmem [shape: f32[4,1,128], index: 15, kind: input, shape index: {}]   ;;  %s11172_s16 = inlined_call_operand.hbm [shape: f32[2,8,128], index: 16, kind: output, shape index: {}]  }
   0x1   :  { %11186 = sst [smem:[#allocation11_spill]] %s11156_s0 }
   0x2   :  { %11187 = sst [smem:[#allocation12_spill]] %s11157_s1 }
   0x3   :  { %11188 = sst [smem:[#allocation13_spill]] %s11158_s2 }
   0x4   :  { %11189 = sst [smem:[#allocation14_spill]] %s11159_s3 }
   0x5   :  { %11190 = sst [smem:[#allocation15_spill]] %s11172_s16 }
   0x6   :  { %21 = vsyncpa [#allocation3], 0 }
   0x7   :  { %23 = vsyncpa [#allocation3 + $0x1], 0  ;;  %s9313_s21 = smov 0   ;;  %s9315_s22 = smov 0  }
   0x8   :  { %s9317_s23 = smov 0   ;;  %s9319_s24 = smov 0  }
   0x9 LB: > { %11191 = sst [smem:[#allocation5_spill]] %s9207_s21  ;;  %s9334_s25 = sadd.s32 4294967295, %s9219_s24   ;;  %s9219_s24 = sphi %s9319_s24, %s11210_s24   ;;  %s9215_s23 = sphi %s9317_s23, %s11212_s23   ;;  %s9211_s22 = sphi %s9315_s22, %s11214_s22   ;;  %s9207_s21 = sphi %s9313_s21, %s11213_s21  }
   0xa   : > { %11192 = sst [smem:[#allocation6_spill]] %s9215_s23  ;;  %s6944_s26 = sadd.s32 4294967294, %s9219_s24  }
   0xb   : > { %11193 = sst [smem:[#allocation7_spill]] %s9219_s24  ;;  %s9338_s27 = sadd.s32 1, %s9219_s24  }
   0xc   : > { %11194 = sst [smem:[#allocation8_spill]] %s9338_s27  ;;  %s382_s28 = sadd.s32 1, %s9215_s23 }
   0xd   : > { %s379_s29 = ssub.s32 %s9219_s24, %s9338_s27  ;;  %p392_p0 = scmp.ne.s32.totalorder %s9215_s23, %s9211_s22 }
   0xe   : > { %p380_p1 = scmp.eq.s32.totalorder %s379_s29, 0  ;;  %p393_p2 = scmp.eq.s32.totalorder %s9334_s25, 1 }
   0xf   : > { %p398_p3 = scmp.ne.s32.totalorder %s9211_s22, %s9207_s21  ;;  %p399_p4 = scmp.eq.s32.totalorder %s6944_s26, 1 }
  0x10   : > { %s9349_s30 = scalar_select %p380_p1, %s9215_s23, %s382_s28  }
  0x11   : > { %p9351_p5 = por %p393_p2, %p392_p0  ;;  %p9355_p6 = por %p399_p4, %p398_p3 }
  0x12   : > { %11195 = sst [smem:[#allocation9_spill]] %s9349_s30  ;;  %p6947_p7 = scmp.ge.s32.totalorder %s9219_s24, 1 }
  0x13   : > { %s11197_s17 = scalar_select %p9355_p6, 1, 0 }
  0x14   : > { %p472_p8 = scmp.lt.s32.totalorder %s9219_s24, 3 }
  0x15   : > { %11198 = sst [smem:[#allocation10_spill]] %s11197_s17 }
  0x16   : > { %p473_p9 = pnand %p6947_p7, %p472_p8 }
  0x17   : > { %p524_p10 = scmp.lt.s32.totalorder (!%p473_p9), %s9334_s25, 1  ;;  %s11199_s28 = sld [smem:[#allocation11_spill]] (!%p473_p9) }
  0x18   : > { %476 = sbr.rel (%p473_p9) target bundleno = 11571 (0x2d33), region = 84  ;;  %s11200_s2 = sld [smem:[#allocation13_spill]] (!%p473_p9) }
  0x19   : > { %s11201_s3 = sld [smem:[#allocation14_spill]] (!%p473_p9)  ;;  %s11182_s20 = smov (!%p473_p9), 32  }
  0x1a   : > { %s11202_s1 = sld [smem:[#allocation12_spill]] (!%p473_p9)  ;;  %s11205_s17 = smov (!%p473_p9), 64  }
  0x1d   : > { %s9363_s18 = scalar_select %p524_p10, %s9334_s25, 1  ;;  %v8562_v1 = vld [vmem:[%s11160_s4 + $0xac] ss:$12 sps:$4 sm:$0xff]   ;;  %v8564_v2 = vld [vmem:[%s11160_s4 + $0xa8] ss:$12 sps:$4 sm:$0xff]   ;;  %v9221_v3 = vmov 0.0   ;;  %v597_v41 = vlaneseq }
  0x1e   : > { %8165 = vmatprep.subr.bf16.mxu1 %v9221_v3  ;;  %v8565_v4 = vld [vmem:[%s11160_s4 + $0xb0] ss:$12 sps:$4 sm:$0xff]   ;;  %v8566_v5 = vld [vmem:[%s11160_s4 + $0x94] ss:$12 sps:$4 sm:$0xff]   ;;  %740 = vmatprep.subr.bf16.mxu0 %v8562_v1  ;;  %v8569_v7 = vld [vmem:[%s11160_s4 + $0x98] ss:$12 sps:$4 sm:$0xff]  }
  0x1f   : > { %s6949_s19 = sshll.u32 %s9363_s18, 3  ;;  %v8568_v6 = vld [vmem:[%s11160_s4 + $0x90] ss:$12 sps:$4 sm:$0xff]   ;;  %741 = vmatpush1.bf16.msra.mxu0 %v8564_v2  ;;  %8166 = vmatpush3.bf16.msra.mxu1 %v8565_v4  ;;  %v8572_v13 = vld [vmem:[%s11160_s4 + $0x78] ss:$12 sps:$4 sm:$0xff]   ;;  %v9222_v25 = vmov 0  }
  0x20   : > { %s527_s29 = scalar_lea.vmem %s11199_s28, %s6949_s19  ;;  %742 = vmatprep.subr.bf16.mxu0 %v8566_v5  ;;  %8167 = vmatprep.subr.bf16.mxu1 %v9221_v3  ;;  %v8570_v12 = vld [vmem:[%s11160_s4 + $0x7c] ss:$12 sps:$4 sm:$0xff]   ;;  %v8573_v14 = vld [vmem:[%s11160_s4 + $0x80] ss:$12 sps:$4 sm:$0xff]   ;;  %v8574_v15 = vld [vmem:[%s11160_s4 + $0x64] ss:$12 sps:$4 sm:$0xff]   ;;  %s9501_s23 = scalar_lea.vmem %s11202_s1, %s9363_s18 }
  0x21   : > { %v533_v0 = vld [vmem:[%s527_s29] sm:$0xff]  ;;  %v8577_v17 = vld [vmem:[%s11160_s4 + $0x68] ss:$12 sps:$4 sm:$0xff]   ;;  %v8578_v18 = vld [vmem:[%s11160_s4 + $0x4c] ss:$12 sps:$4 sm:$0xff]   ;;  %772 = vmatprep.mubr.bf16.mxu0 %v9222_v25  ;;  %vm9223_vm0 = vmmov 0  }
  0x22   : > { %536 = vadd.xlane.f32.xlu0 %v533_v0  ;;  %v8576_v16 = vld [vmem:[%s11160_s4 + $0x60] ss:$12 sps:$4 sm:$0xff]   ;;  %v8580_v19 = vld [vmem:[%s11160_s4 + $0x48] ss:$12 sps:$4 sm:$0xff]   ;;  %v8581_v20 = vld [vmem:[%s11160_s4 + $0x50] ss:$12 sps:$4 sm:$0xff]   ;;  %8181 = vmatprep.mubr.msk.bf16.mxu1 %vm9223_vm0, %v9221_v3 }
  0x23   : > { %743 = vmatpush1.bf16.msra.mxu0 %v8568_v6  ;;  %8168 = vmatpush3.bf16.msra.mxu1 %v8569_v7  ;;  %v8582_v21 = vld [vmem:[%s11160_s4 + $0x34] ss:$12 sps:$4 sm:$0xff]   ;;  %v8584_v22 = vld [vmem:[%s11160_s4 + $0x30] ss:$12 sps:$4 sm:$0xff]   ;;  %v8585_v23 = vld [vmem:[%s11160_s4 + $0x38] ss:$12 sps:$4 sm:$0xff]  }
  0x24   : > { %8169 = vmatprep.subr.bf16.mxu1 %v9221_v3  ;;  %744 = vmatprep.subr.bf16.mxu0 %v8570_v12  ;;  %v8586_v24 = vld [vmem:[%s11160_s4 + $0x1c] ss:$12 sps:$4 sm:$0xff]   ;;  %v8588_v26 = vld [vmem:[%s11160_s4 + $0x18] ss:$12 sps:$4 sm:$0xff]   ;;  %v8589_v27 = vld [vmem:[%s11160_s4 + $0x20] ss:$12 sps:$4 sm:$0xff]  }
  0x25   : > { %v8590_v28 = vld [vmem:[%s11160_s4 + $0x4] ss:$12 sps:$4 sm:$0xff]   ;;  %v8592_v29 = vld [vmem:[%s11160_s4] ss:$12 sps:$4 sm:$0xff]   ;;  %v8593_v30 = vld [vmem:[%s11160_s4 + $0x8] ss:$12 sps:$4 sm:$0xff]  }
  0x26   : > { %v6950_v35 = vld [vmem:[%s11200_s2] ss:$0 sm:$0xff]  ;;  %v9468_v42 = vshrl.u32 %v597_v41, 7  ;;  %vm830_vm1 = vcmask 261120   ;;  %s11184_s29 = smov 96   ;;  %vm893_vm2 = vcmask 1043456  }
  0x27   : > { %745 = vmatpush1.bf16.msra.mxu0 %v8572_v13  ;;  %8170 = vmatpush3.bf16.msra.mxu1 %v8573_v14  ;;  %v6951_v37 = vld [vmem:[%s11201_s3] ss:$0 sm:$0xff]  ;;  %vm877_vm3 = vcmask 64512   ;;  %s11180_s18 = smov 64   ;;  %vm1283_vm4 = vcmask 523264   ;;  %vm1285_vm5 = vcmask 785408  }
  0x28   : > { %8171 = vmatprep.subr.bf16.mxu1 %v9221_v3  ;;  %746 = vmatprep.subr.bf16.mxu0 %v8574_v15  ;;  %v9471_v43 = vsub.s32 1, %v9468_v42  ;;  %v595_v44 = vld [vmem:[%s11161_s5] sm:$0x7]  ;;  %v9477_v45 = vsub.s32 2, %v9468_v42  ;;  %v9481_v49 = vsub.s32 0, %v9468_v42  ;;  %s521_s2 = sand.u32 1, %s9211_s22  }
  0x29   : > { %v9504_v2 = vld [vmem:[%s9501_s23] ss:$0 sm:$0xff]  ;;  %s11206_s3 = sld [smem:[#allocation15_spill]]  ;;  %s6863_s30 = scalar_lea.sflag [#allocation3], %s521_s2 }
  0x2a   : > { %v604_v46 = vrot.slane %v595_v44, %v9471_v43  ;;  %v608_v52 = vrot.slane %v595_v44, %v9477_v45  ;;  %v600_v56 = vrot.slane %v595_v44, %v9481_v49  ;;  %s9227_s1 = smov [#allocation2]  }
  0x2b   : > { %747 = vmatpush1.bf16.msra.mxu0 %v8576_v16  ;;  %8172 = vmatpush3.bf16.msra.mxu1 %v8577_v17 }
  0x2c   : > { %748 = vmatprep.subr.bf16.mxu0 %v8578_v18  ;;  %8173 = vmatprep.subr.bf16.mxu1 %v9221_v3 }
  0x2f   : > { %749 = vmatpush1.bf16.msra.mxu0 %v8580_v19  ;;  %8174 = vmatpush3.bf16.msra.mxu1 %v8581_v20 }
  0x30   : > { %750 = vmatprep.subr.bf16.mxu0 %v8582_v21  ;;  %8175 = vmatprep.subr.bf16.mxu1 %v9221_v3 }
  0x33   : > { %751 = vmatpush1.bf16.msra.mxu0 %v8584_v22  ;;  %8176 = vmatpush3.bf16.msra.mxu1 %v8585_v23 }
  0x34   : > { %752 = vmatprep.subr.bf16.mxu0 %v8586_v24  ;;  %8177 = vmatprep.subr.bf16.mxu1 %v9221_v3 }
  0x37   : > { %753 = vmatpush1.bf16.msra.mxu0 %v8588_v26  ;;  %8178 = vmatpush3.bf16.msra.mxu1 %v8589_v27 }
  0x38   : > { %754 = vmatprep.subr.bf16.mxu0 %v8590_v28  ;;  %8179 = vmatprep.subr.bf16.mxu1 %v9221_v3 }
  0x3b   : > { %755 = vmatpush1.bf16.msra.mxu0 %v8592_v29  ;;  %8180 = vmatpush3.bf16.msra.mxu1 %v8593_v30 }
  0x3c   : > { %8185 = vmatprep.subr.bf16.mxu1 %v9221_v3  ;;  %8209 = vmatprep.subr.bf16.mxu0 %v9221_v3 }
  0xab   : > { %v537_v8 = vpop.xlane.xlu0 %536 }
  0xac   : > { %v539_v9 = vmul.f32 0.0078125, %v537_v8 }
  0xae   : > { %v540_v10 = vsub.f32 %v533_v0, %v539_v9 }
  0xb0   : > { %v541_v11 = vmul.f32 %v540_v10, %v540_v10 }
  0xb2   : > { %542 = vadd.xlane.f32.xlu0 %v541_v11 }
 0x13b   : > { %v543_v31 = vpop.xlane.xlu0 %542 }
 0x13c   : > { %v544_v32 = vmul.f32 0.0078125, %v543_v31 }
 0x13e   : > { %v545_v33 = vadd.f32 1e-12, %v544_v32 }
 0x140   : > { %9042 = vrsqrt.f32 %v545_v33 }
 0x14d   : > { %v9043_v34 = vpop.eup %9042 }
 0x14e   : > { %v547_v36 = vmul.f32 %v9043_v34, %v540_v10 }
 0x150   : > { %v554_v38 = vmul.f32 %v6950_v35, %v547_v36 }
 0x152   : > { %v9460_v39 = vadd.f32 %v6951_v37, %v554_v38 }
 0x154   : > { %v562_v40 = vpack.c.bf16 %v9460_v39, %v9460_v39 }
 0x156   : > { %773 = vmatmul.mubr.bf16.vlgmr.msra.gmra.mxu0 %v562_v40  ;;  %8182 = vmatmul.mubr.bf16.vlgmr.msra.gmra.mxu1 %v562_v40 }
 0x157   : > { %8187 = vmatprep.mubr.msk.bf16.mxu1 %vm9223_vm0, %v9221_v3  ;;  %8211 = vmatprep.mubr.msk.bf16.mxu0 %vm9223_vm0, %v9221_v3 }
 0x216   : > { %v774_v47 = vpop.f32.mrf.mxu0  ;;  %v815_v48 = vpop.f32.mrf.mxu1 }
 0x217   : > { %v816_v60 = vadd.f32 %v815_v48, %v608_v52  ;;  %v775_v62 = vadd.f32 %v774_v47, %v600_v56 }
 0x218   : > { %v776_v50 = vpop.f32.mrf.mxu0  ;;  %v8183_v51 = vpop.f32.mrf.mxu1 }
 0x219   : > { %v777_v53 = vadd.f32 %v776_v50, %v604_v46  ;;  %v9488_v63 = vpack.c.bf16 %v816_v60, %v816_v60  ;;  %v821_v0 = vpack.c.bf16 %v775_v62, %v775_v62 }
 0x21a   : > { %v778_v54 = vpop.f32.mrf.mxu0  ;;  %v818_v55 = vpop.f32.mrf.mxu1 }
 0x21b   : > { %v822_v57 = vpack.c.bf16 %v777_v53, %v777_v53  ;;  %v895_v1 = vsel %vm893_vm2, %v9488_v63, 0 }
 0x21c   : > { %v779_v58 = vpop.f32.mrf.mxu0  ;;  %v8184_v59 = vpop.f32.mrf.mxu1 }
 0x21d   : > { %941 = vrot.lane.b32.xlu0 %v822_v57, %s11184_s29  ;;  %v835_v61 = vsel %vm830_vm1, %v822_v57, 0 }
 0x21e   : > { %8186 = vmatpush3.bf16.xpose.msra.mxu1 %v835_v61 }
 0x21f   : > { %8191 = vmatprep.subr.bf16.mxu1 %v9221_v3 }
 0x221   : > { %1162 = vrot.lane.b32.xlu0 %v822_v57, %s11182_s20 }
 0x225   : > { %8188 = vmatmul.mubr.msk.bf16.vlgmr.msra.gmra.mxu1 %vm830_vm1, %v821_v0 }
 0x226   : > { %8192 = vmatpush3.bf16.msra.mxu1 %v895_v1  ;;  %8193 = vmatprep.mubr.msk.bf16.mxu1 %vm9223_vm0, %v9221_v3 }
 0x227   : > { %8197 = vmatprep.subr.bf16.mxu1 %v9221_v3 }
 0x28f   : > { %v942_v17 = vpop.permute.xlu0 %941 }
 0x290   : > { %v947_v27 = vsel %vm830_vm1, %v942_v17, 0 }
 0x293   : > { %v1163_v21 = vpop.permute.xlu0 %1162 }
 0x294   : > { %v1168_v24 = vsel %vm830_vm1, %v1163_v21, 0 }
 0x2e5   : > { %v871_v4 = vpop.f32.mrf.mxu1 }
 0x2e6   : > { %v872_v5 = vadd.f32 %v9504_v2, %v871_v4 }
 0x2e7   : > { %v8189_v6 = vpop.f32.mrf.mxu1 }
 0x2e8   : > { %v878_v7 = vsel %vm877_vm3, %v872_v5, -inf }
 0x2e9   : > { %879 = vmax.xlane.f32.xlu1 %v878_v7  ;;  %v874_v8 = vpop.f32.mrf.mxu1 }
 0x2eb   : > { %v8190_v9 = vpop.f32.mrf.mxu1 }
 0x372   : > { %v880_v10 = vpop.xlane.xlu1 %879 }
 0x373   : > { %v881_v11 = vsub.f32 %v872_v5, %v880_v10 }
 0x375   : > { %v882_v12 = vmul.f32 1.442695, %v881_v11 }
 0x377   : > { %9044 = vpow2.f32 %v882_v12 }
 0x384   : > { %v9045_v13 = vpop.eup %9044 }
 0x385   : > { %v884_v14 = vsel %vm877_vm3, %v9045_v13, 0.0 }
 0x386   : > { %885 = vadd.xlane.f32.xlu1 %v884_v14 }
 0x397   : > { %938 = vrot.lane.b32.xlu1 %v821_v0, %s11184_s29 }
 0x39b   : > { %1052 = vrot.lane.b32.xlu1 %v822_v57, %s11180_s18 }
 0x39f   : > { %1050 = vrot.lane.b32.xlu1 %v821_v0, %s11180_s18 }
 0x3a3   : > { %1160 = vrot.lane.b32.xlu1 %v821_v0, %s11182_s20 }
 0x40f   : > { %v886_v15 = vpop.xlane.xlu1 %885 }
 0x410   : > { %9046 = vrcp.f32 %v886_v15 }
 0x413   : > { %v939_v16 = vpop.permute.xlu1 %938 }
 0x417   : > { %v1053_v18 = vpop.permute.xlu1 %1052 }
 0x418   : > { %v1058_v19 = vsel %vm830_vm1, %v1053_v18, 0 }
 0x419   : > { %8210 = vmatpush3.bf16.xpose.msra.mxu0 %v1058_v19 }
 0x41a   : > { %8221 = vmatprep.subr.bf16.mxu0 %v9221_v3 }
 0x41b   : > { %v1051_v23 = vpop.permute.xlu1 %1050 }
 0x41d   : > { %v9047_v20 = vpop.eup %9046 }
 0x41e   : > { %v888_v22 = vmul.f32 %v9047_v20, %v9045_v13 }
 0x41f   : > { %v1161_v28 = vpop.permute.xlu1 %1160 }
 0x420   : > { %8212 = vmatmul.mubr.msk.bf16.vlgmr.msra.gmra.mxu0 %vm830_vm1, %v1051_v23  ;;  %v889_v26 = vpack.c.bf16 %v888_v22, %v888_v22 }
 0x421   : > { %8222 = vmatpush3.bf16.xpose.msra.mxu0 %v1168_v24  ;;  %8223 = vmatprep.mubr.msk.bf16.mxu0 %vm9223_vm0, %v9221_v3 }
 0x422   : > { %8194 = vmatmul.mubr.msk.bf16.vlgmr.msra.gmra.mxu1 %vm877_vm3, %v889_v26  ;;  %8233 = vmatprep.subr.bf16.mxu0 %v9221_v3 }
 0x423   : > { %8198 = vmatpush3.bf16.xpose.msra.mxu1 %v947_v27  ;;  %8199 = vmatprep.mubr.msk.bf16.mxu1 %vm9223_vm0, %v9221_v3  ;;  %v8594_v27 = vld [vmem:[%s11162_s6 + $0x38] sm:$0xff]  }
 0x424   : > { %8203 = vmatprep.subr.bf16.mxu1 %v9221_v3 }
 0x428   : > { %8224 = vmatmul.mubr.msk.bf16.vlgmr.msra.gmra.mxu0 %vm830_vm1, %v1161_v28  ;;  %v8595_v28 = vld [vmem:[%s11162_s6 + $0x30] sm:$0xff]  }
 0x429   : > { %8249 = vmatprep.mubr.msk.bf16.mxu0 %vm9223_vm0, %v9221_v3  ;;  %8234 = vmatpush3.bf16.msra.mxu0 %v8594_v27  ;;  %v8634_v27 = vld [vmem:[%s11166_s10 + $0x44] ss:$16 sps:$4 sm:$0xff]  }
 0x42a   : > { %8200 = vmatmul.mubr.msk.bf16.vlgmr.msra.gmra.mxu1 %vm830_vm1, %v939_v16  ;;  %8235 = vmatprep.subr.bf16.mxu0 %v9221_v3 }
 0x42b   : > { %8205 = vmatprep.mubr.msk.bf16.mxu1 %vm9223_vm0, %v9221_v3 }
 0x42d   : > { %8236 = vmatpush3.bf16.msra.mxu0 %v8595_v28  ;;  %v8637_v28 = vld [vmem:[%s11166_s10 + $0x4c] ss:$16 sps:$4 sm:$0xff]  }
 0x42e   : > { %8237 = vmatprep.subr.bf16.mxu0 %v9221_v3 }
 0x4e0   : > { %v1094_v29 = vpop.f32.mrf.mxu0 }
 0x4e1   : > { %v1095_v30 = vadd.f32 %v9504_v2, %v1094_v29  ;;  %v8596_v29 = vld [vmem:[%s11162_s6 + $0x28] sm:$0xff]  }
 0x4e2   : > { %v9532_v31 = vpop.f32.mrf.mxu1  ;;  %v8213_v32 = vpop.f32.mrf.mxu0  ;;  %8238 = vmatpush3.bf16.msra.mxu0 %v8596_v29  ;;  %v8632_v29 = vld [vmem:[%s11166_s10 + $0x40] ss:$16 sps:$4 sm:$0xff]  }
 0x4e3   : > { %v1100_v33 = vsel %vm877_vm3, %v1095_v30, -inf  ;;  %8239 = vmatprep.subr.bf16.mxu0 %v9221_v3  ;;  %v8598_v32 = vld [vmem:[%s11162_s6 + $0x18] sm:$0xff]  }
 0x4e4   : > { %1101 = vmax.xlane.f32.xlu1 %v1100_v33  ;;  %v8195_v34 = vpop.f32.mrf.mxu1  ;;  %v1097_v35 = vpop.f32.mrf.mxu0  ;;  %v8599_v33 = vld [vmem:[%s11162_s6 + $0x10] sm:$0xff]  }
 0x4e5   : > { %v8600_v34 = vld [vmem:[%s11162_s6 + $0x8] sm:$0xff]  }
 0x4e6   : > { %v934_v36 = vpop.f32.mrf.mxu1  ;;  %v8214_v37 = vpop.f32.mrf.mxu0 }
 0x4e7   : > { %v8601_v37 = vld [vmem:[%s11162_s6] sm:$0xff]  }
 0x4e8   : > { %v8196_v38 = vpop.f32.mrf.mxu1  ;;  %v1204_v40 = vpop.f32.mrf.mxu0 }
 0x4e9   : > { %v1205_v50 = vadd.f32 %v9504_v2, %v1204_v40 }
 0x4ea   : > { %v983_v41 = vpop.f32.mrf.mxu1  ;;  %v8225_v44 = vpop.f32.mrf.mxu0 }
 0x4eb   : > { %v984_v46 = vadd.f32 %v9504_v2, %v983_v41  ;;  %v1210_v55 = vsel %vm877_vm3, %v1205_v50, -inf }
 0x4ec   : > { %v8201_v47 = vpop.f32.mrf.mxu1  ;;  %v1207_v48 = vpop.f32.mrf.mxu0 }
 0x4ed   : > { %v989_v51 = vsel %vm877_vm3, %v984_v46, -inf }
 0x4ee   : > { %v8226_v52 = vpop.f32.mrf.mxu0  ;;  %990 = vmax.xlane.f32.xlu0 %v989_v51  ;;  %v986_v53 = vpop.f32.mrf.mxu1 }
 0x4f0   : > { %v8202_v54 = vpop.f32.mrf.mxu1 }
 0x4f2   : > { %1211 = vmax.xlane.f32.xlu0 %v1210_v55 }
 0x56d   : > { %v1102_v56 = vpop.xlane.xlu1 %1101 }
 0x56e   : > { %v1103_v57 = vsub.f32 %v1095_v30, %v1102_v56  ;;  %v8597_v30 = vld [vmem:[%s11162_s6 + $0x20] sm:$0xff]  }
 0x56f   : > { %8240 = vmatpush3.bf16.msra.mxu0 %v8597_v30  ;;  %v8635_v30 = vld [vmem:[%s11166_s10 + $0x48] ss:$16 sps:$4 sm:$0xff]  }
 0x570   : > { %v1104_v58 = vmul.f32 1.442695, %v1103_v57  ;;  %8241 = vmatprep.subr.bf16.mxu0 %v9221_v3 }
 0x572   : > { %9048 = vpow2.f32 %v1104_v58 }
 0x573   : > { %8242 = vmatpush3.bf16.msra.mxu0 %v8598_v32  ;;  %v8640_v32 = vld [vmem:[%s11166_s10 + $0x24] ss:$16 sps:$4 sm:$0xff]  }
 0x574   : > { %8243 = vmatprep.subr.bf16.mxu0 %v9221_v3 }
 0x577   : > { %v991_v59 = vpop.xlane.xlu0 %990  ;;  %8244 = vmatpush3.bf16.msra.mxu0 %v8599_v33  ;;  %v8643_v33 = vld [vmem:[%s11166_s10 + $0x2c] ss:$16 sps:$4 sm:$0xff]  }
 0x578   : > { %v992_v60 = vsub.f32 %v984_v46, %v991_v59  ;;  %8245 = vmatprep.subr.bf16.mxu0 %v9221_v3 }
 0x57a   : > { %v993_v61 = vmul.f32 1.442695, %v992_v60  ;;  %v6985_v60 = vld [vmem:[%s11163_s7] ss:$0 sm:$0xff] }
 0x57b   : > { %v1212_v62 = vpop.xlane.xlu0 %1211  ;;  %8246 = vmatpush3.bf16.msra.mxu0 %v8600_v34  ;;  %v8638_v34 = vld [vmem:[%s11166_s10 + $0x20] ss:$16 sps:$4 sm:$0xff]  }
 0x57c   : > { %9050 = vpow2.f32 %v993_v61  ;;  %v1213_v0 = vsub.f32 %v1205_v50, %v1212_v62  ;;  %8247 = vmatprep.subr.bf16.mxu0 %v9221_v3 }
 0x57e   : > { %v1214_v1 = vmul.f32 1.442695, %v1213_v0 }
 0x57f   : > { %v9049_v2 = vpop.eup %9048  ;;  %8248 = vmatpush3.bf16.msra.mxu0 %v8601_v37  ;;  %v8649_v37 = vld [vmem:[%s11166_s10 + $0xc] ss:$16 sps:$4 sm:$0xff]  }
 0x580   : > { %9052 = vpow2.f32 %v1214_v1  ;;  %v1106_v4 = vsel %vm877_vm3, %v9049_v2, 0.0 }
 0x581   : > { %1107 = vadd.xlane.f32.xlu0 %v1106_v4  ;;  %v8602_v4 = vld [vmem:[%s11166_s10 + $0xe0] ss:$16 sps:$4 sm:$0xff]  }
 0x589   : > { %v9051_v5 = vpop.eup %9050 }
 0x58a   : > { %v995_v6 = vsel %vm877_vm3, %v9051_v5, 0.0 }
 0x58b   : > { %996 = vadd.xlane.f32.xlu0 %v995_v6  ;;  %v8605_v6 = vld [vmem:[%s11166_s10 + $0xe8] ss:$16 sps:$4 sm:$0xff]  }
 0x58d   : > { %v9053_v7 = vpop.eup %9052 }
 0x58e   : > { %v1216_v8 = vsel %vm877_vm3, %v9053_v7, 0.0 }
 0x58f   : > { %1217 = vadd.xlane.f32.xlu1 %v1216_v8  ;;  %v8613_v8 = vld [vmem:[%s11166_s10 + $0xcc] ss:$16 sps:$4 sm:$0xff]  }
 0x5a0   : > { %1112 = vrot.lane.b32.xlu1 %v9488_v63, %s11180_s18 }
 0x5a1   : > { %1002 = vrot.lane.b32.xlu0 %v9488_v63, %s11184_s29 }
 0x5a4   : > { %1222 = vrot.lane.b32.xlu1 %v9488_v63, %s11182_s20 }
 0x60a   : > { %v1108_v9 = vpop.xlane.xlu0 %1107 }
 0x614   : > { %v997_v10 = vpop.xlane.xlu0 %996 }
 0x615   : > { %9054 = vrcp.f32 %v997_v10  ;;  %v8611_v10 = vld [vmem:[%s11166_s10 + $0xc8] ss:$16 sps:$4 sm:$0xff]  }
 0x616   : > { %9056 = vrcp.f32 %v1108_v9  ;;  %v8608_v9 = vld [vmem:[%s11166_s10 + $0xc0] ss:$16 sps:$4 sm:$0xff]  }
 0x618   : > { %v1003_v11 = vpop.permute.xlu0 %1002  ;;  %v1218_v13 = vpop.xlane.xlu1 %1217 }
 0x619   : > { %v1008_v12 = vsel %vm893_vm2, %v1003_v11, 0  ;;  %9058 = vrcp.f32 %v1218_v13 }
 0x61a   : > { %8204 = vmatpush3.bf16.msra.mxu1 %v1008_v12 }
 0x61b   : > { %8215 = vmatprep.subr.bf16.mxu1 %v9221_v3 }
 0x61c   : > { %v1113_v16 = vpop.permute.xlu1 %1112 }
 0x61d   : > { %v1118_v19 = vsel %vm893_vm2, %v1113_v16, 0  ;;  %v8619_v16 = vld [vmem:[%s11166_s10 + $0xac] ss:$16 sps:$4 sm:$0xff]  }
 0x620   : > { %v1223_v20 = vpop.permute.xlu1 %1222 }
 0x621   : > { %v1228_v23 = vsel %vm893_vm2, %v1223_v20, 0  ;;  %v8623_v20 = vld [vmem:[%s11166_s10 + $0x88] ss:$16 sps:$4 sm:$0xff]  }
 0x622   : > { %v9055_v14 = vpop.eup %9054 }
 0x623   : > { %v999_v15 = vmul.f32 %v9055_v14, %v9051_v5  ;;  %v9057_v18 = vpop.eup %9056  ;;  %v8604_v5 = vld [vmem:[%s11166_s10 + $0xe4] ss:$16 sps:$4 sm:$0xff]  }
 0x624   : > { %v1110_v63 = vmul.f32 %v9057_v18, %v9049_v2  ;;  %v8617_v18 = vld [vmem:[%s11166_s10 + $0xa8] ss:$16 sps:$4 sm:$0xff]  }
 0x625   : > { %v1000_v17 = vpack.c.bf16 %v999_v15, %v999_v15  ;;  %v8616_v15 = vld [vmem:[%s11166_s10 + $0xa4] ss:$16 sps:$4 sm:$0xff]  }
 0x626   : > { %v1111_v21 = vpack.c.bf16 %v1110_v63, %v1110_v63  ;;  %v9059_v22 = vpop.eup %9058  ;;  %v8622_v63 = vld [vmem:[%s11166_s10 + $0x84] ss:$16 sps:$4 sm:$0xff]  }
 0x627   : > { %8206 = vmatmul.mubr.msk.bf16.vlgmr.msra.gmra.mxu1 %vm877_vm3, %v1000_v17  ;;  %v1220_v24 = vmul.f32 %v9059_v22, %v9053_v7  ;;  %v8607_v7 = vld [vmem:[%s11166_s10 + $0xec] ss:$16 sps:$4 sm:$0xff]   ;;  %v8614_v17 = vld [vmem:[%s11166_s10 + $0xa0] ss:$16 sps:$4 sm:$0xff]   ;;  %v8628_v22 = vld [vmem:[%s11166_s10 + $0x64] ss:$16 sps:$4 sm:$0xff]  }
 0x628   : > { %8216 = vmatpush3.bf16.msra.mxu1 %v1118_v19  ;;  %8217 = vmatprep.mubr.msk.bf16.mxu1 %vm9223_vm0, %v9221_v3  ;;  %v8620_v19 = vld [vmem:[%s11166_s10 + $0x80] ss:$16 sps:$4 sm:$0xff]  }
 0x629   : > { %8227 = vmatprep.subr.bf16.mxu1 %v9221_v3  ;;  %v1221_v26 = vpack.c.bf16 %v1220_v24, %v1220_v24  ;;  %1683 = vmatprep.subr.bf16.mxu0 %v8607_v7  ;;  %v8626_v24 = vld [vmem:[%s11166_s10 + $0x60] ss:$16 sps:$4 sm:$0xff]  }
 0x62a   : > { %v8665_v7 = vld [vmem:[%s11168_s12 + $0xa0] sm:$0xff]  }
 0x62f   : > { %8218 = vmatmul.mubr.msk.bf16.vlgmr.msra.gmra.mxu1 %vm877_vm3, %v1111_v21  ;;  %v8625_v21 = vld [vmem:[%s11166_s10 + $0x8c] ss:$16 sps:$4 sm:$0xff]  }
 0x630   : > { %8228 = vmatpush3.bf16.msra.mxu1 %v1228_v23  ;;  %8229 = vmatprep.mubr.msk.bf16.mxu1 %vm9223_vm0, %v9221_v3  ;;  %v8631_v23 = vld [vmem:[%s11166_s10 + $0x6c] ss:$16 sps:$4 sm:$0xff]  }
 0x631   : > { %1642 = vmatprep.subr.bf16.mxu1 %v8604_v5  ;;  %v8663_v5 = vld [vmem:[%s11168_s12 + $0xe0] sm:$0xff]  }
 0x637   : > { %8230 = vmatmul.mubr.msk.bf16.vlgmr.msra.gmra.mxu1 %vm877_vm3, %v1221_v26  ;;  %v8629_v26 = vld [vmem:[%s11166_s10 + $0x68] ss:$16 sps:$4 sm:$0xff]  }
 0x638   : > { %1674 = vmatprep.mubr.bf16.mxu1 %v9222_v25  ;;  %1643 = vmatpush1.bf16.msra.mxu1 %v8602_v4  ;;  %v8662_v4 = vld [vmem:[%s11168_s12 + $0x60] sm:$0xff]  }
 0x6e7   : > { %v1044_v35 = vpop.f32.mrf.mxu1 }
 0x6e8   : > { %1271 = vrot.lane.b32.xlu1 %v1044_v35, %s11182_s20  ;;  %v8641_v35 = vld [vmem:[%s11166_s10 + $0x28] ss:$16 sps:$4 sm:$0xff]   ;;  %s11203_s20 = smov 96  }
 0x6e9   : > { %v8207_v36 = vpop.f32.mrf.mxu1 }
 0x6ea   : > { %v8646_v36 = vld [vmem:[%s11166_s10 + $0x4] ss:$16 sps:$4 sm:$0xff]  }
 0x6eb   : > { %v1047_v38 = vpop.f32.mrf.mxu1 }
 0x6ec   : > { %v8644_v38 = vld [vmem:[%s11166_s10] ss:$16 sps:$4 sm:$0xff]  }
 0x6ed   : > { %v8208_v40 = vpop.f32.mrf.mxu1 }
 0x6ee   : > { %v8647_v40 = vld [vmem:[%s11166_s10 + $0x8] ss:$16 sps:$4 sm:$0xff]  }
 0x6ef   : > { %v1154_v41 = vpop.f32.mrf.mxu1 }
 0x6f0   : > { %1275 = vrot.lane.b32.xlu0 %v1154_v41, %s11180_s18  ;;  %s11204_s18 = smov 32  }
 0x6f1   : > { %v8219_v44 = vpop.f32.mrf.mxu1 }
 0x6f3   : > { %v1157_v46 = vpop.f32.mrf.mxu1 }
 0x6f5   : > { %v8220_v47 = vpop.f32.mrf.mxu1 }
 0x6f7   : > { %v1264_v48 = vpop.f32.mrf.mxu1 }
 0x6f8   : > { %1279 = vrot.lane.b32.xlu1 %v1264_v48, %s11184_s29  ;;  %v6994_v48 = vld [vmem:[%s11164_s8] ss:$0 sm:$0xff]  ;;  %s6948_s29 = sshll.u32 %s521_s2, 3 }
 0x6f9   : > { %v8231_v50 = vpop.f32.mrf.mxu1 }
 0x6fb   : > { %v1267_v51 = vpop.f32.mrf.mxu1 }
 0x6fc   : > { %v6995_v51 = vld [vmem:[%s11165_s9] ss:$0 sm:$0xff] }
 0x6fd   : > { %v8232_v52 = vpop.f32.mrf.mxu1 }
 0x75a   : > { %v1272_v53 = vpop.permute.xlu1 %1271 }
 0x75b   : > { %v1282_v55 = vsel %vm830_vm1, %v9532_v31, %v1272_v53 }
 0x762   : > { %v1276_v54 = vpop.permute.xlu0 %1275 }
 0x763   : > { %v1284_v56 = vsel %vm1283_vm4, %v1282_v55, %v1276_v54  ;;  %v8650_v55 = vld [vmem:[%s11168_s12 + $0x78] sm:$0xff]  }
 0x76a   : > { %v1280_v57 = vpop.permute.xlu1 %1279 }
 0x76b   : > { %v1286_v58 = vsel %vm1285_vm5, %v1284_v56, %v1280_v57  ;;  %v8651_v56 = vld [vmem:[%s11168_s12 + $0xf8] sm:$0xff]  }
 0x76c   : > { %v1287_v59 = vpack.c.bf16 %v1286_v58, %v1286_v58  ;;  %v8652_v57 = vld [vmem:[%s11168_s12 + $0x38] sm:$0xff]  }
 0x76d   : > { %v8653_v58 = vld [vmem:[%s11168_s12 + $0xb8] sm:$0xff]  }
 0x76e   : > { %8250 = vmatmul.mubr.bf16.vlgmr.msra.gmra.mxu0 %v1287_v59  ;;  %v8654_v59 = vld [vmem:[%s11168_s12 + $0x70] sm:$0xff]  }
 0x76f   : > { %1715 = vmatprep.mubr.bf16.mxu0 %v9222_v25  ;;  %1684 = vmatpush1.bf16.msra.mxu0 %v8605_v6  ;;  %v8664_v6 = vld [vmem:[%s11168_s12 + $0x20] sm:$0xff]  }
 0x770   : > { %1685 = vmatprep.subr.bf16.mxu0 %v8613_v8  ;;  %v8667_v8 = vld [vmem:[%s11168_s12 + $0xd8] sm:$0xff]  }
 0x773   : > { %1686 = vmatpush1.bf16.msra.mxu0 %v8611_v10  ;;  %v8669_v10 = vld [vmem:[%s11168_s12 + $0x98] sm:$0xff]  }
 0x774   : > { %1687 = vmatprep.subr.bf16.mxu0 %v8619_v16  ;;  %v8675_v16 = vld [vmem:[%s11168_s12 + $0xc8] sm:$0xff]  }
 0x777   : > { %1688 = vmatpush1.bf16.msra.mxu0 %v8617_v18  ;;  %v8677_v18 = vld [vmem:[%s11168_s12 + $0x88] sm:$0xff]  }
 0x778   : > { %1689 = vmatprep.subr.bf16.mxu0 %v8625_v21  ;;  %v8681_v21 = vld [vmem:[%s11168_s12 + $0x80] sm:$0xff]  }
 0x77b   : > { %1690 = vmatpush1.bf16.msra.mxu0 %v8623_v20  ;;  %v8680_v20 = vld [vmem:[%s11168_s12] sm:$0xff]  }
 0x77c   : > { %1691 = vmatprep.subr.bf16.mxu0 %v8631_v23  ;;  %v9811_v23 = vsub.s32 3, %v9468_v42 }
 0x77f   : > { %1692 = vmatpush1.bf16.msra.mxu0 %v8629_v26 }
 0x780   : > { %1693 = vmatprep.subr.bf16.mxu0 %v8637_v28 }
 0x783   : > { %1694 = vmatpush1.bf16.msra.mxu0 %v8635_v30 }
 0x784   : > { %1695 = vmatprep.subr.bf16.mxu0 %v8643_v33 }
 0x787   : > { %1696 = vmatpush1.bf16.msra.mxu0 %v8641_v35 }
 0x788   : > { %1697 = vmatprep.subr.bf16.mxu0 %v8649_v37 }
 0x78b   : > { %1698 = vmatpush1.bf16.msra.mxu0 %v8647_v40 }
 0x78c   : > { %7909 = vmatprep.subr.bf16.mxu0 %v8651_v56 }
 0x82e   : > { %v1393_v61 = vpop.f32.mrf.mxu0 }
 0x82f   : > { %v1394_v62 = vadd.f32 %v6985_v60, %v1393_v61  ;;  %v8655_v60 = vld [vmem:[%s11168_s12 + $0xf0] sm:$0xff]  }
 0x830   : > { %v8251_v0 = vpop.f32.mrf.mxu0  ;;  %v8656_v61 = vld [vmem:[%s11168_s12 + $0x30] sm:$0xff]  }
 0x831   : > { %v1399_v1 = vadd.f32 %v1394_v62, %v9460_v39  ;;  %v8610_v39 = vld [vmem:[%s11166_s10 + $0xc4] ss:$16 sps:$4 sm:$0xff]   ;;  %v8658_v0 = vld [vmem:[%s11168_s12 + $0x68] sm:$0xff]  }
 0x832   : > { %v1396_v2 = vpop.f32.mrf.mxu0  ;;  %1644 = vmatprep.subr.bf16.mxu1 %v8610_v39  ;;  %v8657_v62 = vld [vmem:[%s11168_s12 + $0xb0] sm:$0xff]   ;;  %v8666_v39 = vld [vmem:[%s11168_s12 + $0x58] sm:$0xff]  }
 0x833   : > { %1402 = vadd.xlane.f32.xlu0 %v1399_v1  ;;  %1645 = vmatpush1.bf16.msra.mxu1 %v8608_v9  ;;  %v8660_v2 = vld [vmem:[%s11168_s12 + $0x28] sm:$0xff]   ;;  %v8668_v9 = vld [vmem:[%s11168_s12 + $0x18] sm:$0xff]  }
 0x834   : > { %v8252_v31 = vpop.f32.mrf.mxu0  ;;  %1646 = vmatprep.subr.bf16.mxu1 %v8616_v15  ;;  %v8674_v15 = vld [vmem:[%s11168_s12 + $0x48] sm:$0xff]  }
 0x835   : > { %v8661_v31 = vld [vmem:[%s11168_s12 + $0xa8] sm:$0xff]  }
 0x837   : > { %1647 = vmatpush1.bf16.msra.mxu1 %v8614_v17  ;;  %v8676_v17 = vld [vmem:[%s11168_s12 + $0x8] sm:$0xff]  }
 0x838   : > { %1648 = vmatprep.subr.bf16.mxu1 %v8622_v63  ;;  %v8679_v63 = vld [vmem:[%s11168_s12 + $0xc0] sm:$0xff]  }
 0x83b   : > { %1649 = vmatpush1.bf16.msra.mxu1 %v8620_v19  ;;  %v8678_v19 = vld [vmem:[%s11168_s12 + $0x40] sm:$0xff]  }
 0x83c   : > { %1650 = vmatprep.subr.bf16.mxu1 %v8628_v22  ;;  %v1460_v22 = vld [vmem:[%s11167_s11] sm:$0xf] }
 0x83d   : > { %v1473_v26 = vrot.slane %v1460_v22, %v9477_v45  ;;  %v1477_v28 = vrot.slane %v1460_v22, %v9811_v23 }
 0x83f   : > { %1651 = vmatpush1.bf16.msra.mxu1 %v8626_v24  ;;  %v1465_v24 = vrot.slane %v1460_v22, %v9481_v49 }
 0x840   : > { %1652 = vmatprep.subr.bf16.mxu1 %v8634_v27  ;;  %v1469_v27 = vrot.slane %v1460_v22, %v9471_v43 }
 0x843   : > { %1653 = vmatpush1.bf16.msra.mxu1 %v8632_v29 }
 0x844   : > { %1654 = vmatprep.subr.bf16.mxu1 %v8640_v32 }
 0x847   : > { %1655 = vmatpush1.bf16.msra.mxu1 %v8638_v34 }
 0x848   : > { %1656 = vmatprep.subr.bf16.mxu1 %v8646_v36 }
 0x84b   : > { %1657 = vmatpush1.bf16.msra.mxu1 %v8644_v38 }
 0x84c   : > { %7887 = vmatprep.subr.bf16.mxu1 %v8650_v55 }
 0x8bc   : > { %v1403_v11 = vpop.xlane.xlu0 %1402 }
 0x8bd   : > { %v1404_v12 = vmul.f32 0.0078125, %v1403_v11  ;;  %v8670_v11 = vld [vmem:[%s11168_s12 + $0x50] sm:$0xff]  }
 0x8bf   : > { %v1405_v13 = vsub.f32 %v1399_v1, %v1404_v12  ;;  %v8659_v1 = vld [vmem:[%s11168_s12 + $0xe8] sm:$0xff]   ;;  %v8671_v12 = vld [vmem:[%s11168_s12 + $0xd0] sm:$0xff]  }
 0x8c1   : > { %v1406_v14 = vmul.f32 %v1405_v13, %v1405_v13 }
 0x8c3   : > { %1407 = vadd.xlane.f32.xlu1 %v1406_v14  ;;  %v8673_v14 = vld [vmem:[%s11168_s12 + $0x90] sm:$0xff]  }
 0x94c   : > { %v1408_v41 = vpop.xlane.xlu1 %1407 }
 0x94d   : > { %v1409_v44 = vmul.f32 0.0078125, %v1408_v41 }
 0x94f   : > { %v1410_v46 = vadd.f32 1e-12, %v1409_v44 }
 0x951   : > { %9060 = vrsqrt.f32 %v1410_v46 }
 0x95e   : > { %v9061_v47 = vpop.eup %9060 }
 0x95f   : > { %v1412_v50 = vmul.f32 %v9061_v47, %v1405_v13  ;;  %v8672_v13 = vld [vmem:[%s11168_s12 + $0x10] sm:$0xff]  }
 0x961   : > { %v1419_v52 = vmul.f32 %v6994_v48, %v1412_v50 }
 0x963   : > { %v9706_v53 = vadd.f32 %v6995_v51, %v1419_v52 }
 0x965   : > { %v1427_v54 = vpack.c.bf16 %v9706_v53, %v9706_v53 }
 0x967   : > { %1675 = vmatmul.mubr.bf16.vlgmr.msra.gmra.mxu1 %v1427_v54  ;;  %1716 = vmatmul.mubr.bf16.vlgmr.msra.gmra.mxu0 %v1427_v54 }
 0x968   : > { %7888 = vmatpush3.bf16.msra.mxu1 %v8652_v57  ;;  %7910 = vmatpush3.bf16.msra.mxu0 %v8653_v58 }
 0x969   : > { %7889 = vmatprep.subr.bf16.mxu1 %v8654_v59  ;;  %7911 = vmatprep.subr.bf16.mxu0 %v8655_v60 }
 0x96c   : > { %7890 = vmatpush3.bf16.msra.mxu1 %v8656_v61  ;;  %7912 = vmatpush3.bf16.msra.mxu0 %v8657_v62 }
 0x96d   : > { %7891 = vmatprep.subr.bf16.mxu1 %v8658_v0  ;;  %7913 = vmatprep.subr.bf16.mxu0 %v8659_v1 }
 0x970   : > { %7892 = vmatpush3.bf16.msra.mxu1 %v8660_v2  ;;  %7914 = vmatpush3.bf16.msra.mxu0 %v8661_v31 }
 0x971   : > { %7893 = vmatprep.subr.bf16.mxu1 %v8662_v4  ;;  %7915 = vmatprep.subr.bf16.mxu0 %v8663_v5 }
 0x974   : > { %7894 = vmatpush3.bf16.msra.mxu1 %v8664_v6  ;;  %7916 = vmatpush3.bf16.msra.mxu0 %v8665_v7 }
 0x975   : > { %7895 = vmatprep.subr.bf16.mxu1 %v8666_v39  ;;  %7917 = vmatprep.subr.bf16.mxu0 %v8667_v8 }
 0x978   : > { %7896 = vmatpush3.bf16.msra.mxu1 %v8668_v9  ;;  %7918 = vmatpush3.bf16.msra.mxu0 %v8669_v10 }
 0x979   : > { %7897 = vmatprep.subr.bf16.mxu1 %v8670_v11  ;;  %7919 = vmatprep.subr.bf16.mxu0 %v8671_v12 }
 0x97c   : > { %7898 = vmatpush3.bf16.msra.mxu1 %v8672_v13  ;;  %7920 = vmatpush3.bf16.msra.mxu0 %v8673_v14 }
 0x97d   : > { %7899 = vmatprep.subr.bf16.mxu1 %v8674_v15  ;;  %7921 = vmatprep.subr.bf16.mxu0 %v8675_v16 }
 0x980   : > { %7900 = vmatpush3.bf16.msra.mxu1 %v8676_v17  ;;  %7922 = vmatpush3.bf16.msra.mxu0 %v8677_v18 }
 0x981   : > { %7901 = vmatprep.subr.bf16.mxu1 %v8678_v19  ;;  %7923 = vmatprep.subr.bf16.mxu0 %v8679_v63 }
 0x984   : > { %7902 = vmatpush3.bf16.msra.mxu1 %v8680_v20  ;;  %7924 = vmatpush3.bf16.msra.mxu0 %v8681_v21 }
 0x985   : > { %8253 = vmatprep.subr.bf16.mxu0 %v9221_v3 }
 0xa27   : > { %v1676_v29 = vpop.f32.mrf.mxu1  ;;  %v1717_v30 = vpop.f32.mrf.mxu0 }
 0xa28   : > { %v1677_v32 = vadd.f32 %v1676_v29, %v1465_v24  ;;  %v1718_v33 = vadd.f32 %v1717_v30, %v1473_v26  ;;  %v7028_v26 = vld [vmem:[%s11169_s13] ss:$0 sm:$0xff] }
 0xa29   : > { %v1678_v34 = vpop.f32.mrf.mxu1  ;;  %v1719_v35 = vpop.f32.mrf.mxu0 }
 0xa2a   : > { %v1728_v36 = vmul.f32 0.044715, %v1677_v32  ;;  %v1730_v37 = vmul.f32 0.044715, %v1718_v33  ;;  %v1679_v38 = vadd.f32 %v1678_v34, %v1469_v27  ;;  %v1720_v40 = vadd.f32 %v1719_v35, %v1477_v28 }
 0xa2b   : > { %v1680_v42 = vpop.f32.mrf.mxu1  ;;  %v1721_v41 = vpop.f32.mrf.mxu0  ;;  %v1724_v39 = vmul.f32 0.5, %v1677_v32  ;;  %v1726_v12 = vmul.f32 0.5, %v1718_v33 }
 0xa2c   : > { %v1732_v44 = vmul.f32 %v1728_v36, %v1677_v32  ;;  %v1734_v46 = vmul.f32 %v1730_v37, %v1718_v33  ;;  %v1729_v47 = vmul.f32 0.044715, %v1679_v38  ;;  %v1731_v48 = vmul.f32 0.044715, %v1720_v40  ;;  %v8684_v42 = vld [vmem:[%s11160_s4 + $0x16c] ss:$12 sps:$4 sm:$0xff]  }
 0xa2d   : > { %v1681_v50 = vpop.f32.mrf.mxu1  ;;  %v1722_v51 = vpop.f32.mrf.mxu0  ;;  %v1725_v10 = vmul.f32 0.5, %v1679_v38  ;;  %v1727_v13 = vmul.f32 0.5, %v1720_v40  ;;  %v8685_v41 = vld [vmem:[%s11160_s4 + $0x170] ss:$12 sps:$4 sm:$0xff]   ;;  %2316 = vmatprep.subr.bf16.mxu1 %v8684_v42  ;;  %v9936_v42 = vld [vmem:[%s9501_s23] ss:$0 sm:$0xff] }
 0xa2e   : > { %v1736_v52 = vmul.f32 %v1732_v44, %v1677_v32  ;;  %v1738_v54 = vmul.f32 %v1734_v46, %v1718_v33  ;;  %v1733_v55 = vmul.f32 %v1729_v47, %v1679_v38  ;;  %v1735_v56 = vmul.f32 %v1731_v48, %v1720_v40  ;;  %v8688_v44 = vld [vmem:[%s11160_s4 + $0x154] ss:$12 sps:$4 sm:$0xff]   ;;  %v8686_v46 = vld [vmem:[%s11160_s4 + $0x150] ss:$12 sps:$4 sm:$0xff]  }
 0xa30   : > { %v1740_v57 = vadd.f32 %v1736_v52, %v1677_v32  ;;  %v1742_v58 = vadd.f32 %v1738_v54, %v1718_v33  ;;  %v1737_v59 = vmul.f32 %v1733_v55, %v1679_v38  ;;  %v1739_v60 = vmul.f32 %v1735_v56, %v1720_v40  ;;  %v8692_v52 = vld [vmem:[%s11160_s4 + $0x13c] ss:$12 sps:$4 sm:$0xff]   ;;  %v8690_v54 = vld [vmem:[%s11160_s4 + $0x138] ss:$12 sps:$4 sm:$0xff]   ;;  %v8693_v55 = vld [vmem:[%s11160_s4 + $0x140] ss:$12 sps:$4 sm:$0xff]  }
 0xa31   : > { %v8696_v56 = vld [vmem:[%s11160_s4 + $0x124] ss:$12 sps:$4 sm:$0xff]  }
 0xa32   : > { %v1744_v61 = vmul.f32 0.7978846, %v1740_v57  ;;  %v1746_v62 = vmul.f32 0.7978846, %v1742_v58  ;;  %v1741_v0 = vadd.f32 %v1737_v59, %v1679_v38  ;;  %v1743_v1 = vadd.f32 %v1739_v60, %v1720_v40  ;;  %v8682_v40 = vld [vmem:[%s11160_s4 + $0x168] ss:$12 sps:$4 sm:$0xff]  }
 0xa33   : > { %v8694_v57 = vld [vmem:[%s11160_s4 + $0x120] ss:$12 sps:$4 sm:$0xff]   ;;  %v8697_v58 = vld [vmem:[%s11160_s4 + $0x128] ss:$12 sps:$4 sm:$0xff]  }
 0xa34   : > { %v1745_v2 = vmul.f32 0.7978846, %v1741_v0  ;;  %v1747_v31 = vmul.f32 0.7978846, %v1743_v1  ;;  %9062 = vtanh.f32 %v1744_v61  ;;  %v8700_v59 = vld [vmem:[%s11160_s4 + $0x10c] ss:$12 sps:$4 sm:$0xff]  }
 0xa35   : > { %9064 = vtanh.f32 %v1746_v62  ;;  %v8698_v60 = vld [vmem:[%s11160_s4 + $0x108] ss:$12 sps:$4 sm:$0xff]   ;;  %v8701_v61 = vld [vmem:[%s11160_s4 + $0x110] ss:$12 sps:$4 sm:$0xff]   ;;  %v8705_v1 = vld [vmem:[%s11160_s4 + $0xf8] ss:$12 sps:$4 sm:$0xff]  }
 0xa36   : > { %9066 = vtanh.f32 %v1745_v2  ;;  %v8704_v62 = vld [vmem:[%s11160_s4 + $0xf4] ss:$12 sps:$4 sm:$0xff]   ;;  %v8702_v0 = vld [vmem:[%s11160_s4 + $0xf0] ss:$12 sps:$4 sm:$0xff]  }
 0xa37   : > { %9068 = vtanh.f32 %v1747_v31  ;;  %v8708_v2 = vld [vmem:[%s11160_s4 + $0xdc] ss:$12 sps:$4 sm:$0xff]   ;;  %v8706_v31 = vld [vmem:[%s11160_s4 + $0xd8] ss:$12 sps:$4 sm:$0xff]  }
 0xa41   : > { %v9063_v4 = vpop.eup %9062 }
 0xa42   : > { %v9065_v5 = vpop.eup %9064  ;;  %v1752_v6 = vadd.f32 1.0, %v9063_v4  ;;  %v8709_v4 = vld [vmem:[%s11160_s4 + $0xe0] ss:$12 sps:$4 sm:$0xff]  }
 0xa43   : > { %v9067_v7 = vpop.eup %9066  ;;  %v1754_v8 = vadd.f32 1.0, %v9065_v5  ;;  %v8712_v5 = vld [vmem:[%s11160_s4 + $0xc4] ss:$12 sps:$4 sm:$0xff]  }
 0xa44   : > { %v9069_v9 = vpop.eup %9068  ;;  %v1753_v11 = vadd.f32 1.0, %v9067_v7  ;;  %v1756_v15 = vmul.f32 %v1752_v6, %v1724_v39  ;;  %v8710_v6 = vld [vmem:[%s11160_s4 + $0xc0] ss:$12 sps:$4 sm:$0xff]   ;;  %v8713_v7 = vld [vmem:[%s11160_s4 + $0xc8] ss:$12 sps:$4 sm:$0xff]  }
 0xa45   : > { %v1755_v14 = vadd.f32 1.0, %v9069_v9  ;;  %v1758_v17 = vmul.f32 %v1754_v8, %v1726_v12 }
 0xa46   : > { %v1757_v16 = vmul.f32 %v1753_v11, %v1725_v10  ;;  %v1760_v20 = vpack.c.bf16 %v1756_v15, %v1756_v15  ;;  %v7061_v11 = vld [vmem:[%s11170_s14] ss:$0 sm:$0xff] }
 0xa47   : > { %v1759_v18 = vmul.f32 %v1755_v14, %v1727_v13  ;;  %v1762_v21 = vpack.c.bf16 %v1758_v17, %v1758_v17  ;;  %v7062_v13 = vld [vmem:[%s11171_s15] ss:$0 sm:$0xff]  ;;  %v7095_v17 = vld [vmem:[%s11161_s5 + $0x3] sm:$0x7] }
 0xa48   : > { %v1761_v19 = vpack.c.bf16 %v1757_v16, %v1757_v16 }
 0xa49   : > { %v1763_v63 = vpack.c.bf16 %v1759_v18, %v1759_v18  ;;  %v2180_v18 = vrot.slane %v7095_v17, %v9471_v43 }
 0xa4a   : > { %2059 = vmatprep.mubr.bf16.mxu1 %v1761_v19 }
 0xa4b   : > { %2099 = vmatprep.mubr.bf16.mxu0 %v1763_v63  ;;  %2060 = vmatmul.mubr.bf16.vlgmr.msra.gmra.mxu1 %v1760_v20 }
 0xa4c   : > { %2100 = vmatmul.mubr.bf16.vlgmr.msra.gmra.mxu0 %v1762_v21  ;;  %2348 = vmatprep.mubr.bf16.mxu1 %v9222_v25 }
 0xa4d   : > { %8269 = vmatprep.mubr.msk.bf16.mxu0 %vm9223_vm0, %v9221_v3  ;;  %8254 = vmatpush3.bf16.msra.mxu0 %v8685_v41 }
 0xa4e   : > { %2317 = vmatpush1.bf16.msra.mxu1 %v8682_v40  ;;  %8255 = vmatprep.subr.bf16.mxu0 %v9221_v3 }
 0xa4f   : > { %2318 = vmatprep.subr.bf16.mxu1 %v8688_v44 }
 0xa52   : > { %2319 = vmatpush1.bf16.msra.mxu1 %v8686_v46 }
 0xa53   : > { %2320 = vmatprep.subr.bf16.mxu1 %v8692_v52 }
 0xa56   : > { %2321 = vmatpush1.bf16.msra.mxu1 %v8690_v54 }
 0xa57   : > { %2322 = vmatprep.subr.bf16.mxu1 %v8696_v56 }
 0xa5a   : > { %2323 = vmatpush1.bf16.msra.mxu1 %v8694_v57 }
 0xa5b   : > { %2324 = vmatprep.subr.bf16.mxu1 %v8700_v59 }
 0xa5e   : > { %2325 = vmatpush1.bf16.msra.mxu1 %v8698_v60 }
 0xa5f   : > { %2326 = vmatprep.subr.bf16.mxu1 %v8704_v62 }
 0xa62   : > { %2327 = vmatpush1.bf16.msra.mxu1 %v8702_v0 }
 0xa63   : > { %2328 = vmatprep.subr.bf16.mxu1 %v8708_v2 }
 0xa66   : > { %2329 = vmatpush1.bf16.msra.mxu1 %v8706_v31 }
 0xa67   : > { %2330 = vmatprep.subr.bf16.mxu1 %v8712_v5 }
 0xa6a   : > { %2331 = vmatpush1.bf16.msra.mxu1 %v8710_v6 }
 0xa6b   : > { %8273 = vmatprep.subr.bf16.mxu1 %v9221_v3 }
 0xb0b   : > { %v7903_v22 = vpop.f32.mrf.mxu1 }
 0xb0c   : > { %v7925_v24 = vpop.f32.mrf.mxu0 }
 0xb0d   : > { %v7904_v27 = vpop.f32.mrf.mxu1 }
 0xb0e   : > { %v7905_v28 = vadd.f32 %v7904_v27, %v7903_v22  ;;  %v7926_v29 = vpop.f32.mrf.mxu0  ;;  %v2184_v22 = vrot.slane %v7095_v17, %v9477_v45 }
 0xb0f   : > { %v7906_v30 = vpop.f32.mrf.mxu1  ;;  %v7927_v33 = vadd.f32 %v7926_v29, %v7925_v24 }
 0xb10   : > { %v2062_v32 = vadd.f32 %v7905_v28, %v7028_v26  ;;  %v7928_v34 = vpop.f32.mrf.mxu0  ;;  %v2176_v28 = vrot.slane %v7095_v17, %v9481_v49 }
 0xb11   : > { %v7907_v35 = vpop.f32.mrf.mxu1 }
 0xb12   : > { %v2102_v36 = vadd.f32 %v7927_v33, %v2062_v32  ;;  %v7929_v37 = vpop.f32.mrf.mxu0 }
 0xb14   : > { %v2107_v38 = vadd.f32 %v2102_v36, %v9706_v53  ;;  %v8689_v53 = vld [vmem:[%s11160_s4 + $0x158] ss:$12 sps:$4 sm:$0xff]  }
 0xb15   : > { %8256 = vmatpush3.bf16.msra.mxu0 %v8689_v53 }
 0xb16   : > { %2110 = vadd.xlane.f32.xlu0 %v2107_v38  ;;  %8257 = vmatprep.subr.bf16.mxu0 %v9221_v3 }
 0xb19   : > { %8258 = vmatpush3.bf16.msra.mxu0 %v8693_v55 }
 0xb1a   : > { %8259 = vmatprep.subr.bf16.mxu0 %v9221_v3 }
 0xb1d   : > { %8260 = vmatpush3.bf16.msra.mxu0 %v8697_v58 }
 0xb1e   : > { %8261 = vmatprep.subr.bf16.mxu0 %v9221_v3 }
 0xb21   : > { %8262 = vmatpush3.bf16.msra.mxu0 %v8701_v61 }
 0xb22   : > { %8263 = vmatprep.subr.bf16.mxu0 %v9221_v3 }
 0xb25   : > { %8264 = vmatpush3.bf16.msra.mxu0 %v8705_v1 }
 0xb26   : > { %8265 = vmatprep.subr.bf16.mxu0 %v9221_v3 }
 0xb29   : > { %8266 = vmatpush3.bf16.msra.mxu0 %v8709_v4 }
 0xb2a   : > { %8267 = vmatprep.subr.bf16.mxu0 %v9221_v3 }
 0xb2d   : > { %8268 = vmatpush3.bf16.msra.mxu0 %v8713_v7 }
 0xb2e   : > { %8297 = vmatprep.subr.bf16.mxu0 %v9221_v3 }
 0xb9f   : > { %v2111_v47 = vpop.xlane.xlu0 %2110 }
 0xba0   : > { %v2112_v48 = vmul.f32 0.0078125, %v2111_v47 }
 0xba2   : > { %v2113_v50 = vsub.f32 %v2107_v38, %v2112_v48 }
 0xba4   : > { %v2114_v51 = vmul.f32 %v2113_v50, %v2113_v50 }
 0xba6   : > { %2115 = vadd.xlane.f32.xlu0 %v2114_v51 }
 0xc2f   : > { %v2116_v39 = vpop.xlane.xlu0 %2115 }
 0xc30   : > { %v2117_v8 = vmul.f32 0.0078125, %v2116_v39 }
 0xc32   : > { %v2118_v9 = vadd.f32 1e-12, %v2117_v8 }
 0xc34   : > { %9070 = vrsqrt.f32 %v2118_v9 }
 0xc41   : > { %v9071_v10 = vpop.eup %9070 }
 0xc42   : > { %v2120_v12 = vmul.f32 %v9071_v10, %v2113_v50 }
 0xc44   : > { %v2127_v14 = vmul.f32 %v7061_v11, %v2120_v12 }
 0xc46   : > { %v9911_v15 = vadd.f32 %v7062_v13, %v2127_v14 }
 0xc48   : > { %v2136_v16 = vpack.c.bf16 %v9911_v15, %v9911_v15 }
 0xc4a   : > { %2349 = vmatmul.mubr.bf16.vlgmr.msra.gmra.mxu1 %v2136_v16  ;;  %8270 = vmatmul.mubr.bf16.vlgmr.msra.gmra.mxu0 %v2136_v16 }
 0xc4b   : > { %8275 = vmatprep.mubr.msk.bf16.mxu1 %vm9223_vm0, %v9221_v3  ;;  %8299 = vmatprep.mubr.msk.bf16.mxu0 %vm9223_vm0, %v9221_v3 }
 0xd0a   : > { %v2350_v19 = vpop.f32.mrf.mxu1  ;;  %v2391_v63 = vpop.f32.mrf.mxu0 }
 0xd0b   : > { %v2392_v33 = vadd.f32 %v2391_v63, %v2184_v22  ;;  %v2351_v35 = vadd.f32 %v2350_v19, %v2176_v28 }
 0xd0c   : > { %v2352_v20 = vpop.f32.mrf.mxu1  ;;  %v8271_v21 = vpop.f32.mrf.mxu0 }
 0xd0d   : > { %v2353_v24 = vadd.f32 %v2352_v20, %v2180_v18  ;;  %v9927_v36 = vpack.c.bf16 %v2392_v33, %v2392_v33  ;;  %v2397_v37 = vpack.c.bf16 %v2351_v35, %v2351_v35 }
 0xd0e   : > { %v2354_v26 = vpop.f32.mrf.mxu1  ;;  %v2394_v27 = vpop.f32.mrf.mxu0 }
 0xd0f   : > { %v2398_v29 = vpack.c.bf16 %v2353_v24, %v2353_v24  ;;  %v2462_v38 = vsel %vm893_vm2, %v9927_v36, 0 }
 0xd10   : > { %v2355_v30 = vpop.f32.mrf.mxu1  ;;  %v8272_v32 = vpop.f32.mrf.mxu0 }
 0xd11   : > { %v2404_v34 = vsel %vm830_vm1, %v2398_v29, 0 }
 0xd12   : > { %8274 = vmatpush3.bf16.xpose.msra.mxu1 %v2404_v34 }
 0xd13   : > { %8279 = vmatprep.subr.bf16.mxu1 %v9221_v3 }
 0xd19   : > { %8276 = vmatmul.mubr.msk.bf16.vlgmr.msra.gmra.mxu1 %vm830_vm1, %v2397_v37 }
 0xd1a   : > { %8280 = vmatpush3.bf16.msra.mxu1 %v2462_v38  ;;  %8281 = vmatprep.mubr.msk.bf16.mxu1 %vm9223_vm0, %v9221_v3 }
 0xd1b   : > { %8285 = vmatprep.subr.bf16.mxu1 %v9221_v3 }
 0xdd9   : > { %v2440_v40 = vpop.f32.mrf.mxu1 }
 0xdda   : > { %v2441_v41 = vadd.f32 %v9936_v42, %v2440_v40 }
 0xddb   : > { %v8277_v44 = vpop.f32.mrf.mxu1 }
 0xddc   : > { %v2446_v53 = vsel %vm877_vm3, %v2441_v41, -inf }
 0xddd   : > { %2447 = vmax.xlane.f32.xlu0 %v2446_v53  ;;  %v2443_v46 = vpop.f32.mrf.mxu1 }
 0xddf   : > { %v8278_v47 = vpop.f32.mrf.mxu1 }
 0xdf3   : > { %2508 = vrot.lane.b32.xlu0 %v2398_v29, %s11203_s20 }
 0xdf7   : > { %2729 = vrot.lane.b32.xlu0 %v2398_v29, %s11204_s18 }
 0xe66   : > { %v2448_v48 = vpop.xlane.xlu0 %2447 }
 0xe67   : > { %v2449_v50 = vsub.f32 %v2441_v41, %v2448_v48 }
 0xe69   : > { %v2450_v51 = vmul.f32 1.442695, %v2449_v50 }
 0xe6a   : > { %v2509_v57 = vpop.permute.xlu0 %2508 }
 0xe6b   : > { %9072 = vpow2.f32 %v2450_v51  ;;  %v2514_v31 = vsel %vm830_vm1, %v2509_v57, 0 }
 0xe6e   : > { %v2730_v61 = vpop.permute.xlu0 %2729 }
 0xe6f   : > { %v2735_v1 = vsel %vm830_vm1, %v2730_v61, 0 }
 0xe78   : > { %v9073_v52 = vpop.eup %9072 }
 0xe79   : > { %v2452_v54 = vsel %vm877_vm3, %v9073_v52, 0.0 }
 0xe7a   : > { %2453 = vadd.xlane.f32.xlu1 %v2452_v54 }
 0xe8b   : > { %2505 = vrot.lane.b32.xlu1 %v2397_v37, %s11203_s20 }
 0xe8f   : > { %2619 = vrot.lane.b32.xlu1 %v2398_v29, %s11205_s17 }
 0xe93   : > { %2617 = vrot.lane.b32.xlu1 %v2397_v37, %s11205_s17 }
 0xe97   : > { %2727 = vrot.lane.b32.xlu1 %v2397_v37, %s11204_s18 }
 0xf03   : > { %v2454_v55 = vpop.xlane.xlu1 %2453 }
 0xf04   : > { %9074 = vrcp.f32 %v2454_v55 }
 0xf07   : > { %v2506_v56 = vpop.permute.xlu1 %2505 }
 0xf0b   : > { %v2620_v58 = vpop.permute.xlu1 %2619 }
 0xf0c   : > { %v2625_v59 = vsel %vm830_vm1, %v2620_v58, 0 }
 0xf0d   : > { %8298 = vmatpush3.bf16.xpose.msra.mxu0 %v2625_v59 }
 0xf0e   : > { %8309 = vmatprep.subr.bf16.mxu0 %v9221_v3 }
 0xf0f   : > { %v2618_v0 = vpop.permute.xlu1 %2617 }
 0xf11   : > { %v9075_v60 = vpop.eup %9074 }
 0xf12   : > { %v2456_v62 = vmul.f32 %v9075_v60, %v9073_v52 }
 0xf13   : > { %v2728_v4 = vpop.permute.xlu1 %2727 }
 0xf14   : > { %8300 = vmatmul.mubr.msk.bf16.vlgmr.msra.gmra.mxu0 %vm830_vm1, %v2618_v0  ;;  %v2457_v2 = vpack.c.bf16 %v2456_v62, %v2456_v62 }
 0xf15   : > { %8310 = vmatpush3.bf16.xpose.msra.mxu0 %v2735_v1  ;;  %8311 = vmatprep.mubr.msk.bf16.mxu0 %vm9223_vm0, %v9221_v3 }
 0xf16   : > { %8282 = vmatmul.mubr.msk.bf16.vlgmr.msra.gmra.mxu1 %vm877_vm3, %v2457_v2  ;;  %8321 = vmatprep.subr.bf16.mxu0 %v9221_v3 }
 0xf17   : > { %8286 = vmatpush3.bf16.xpose.msra.mxu1 %v2514_v31  ;;  %8287 = vmatprep.mubr.msk.bf16.mxu1 %vm9223_vm0, %v9221_v3  ;;  %v8714_v31 = vld [vmem:[%s11162_s6 + $0x78] sm:$0xff]  }
 0xf18   : > { %8291 = vmatprep.subr.bf16.mxu1 %v9221_v3 }
 0xf1c   : > { %8312 = vmatmul.mubr.msk.bf16.vlgmr.msra.gmra.mxu0 %vm830_vm1, %v2728_v4  ;;  %v8715_v4 = vld [vmem:[%s11162_s6 + $0x70] sm:$0xff]  }
 0xf1d   : > { %8337 = vmatprep.mubr.msk.bf16.mxu0 %vm9223_vm0, %v9221_v3  ;;  %8322 = vmatpush3.bf16.msra.mxu0 %v8714_v31  ;;  %v8749_v31 = vld [vmem:[%s11166_s10 + $0x168] ss:$16 sps:$4 sm:$0xff]  }
 0xf1e   : > { %8288 = vmatmul.mubr.msk.bf16.vlgmr.msra.gmra.mxu1 %vm830_vm1, %v2506_v56  ;;  %8323 = vmatprep.subr.bf16.mxu0 %v9221_v3 }
 0xf1f   : > { %8293 = vmatprep.mubr.msk.bf16.mxu1 %vm9223_vm0, %v9221_v3 }
 0xf21   : > { %8324 = vmatpush3.bf16.msra.mxu0 %v8715_v4  ;;  %v8754_v4 = vld [vmem:[%s11166_s10 + $0x144] ss:$16 sps:$4 sm:$0xff]  }
 0xf22   : > { %8325 = vmatprep.subr.bf16.mxu0 %v9221_v3 }
 0xfd4   : > { %v2661_v5 = vpop.f32.mrf.mxu0 }
 0xfd5   : > { %v2662_v6 = vadd.f32 %v9936_v42, %v2661_v5  ;;  %v8716_v5 = vld [vmem:[%s11162_s6 + $0x68] sm:$0xff]  }
 0xfd6   : > { %v9966_v7 = vpop.f32.mrf.mxu1  ;;  %v8301_v39 = vpop.f32.mrf.mxu0  ;;  %8326 = vmatpush3.bf16.msra.mxu0 %v8716_v5  ;;  %v8757_v5 = vld [vmem:[%s11166_s10 + $0x14c] ss:$16 sps:$4 sm:$0xff]  }
 0xfd7   : > { %v2667_v8 = vsel %vm877_vm3, %v2662_v6, -inf  ;;  %8327 = vmatprep.subr.bf16.mxu0 %v9221_v3  ;;  %v8718_v39 = vld [vmem:[%s11162_s6 + $0x58] sm:$0xff]  }
 0xfd8   : > { %2668 = vmax.xlane.f32.xlu1 %v2667_v8  ;;  %v8283_v9 = vpop.f32.mrf.mxu1  ;;  %v2664_v10 = vpop.f32.mrf.mxu0  ;;  %v8719_v8 = vld [vmem:[%s11162_s6 + $0x50] sm:$0xff]  }
 0xfd9   : > { %v8720_v9 = vld [vmem:[%s11162_s6 + $0x48] sm:$0xff]  }
 0xfda   : > { %v2501_v11 = vpop.f32.mrf.mxu1  ;;  %v8302_v12 = vpop.f32.mrf.mxu0 }
 0xfdb   : > { %v8721_v12 = vld [vmem:[%s11162_s6 + $0x40] sm:$0xff]  }
 0xfdc   : > { %v8284_v13 = vpop.f32.mrf.mxu1  ;;  %v2771_v14 = vpop.f32.mrf.mxu0 }
 0xfdd   : > { %v2772_v20 = vadd.f32 %v9936_v42, %v2771_v14 }
 0xfde   : > { %v2550_v16 = vpop.f32.mrf.mxu1  ;;  %v8313_v17 = vpop.f32.mrf.mxu0 }
 0xfdf   : > { %v2551_v18 = vadd.f32 %v9936_v42, %v2550_v16  ;;  %v2777_v27 = vsel %vm877_vm3, %v2772_v20, -inf }
 0xfe0   : > { %v8289_v19 = vpop.f32.mrf.mxu1  ;;  %v2774_v63 = vpop.f32.mrf.mxu0 }
 0xfe1   : > { %v2556_v21 = vsel %vm877_vm3, %v2551_v18, -inf }
 0xfe2   : > { %v8314_v22 = vpop.f32.mrf.mxu0  ;;  %2557 = vmax.xlane.f32.xlu0 %v2556_v21  ;;  %v2553_v24 = vpop.f32.mrf.mxu1 }
 0xfe4   : > { %v8290_v26 = vpop.f32.mrf.mxu1 }
 0xfe6   : > { %2778 = vmax.xlane.f32.xlu0 %v2777_v27 }
0x1061   : > { %v2669_v28 = vpop.xlane.xlu1 %2668 }
0x1062   : > { %v2670_v29 = vsub.f32 %v2662_v6, %v2669_v28  ;;  %v8717_v6 = vld [vmem:[%s11162_s6 + $0x60] sm:$0xff]  }
0x1063   : > { %8328 = vmatpush3.bf16.msra.mxu0 %v8717_v6  ;;  %v8752_v6 = vld [vmem:[%s11166_s10 + $0x140] ss:$16 sps:$4 sm:$0xff]  }
0x1064   : > { %v2671_v30 = vmul.f32 1.442695, %v2670_v29  ;;  %8329 = vmatprep.subr.bf16.mxu0 %v9221_v3 }
0x1066   : > { %9076 = vpow2.f32 %v2671_v30 }
0x1067   : > { %8330 = vmatpush3.bf16.msra.mxu0 %v8718_v39  ;;  %v8755_v39 = vld [vmem:[%s11166_s10 + $0x148] ss:$16 sps:$4 sm:$0xff]  }
0x1068   : > { %8331 = vmatprep.subr.bf16.mxu0 %v9221_v3 }
0x106b   : > { %v2558_v32 = vpop.xlane.xlu0 %2557  ;;  %8332 = vmatpush3.bf16.msra.mxu0 %v8719_v8  ;;  %v8760_v8 = vld [vmem:[%s11166_s10 + $0x124] ss:$16 sps:$4 sm:$0xff]  }
0x106c   : > { %v2559_v33 = vsub.f32 %v2551_v18, %v2558_v32  ;;  %8333 = vmatprep.subr.bf16.mxu0 %v9221_v3 }
0x106e   : > { %v2560_v34 = vmul.f32 1.442695, %v2559_v33  ;;  %v7145_v33 = vld [vmem:[%s11163_s7 + $0x1] ss:$0 sm:$0xff] }
0x106f   : > { %v2779_v35 = vpop.xlane.xlu0 %2778  ;;  %8334 = vmatpush3.bf16.msra.mxu0 %v8720_v9  ;;  %v8763_v9 = vld [vmem:[%s11166_s10 + $0x12c] ss:$16 sps:$4 sm:$0xff]  }
0x1070   : > { %9078 = vpow2.f32 %v2560_v34  ;;  %v2780_v37 = vsub.f32 %v2772_v20, %v2779_v35  ;;  %8335 = vmatprep.subr.bf16.mxu0 %v9221_v3 }
0x1072   : > { %v2781_v38 = vmul.f32 1.442695, %v2780_v37 }
0x1073   : > { %v9077_v40 = vpop.eup %9076  ;;  %8336 = vmatpush3.bf16.msra.mxu0 %v8721_v12  ;;  %v8766_v12 = vld [vmem:[%s11166_s10 + $0x104] ss:$16 sps:$4 sm:$0xff]  }
0x1074   : > { %9080 = vpow2.f32 %v2781_v38  ;;  %v2673_v42 = vsel %vm877_vm3, %v9077_v40, 0.0 }
0x1075   : > { %2674 = vadd.xlane.f32.xlu0 %v2673_v42  ;;  %v8722_v42 = vld [vmem:[%s11166_s10 + $0x1e0] ss:$16 sps:$4 sm:$0xff]  }
0x107d   : > { %v9079_v41 = vpop.eup %9078 }
0x107e   : > { %v2562_v44 = vsel %vm877_vm3, %v9079_v41, 0.0 }
0x107f   : > { %2563 = vadd.xlane.f32.xlu0 %v2562_v44  ;;  %v8725_v44 = vld [vmem:[%s11166_s10 + $0x1e8] ss:$16 sps:$4 sm:$0xff]  }
0x1081   : > { %v9081_v53 = vpop.eup %9080 }
0x1082   : > { %v2783_v46 = vsel %vm877_vm3, %v9081_v53, 0.0 }
0x1083   : > { %2784 = vadd.xlane.f32.xlu1 %v2783_v46  ;;  %v8730_v46 = vld [vmem:[%s11166_s10 + $0x1c4] ss:$16 sps:$4 sm:$0xff]  }
0x1094   : > { %2679 = vrot.lane.b32.xlu1 %v9927_v36, %s11205_s17 }
0x1095   : > { %2569 = vrot.lane.b32.xlu0 %v9927_v36, %s11203_s20 }
0x1098   : > { %2789 = vrot.lane.b32.xlu1 %v9927_v36, %s11204_s18 }
0x10fe   : > { %v2675_v47 = vpop.xlane.xlu0 %2674 }
0x1108   : > { %v2564_v48 = vpop.xlane.xlu0 %2563 }
0x1109   : > { %9082 = vrcp.f32 %v2564_v48  ;;  %v8728_v48 = vld [vmem:[%s11166_s10 + $0x1c0] ss:$16 sps:$4 sm:$0xff]  }
0x110a   : > { %9084 = vrcp.f32 %v2675_v47  ;;  %v8733_v47 = vld [vmem:[%s11166_s10 + $0x1cc] ss:$16 sps:$4 sm:$0xff]  }
0x110c   : > { %v2570_v50 = vpop.permute.xlu0 %2569  ;;  %v2785_v52 = vpop.xlane.xlu1 %2784 }
0x110d   : > { %v2575_v51 = vsel %vm893_vm2, %v2570_v50, 0  ;;  %9086 = vrcp.f32 %v2785_v52  ;;  %v8731_v50 = vld [vmem:[%s11166_s10 + $0x1c8] ss:$16 sps:$4 sm:$0xff]  }
0x110e   : > { %8292 = vmatpush3.bf16.msra.mxu1 %v2575_v51 }
0x110f   : > { %8303 = vmatprep.subr.bf16.mxu1 %v9221_v3 }
0x1110   : > { %v2680_v56 = vpop.permute.xlu1 %2679 }
0x1111   : > { %v2685_v59 = vsel %vm893_vm2, %v2680_v56, 0  ;;  %v8736_v56 = vld [vmem:[%s11166_s10 + $0x1a4] ss:$16 sps:$4 sm:$0xff]  }
0x1114   : > { %v2790_v60 = vpop.permute.xlu1 %2789 }
0x1115   : > { %v2795_v0 = vsel %vm893_vm2, %v2790_v60, 0  ;;  %v8742_v60 = vld [vmem:[%s11166_s10 + $0x184] ss:$16 sps:$4 sm:$0xff]  }
0x1116   : > { %v9083_v54 = vpop.eup %9082 }
0x1117   : > { %v2566_v55 = vmul.f32 %v9083_v54, %v9079_v41  ;;  %v9085_v58 = vpop.eup %9084  ;;  %v8724_v41 = vld [vmem:[%s11166_s10 + $0x1e4] ss:$16 sps:$4 sm:$0xff]  }
0x1118   : > { %v2677_v36 = vmul.f32 %v9085_v58, %v9077_v40  ;;  %v8734_v58 = vld [vmem:[%s11166_s10 + $0x1a0] ss:$16 sps:$4 sm:$0xff]  }
0x1119   : > { %v2567_v57 = vpack.c.bf16 %v2566_v55, %v2566_v55 }
0x111a   : > { %v2678_v61 = vpack.c.bf16 %v2677_v36, %v2677_v36  ;;  %v9087_v62 = vpop.eup %9086  ;;  %v8740_v36 = vld [vmem:[%s11166_s10 + $0x180] ss:$16 sps:$4 sm:$0xff]  }
0x111b   : > { %8294 = vmatmul.mubr.msk.bf16.vlgmr.msra.gmra.mxu1 %vm877_vm3, %v2567_v57  ;;  %v2787_v1 = vmul.f32 %v9087_v62, %v9081_v53  ;;  %v8727_v53 = vld [vmem:[%s11166_s10 + $0x1ec] ss:$16 sps:$4 sm:$0xff]  }
0x111c   : > { %8304 = vmatpush3.bf16.msra.mxu1 %v2685_v59  ;;  %8305 = vmatprep.mubr.msk.bf16.mxu1 %vm9223_vm0, %v9221_v3  ;;  %v8739_v57 = vld [vmem:[%s11166_s10 + $0x1ac] ss:$16 sps:$4 sm:$0xff]   ;;  %v8737_v59 = vld [vmem:[%s11166_s10 + $0x1a8] ss:$16 sps:$4 sm:$0xff]  }
0x111d   : > { %8315 = vmatprep.subr.bf16.mxu1 %v9221_v3  ;;  %v2788_v2 = vpack.c.bf16 %v2787_v1, %v2787_v1  ;;  %3254 = vmatprep.subr.bf16.mxu0 %v8727_v53  ;;  %v8745_v62 = vld [vmem:[%s11166_s10 + $0x18c] ss:$16 sps:$4 sm:$0xff]   ;;  %v8784_v53 = vld [vmem:[%s11168_s12 + $0x120] sm:$0xff]  }
0x111e   : > { %v8751_v1 = vld [vmem:[%s11166_s10 + $0x16c] ss:$16 sps:$4 sm:$0xff]  }
0x1123   : > { %8306 = vmatmul.mubr.msk.bf16.vlgmr.msra.gmra.mxu1 %vm877_vm3, %v2678_v61  ;;  %v8743_v61 = vld [vmem:[%s11166_s10 + $0x188] ss:$16 sps:$4 sm:$0xff]  }
0x1124   : > { %8316 = vmatpush3.bf16.msra.mxu1 %v2795_v0  ;;  %8317 = vmatprep.mubr.msk.bf16.mxu1 %vm9223_vm0, %v9221_v3  ;;  %v8748_v0 = vld [vmem:[%s11166_s10 + $0x164] ss:$16 sps:$4 sm:$0xff]  }
0x1125   : > { %3213 = vmatprep.subr.bf16.mxu1 %v8724_v41  ;;  %v8782_v41 = vld [vmem:[%s11168_s12 + $0x160] sm:$0xff]  }
0x112b   : > { %8318 = vmatmul.mubr.msk.bf16.vlgmr.msra.gmra.mxu1 %vm877_vm3, %v2788_v2  ;;  %v8746_v2 = vld [vmem:[%s11166_s10 + $0x160] ss:$16 sps:$4 sm:$0xff]  }
0x112c   : > { %3245 = vmatprep.mubr.bf16.mxu1 %v9222_v25  ;;  %3214 = vmatpush1.bf16.msra.mxu1 %v8722_v42  ;;  %v8781_v42 = vld [vmem:[%s11168_s12 + $0x1a8] sm:$0xff]  }
0x112d   : > { %3215 = vmatprep.subr.bf16.mxu1 %v8730_v46  ;;  %v8785_v46 = vld [vmem:[%s11168_s12 + $0x1a0] sm:$0xff]  }
0x1130   : > { %3216 = vmatpush1.bf16.msra.mxu1 %v8728_v48  ;;  %v8787_v48 = vld [vmem:[%s11168_s12 + $0x1d8] sm:$0xff]  }
0x1131   : > { %3217 = vmatprep.subr.bf16.mxu1 %v8736_v56  ;;  %v8793_v56 = vld [vmem:[%s11168_s12 + $0x190] sm:$0xff]  }
0x1134   : > { %3218 = vmatpush1.bf16.msra.mxu1 %v8734_v58  ;;  %v8795_v58 = vld [vmem:[%s11168_s12 + $0x1c8] sm:$0xff]  }
0x1135   : > { %3219 = vmatprep.subr.bf16.mxu1 %v8742_v60  ;;  %v8798_v60 = vld [vmem:[%s11168_s12 + $0x140] sm:$0xff]  }
0x1138   : > { %3220 = vmatpush1.bf16.msra.mxu1 %v8740_v36  ;;  %v8797_v36 = vld [vmem:[%s11168_s12 + $0x188] sm:$0xff]  }
0x1139   : > { %3221 = vmatprep.subr.bf16.mxu1 %v8748_v0  ;;  %v8801_v0 = vld [vmem:[%s11168_s12 + $0x180] sm:$0xff]  }
0x113c   : > { %3222 = vmatpush1.bf16.msra.mxu1 %v8746_v2 }
0x113d   : > { %3223 = vmatprep.subr.bf16.mxu1 %v8754_v4 }
0x1140   : > { %3224 = vmatpush1.bf16.msra.mxu1 %v8752_v6 }
0x1141   : > { %3225 = vmatprep.subr.bf16.mxu1 %v8760_v8 }
0x11db   : > { %v2611_v10 = vpop.f32.mrf.mxu1 }
0x11dc   : > { %2838 = vrot.lane.b32.xlu1 %v2611_v10, %s11204_s18  ;;  %v8758_v10 = vld [vmem:[%s11166_s10 + $0x120] ss:$16 sps:$4 sm:$0xff]  }
0x11dd   : > { %v8295_v11 = vpop.f32.mrf.mxu1  ;;  %3226 = vmatpush1.bf16.msra.mxu1 %v8758_v10 }
0x11de   : > { %v8761_v11 = vld [vmem:[%s11166_s10 + $0x128] ss:$16 sps:$4 sm:$0xff]   ;;  %3227 = vmatprep.subr.bf16.mxu1 %v8766_v12 }
0x11df   : > { %v2614_v13 = vpop.f32.mrf.mxu1 }
0x11e0   : > { %v8769_v13 = vld [vmem:[%s11166_s10 + $0x10c] ss:$16 sps:$4 sm:$0xff]  }
0x11e1   : > { %v8296_v14 = vpop.f32.mrf.mxu1 }
0x11e2   : > { %v8764_v14 = vld [vmem:[%s11166_s10 + $0x100] ss:$16 sps:$4 sm:$0xff]  }
0x11e3   : > { %v2721_v16 = vpop.f32.mrf.mxu1  ;;  %3228 = vmatpush1.bf16.msra.mxu1 %v8764_v14 }
0x11e4   : > { %2842 = vrot.lane.b32.xlu0 %v2721_v16, %s11205_s17  ;;  %v8767_v16 = vld [vmem:[%s11166_s10 + $0x108] ss:$16 sps:$4 sm:$0xff]  }
0x11e5   : > { %v8307_v17 = vpop.f32.mrf.mxu1 }
0x11e7   : > { %v2724_v18 = vpop.f32.mrf.mxu1 }
0x11e9   : > { %v8308_v19 = vpop.f32.mrf.mxu1 }
0x11eb   : > { %v2831_v63 = vpop.f32.mrf.mxu1 }
0x11ec   : > { %2846 = vrot.lane.b32.xlu1 %v2831_v63, %s11203_s20 }
0x11ed   : > { %v8319_v20 = vpop.f32.mrf.mxu1 }
0x11ee   : > { %v7156_v20 = vld [vmem:[%s11164_s8 + $0x1] ss:$0 sm:$0xff] }
0x11ef   : > { %v2834_v21 = vpop.f32.mrf.mxu1 }
0x11f1   : > { %v8320_v22 = vpop.f32.mrf.mxu1 }
0x11f2   : > { %v7157_v22 = vld [vmem:[%s11165_s9 + $0x1] ss:$0 sm:$0xff] }
0x124e   : > { %v2839_v24 = vpop.permute.xlu1 %2838 }
0x124f   : > { %v2849_v27 = vsel %vm830_vm1, %v9966_v7, %v2839_v24 }
0x1256   : > { %v2843_v26 = vpop.permute.xlu0 %2842 }
0x1257   : > { %v2850_v28 = vsel %vm1283_vm4, %v2849_v27, %v2843_v26 }
0x125e   : > { %v2847_v29 = vpop.permute.xlu1 %2846 }
0x125f   : > { %v2851_v30 = vsel %vm1285_vm5, %v2850_v28, %v2847_v29  ;;  %v8770_v28 = vld [vmem:[%s11168_s12 + $0x178] sm:$0xff]  }
0x1260   : > { %v2852_v32 = vpack.c.bf16 %v2851_v30, %v2851_v30  ;;  %v8771_v29 = vld [vmem:[%s11168_s12 + $0x1f8] sm:$0xff]   ;;  %7965 = vmatprep.subr.bf16.mxu1 %v8770_v28 }
0x1261   : > { %v8772_v30 = vld [vmem:[%s11168_s12 + $0x138] sm:$0xff]  }
0x1262   : > { %8338 = vmatmul.mubr.bf16.vlgmr.msra.gmra.mxu0 %v2852_v32  ;;  %v8773_v32 = vld [vmem:[%s11168_s12 + $0x1b8] sm:$0xff]  }
0x1263   : > { %3286 = vmatprep.mubr.bf16.mxu0 %v9222_v25  ;;  %3255 = vmatpush1.bf16.msra.mxu0 %v8725_v44  ;;  %v8783_v44 = vld [vmem:[%s11168_s12 + $0x1e0] sm:$0xff]  }
0x1264   : > { %3256 = vmatprep.subr.bf16.mxu0 %v8733_v47  ;;  %v8786_v47 = vld [vmem:[%s11168_s12 + $0x158] sm:$0xff]  }
0x1267   : > { %3257 = vmatpush1.bf16.msra.mxu0 %v8731_v50  ;;  %v8788_v50 = vld [vmem:[%s11168_s12 + $0x118] sm:$0xff]  }
0x1268   : > { %3258 = vmatprep.subr.bf16.mxu0 %v8739_v57  ;;  %v8794_v57 = vld [vmem:[%s11168_s12 + $0x148] sm:$0xff]  }
0x126b   : > { %3259 = vmatpush1.bf16.msra.mxu0 %v8737_v59  ;;  %v8796_v59 = vld [vmem:[%s11168_s12 + $0x108] sm:$0xff]  }
0x126c   : > { %3260 = vmatprep.subr.bf16.mxu0 %v8745_v62  ;;  %v8800_v62 = vld [vmem:[%s11168_s12 + $0x100] sm:$0xff]  }
0x126f   : > { %3261 = vmatpush1.bf16.msra.mxu0 %v8743_v61  ;;  %v8799_v61 = vld [vmem:[%s11168_s12 + $0x1c0] sm:$0xff]  }
0x1270   : > { %3262 = vmatprep.subr.bf16.mxu0 %v8751_v1  ;;  %v7190_v1 = vld [vmem:[%s11167_s11 + $0x4] sm:$0xf] }
0x1271   : > { %v3036_v2 = vrot.slane %v7190_v1, %v9481_v49  ;;  %v3040_v4 = vrot.slane %v7190_v1, %v9471_v43 }
0x1273   : > { %3263 = vmatpush1.bf16.msra.mxu0 %v8749_v31  ;;  %v3044_v31 = vrot.slane %v7190_v1, %v9477_v45 }
0x1274   : > { %3264 = vmatprep.subr.bf16.mxu0 %v8757_v5  ;;  %v3048_v5 = vrot.slane %v7190_v1, %v9811_v23 }
0x1277   : > { %3265 = vmatpush1.bf16.msra.mxu0 %v8755_v39 }
0x1278   : > { %3266 = vmatprep.subr.bf16.mxu0 %v8763_v9 }
0x127b   : > { %3267 = vmatpush1.bf16.msra.mxu0 %v8761_v11 }
0x127c   : > { %3268 = vmatprep.subr.bf16.mxu0 %v8769_v13 }
0x127f   : > { %3269 = vmatpush1.bf16.msra.mxu0 %v8767_v16 }
0x1280   : > { %7987 = vmatprep.subr.bf16.mxu0 %v8771_v29 }
0x1322   : > { %v2960_v34 = vpop.f32.mrf.mxu0 }
0x1323   : > { %v2961_v35 = vadd.f32 %v7145_v33, %v2960_v34  ;;  %v8774_v33 = vld [vmem:[%s11168_s12 + $0x170] sm:$0xff]  }
0x1324   : > { %v8339_v37 = vpop.f32.mrf.mxu0  ;;  %v8775_v34 = vld [vmem:[%s11168_s12 + $0x1f0] sm:$0xff]  }
0x1325   : > { %v2966_v38 = vadd.f32 %v2961_v35, %v9911_v15  ;;  %v8776_v35 = vld [vmem:[%s11168_s12 + $0x130] sm:$0xff]  }
0x1326   : > { %v2963_v40 = vpop.f32.mrf.mxu0  ;;  %v8777_v37 = vld [vmem:[%s11168_s12 + $0x1b0] sm:$0xff]  }
0x1327   : > { %2971 = vadd.xlane.f32.xlu0 %v2966_v38  ;;  %v8779_v40 = vld [vmem:[%s11168_s12 + $0x1e8] sm:$0xff]  }
0x1328   : > { %v8340_v7 = vpop.f32.mrf.mxu0 }
0x1329   : > { %v8780_v7 = vld [vmem:[%s11168_s12 + $0x128] sm:$0xff]  }
0x13b0   : > { %v2972_v51 = vpop.xlane.xlu0 %2971 }
0x13b1   : > { %v2973_v52 = vmul.f32 0.0078125, %v2972_v51  ;;  %v8789_v51 = vld [vmem:[%s11168_s12 + $0x198] sm:$0xff]  }
0x13b3   : > { %v2974_v54 = vsub.f32 %v2966_v38, %v2973_v52  ;;  %v8778_v38 = vld [vmem:[%s11168_s12 + $0x168] sm:$0xff]   ;;  %v8790_v52 = vld [vmem:[%s11168_s12 + $0x150] sm:$0xff]  }
0x13b5   : > { %v2975_v55 = vmul.f32 %v2974_v54, %v2974_v54 }
0x13b7   : > { %2976 = vadd.xlane.f32.xlu1 %v2975_v55  ;;  %v8792_v55 = vld [vmem:[%s11168_s12 + $0x110] sm:$0xff]  }
0x1440   : > { %v2977_v17 = vpop.xlane.xlu1 %2976 }
0x1441   : > { %v2978_v18 = vmul.f32 0.0078125, %v2977_v17 }
0x1443   : > { %v2979_v19 = vadd.f32 1e-12, %v2978_v18 }
0x1445   : > { %9088 = vrsqrt.f32 %v2979_v19 }
0x1452   : > { %v9089_v63 = vpop.eup %9088 }
0x1453   : > { %v2981_v21 = vmul.f32 %v9089_v63, %v2974_v54  ;;  %v8791_v54 = vld [vmem:[%s11168_s12 + $0x1d0] sm:$0xff]  }
0x1455   : > { %v2988_v24 = vmul.f32 %v7156_v20, %v2981_v21 }
0x1457   : > { %v10140_v26 = vadd.f32 %v7157_v22, %v2988_v24 }
0x1459   : > { %v2996_v27 = vpack.c.bf16 %v10140_v26, %v10140_v26 }
0x145b   : > { %3246 = vmatmul.mubr.bf16.vlgmr.msra.gmra.mxu1 %v2996_v27  ;;  %3287 = vmatmul.mubr.bf16.vlgmr.msra.gmra.mxu0 %v2996_v27 }
0x145c   : > { %7966 = vmatpush3.bf16.msra.mxu1 %v8772_v30  ;;  %7988 = vmatpush3.bf16.msra.mxu0 %v8773_v32 }
0x145d   : > { %7967 = vmatprep.subr.bf16.mxu1 %v8774_v33  ;;  %7989 = vmatprep.subr.bf16.mxu0 %v8775_v34 }
0x1460   : > { %7968 = vmatpush3.bf16.msra.mxu1 %v8776_v35  ;;  %7990 = vmatpush3.bf16.msra.mxu0 %v8777_v37 }
0x1461   : > { %7969 = vmatprep.subr.bf16.mxu1 %v8778_v38  ;;  %7991 = vmatprep.subr.bf16.mxu0 %v8779_v40 }
0x1464   : > { %7970 = vmatpush3.bf16.msra.mxu1 %v8780_v7  ;;  %7992 = vmatpush3.bf16.msra.mxu0 %v8781_v42 }
0x1465   : > { %7971 = vmatprep.subr.bf16.mxu1 %v8782_v41  ;;  %7993 = vmatprep.subr.bf16.mxu0 %v8783_v44 }
0x1468   : > { %7972 = vmatpush3.bf16.msra.mxu1 %v8784_v53  ;;  %7994 = vmatpush3.bf16.msra.mxu0 %v8785_v46 }
0x1469   : > { %7973 = vmatprep.subr.bf16.mxu1 %v8786_v47  ;;  %7995 = vmatprep.subr.bf16.mxu0 %v8787_v48 }
0x146c   : > { %7974 = vmatpush3.bf16.msra.mxu1 %v8788_v50  ;;  %7996 = vmatpush3.bf16.msra.mxu0 %v8789_v51 }
0x146d   : > { %7975 = vmatprep.subr.bf16.mxu1 %v8790_v52  ;;  %7997 = vmatprep.subr.bf16.mxu0 %v8791_v54 }
0x1470   : > { %7976 = vmatpush3.bf16.msra.mxu1 %v8792_v55  ;;  %7998 = vmatpush3.bf16.msra.mxu0 %v8793_v56 }
0x1471   : > { %7977 = vmatprep.subr.bf16.mxu1 %v8794_v57  ;;  %7999 = vmatprep.subr.bf16.mxu0 %v8795_v58 }
0x1474   : > { %7978 = vmatpush3.bf16.msra.mxu1 %v8796_v59  ;;  %8000 = vmatpush3.bf16.msra.mxu0 %v8797_v36 }
0x1475   : > { %7979 = vmatprep.subr.bf16.mxu1 %v8798_v60  ;;  %8001 = vmatprep.subr.bf16.mxu0 %v8799_v61 }
0x1478   : > { %7980 = vmatpush3.bf16.msra.mxu1 %v8800_v62  ;;  %8002 = vmatpush3.bf16.msra.mxu0 %v8801_v0 }
0x1479   : > { %8341 = vmatprep.subr.bf16.mxu0 %v9221_v3 }
0x151b   : > { %v3247_v6 = vpop.f32.mrf.mxu1  ;;  %v3288_v39 = vpop.f32.mrf.mxu0 }
0x151c   : > { %v3248_v8 = vadd.f32 %v3247_v6, %v3036_v2  ;;  %v3289_v9 = vadd.f32 %v3288_v39, %v3044_v31 }
0x151d   : > { %v3249_v10 = vpop.f32.mrf.mxu1  ;;  %v3290_v11 = vpop.f32.mrf.mxu0 }
0x151e   : > { %v3299_v12 = vmul.f32 0.044715, %v3248_v8  ;;  %v3301_v13 = vmul.f32 0.044715, %v3289_v9  ;;  %v3250_v14 = vadd.f32 %v3249_v10, %v3040_v4  ;;  %v3291_v16 = vadd.f32 %v3290_v11, %v3048_v5  ;;  %v7288_v4 = vld [vmem:[%s11169_s13 + $0x1] ss:$0 sm:$0xff] }
0x151f   : > { %v3251_v17 = vpop.f32.mrf.mxu1  ;;  %v3292_v18 = vpop.f32.mrf.mxu0  ;;  %v3295_v48 = vmul.f32 0.5, %v3248_v8  ;;  %v3297_v55 = vmul.f32 0.5, %v3289_v9 }
0x1520   : > { %v3303_v19 = vmul.f32 %v3299_v12, %v3248_v8  ;;  %v3305_v63 = vmul.f32 %v3301_v13, %v3289_v9  ;;  %v3300_v20 = vmul.f32 0.044715, %v3250_v14  ;;  %v3302_v21 = vmul.f32 0.044715, %v3291_v16  ;;  %v8802_v17 = vld [vmem:[%s11160_s4 + $0x228] ss:$12 sps:$4 sm:$0xff]  }
0x1521   : > { %v3252_v22 = vpop.f32.mrf.mxu1  ;;  %v3293_v24 = vpop.f32.mrf.mxu0  ;;  %v3296_v52 = vmul.f32 0.5, %v3250_v14  ;;  %v3298_v56 = vmul.f32 0.5, %v3291_v16  ;;  %v8804_v18 = vld [vmem:[%s11160_s4 + $0x22c] ss:$12 sps:$4 sm:$0xff]  }
0x1522   : > { %v3307_v27 = vmul.f32 %v3303_v19, %v3248_v8  ;;  %v3309_v28 = vmul.f32 %v3305_v63, %v3289_v9  ;;  %v3304_v29 = vmul.f32 %v3300_v20, %v3250_v14  ;;  %v3306_v30 = vmul.f32 %v3302_v21, %v3291_v16  ;;  %v8805_v19 = vld [vmem:[%s11160_s4 + $0x230] ss:$12 sps:$4 sm:$0xff]   ;;  %v8808_v63 = vld [vmem:[%s11160_s4 + $0x214] ss:$12 sps:$4 sm:$0xff]   ;;  %3891 = vmatprep.subr.bf16.mxu1 %v8804_v18 }
0x1523   : > { %v8806_v20 = vld [vmem:[%s11160_s4 + $0x210] ss:$12 sps:$4 sm:$0xff]  }
0x1524   : > { %v3311_v32 = vadd.f32 %v3307_v27, %v3248_v8  ;;  %v3313_v33 = vadd.f32 %v3309_v28, %v3289_v9  ;;  %v3308_v34 = vmul.f32 %v3304_v29, %v3250_v14  ;;  %v3310_v35 = vmul.f32 %v3306_v30, %v3291_v16  ;;  %v8812_v28 = vld [vmem:[%s11160_s4 + $0x1fc] ss:$12 sps:$4 sm:$0xff]   ;;  %v8810_v29 = vld [vmem:[%s11160_s4 + $0x1f8] ss:$12 sps:$4 sm:$0xff]   ;;  %v8813_v30 = vld [vmem:[%s11160_s4 + $0x200] ss:$12 sps:$4 sm:$0xff]  }
0x1526   : > { %v3315_v37 = vmul.f32 0.7978846, %v3311_v32  ;;  %v3317_v38 = vmul.f32 0.7978846, %v3313_v33  ;;  %v3312_v40 = vadd.f32 %v3308_v34, %v3250_v14  ;;  %v3314_v7 = vadd.f32 %v3310_v35, %v3291_v16  ;;  %v8816_v32 = vld [vmem:[%s11160_s4 + $0x1e4] ss:$12 sps:$4 sm:$0xff]  }
0x1527   : > { %v8814_v33 = vld [vmem:[%s11160_s4 + $0x1e0] ss:$12 sps:$4 sm:$0xff]   ;;  %v8817_v34 = vld [vmem:[%s11160_s4 + $0x1e8] ss:$12 sps:$4 sm:$0xff]  }
0x1528   : > { %v3316_v42 = vmul.f32 0.7978846, %v3312_v40  ;;  %v3318_v41 = vmul.f32 0.7978846, %v3314_v7  ;;  %9090 = vtanh.f32 %v3315_v37  ;;  %v8820_v35 = vld [vmem:[%s11160_s4 + $0x1cc] ss:$12 sps:$4 sm:$0xff]  }
0x1529   : > { %9092 = vtanh.f32 %v3317_v38  ;;  %v8818_v37 = vld [vmem:[%s11160_s4 + $0x1c8] ss:$12 sps:$4 sm:$0xff]   ;;  %v8821_v38 = vld [vmem:[%s11160_s4 + $0x1d0] ss:$12 sps:$4 sm:$0xff]  }
0x152a   : > { %9094 = vtanh.f32 %v3316_v42  ;;  %v8824_v40 = vld [vmem:[%s11160_s4 + $0x1b4] ss:$12 sps:$4 sm:$0xff]   ;;  %v8822_v7 = vld [vmem:[%s11160_s4 + $0x1b0] ss:$12 sps:$4 sm:$0xff]   ;;  %v8825_v42 = vld [vmem:[%s11160_s4 + $0x1b8] ss:$12 sps:$4 sm:$0xff]  }
0x152b   : > { %9096 = vtanh.f32 %v3318_v41  ;;  %v8828_v41 = vld [vmem:[%s11160_s4 + $0x19c] ss:$12 sps:$4 sm:$0xff]  }
0x1535   : > { %v9091_v44 = vpop.eup %9090 }
0x1536   : > { %v9093_v53 = vpop.eup %9092  ;;  %v3323_v46 = vadd.f32 1.0, %v9091_v44  ;;  %v8826_v44 = vld [vmem:[%s11160_s4 + $0x198] ss:$12 sps:$4 sm:$0xff]  }
0x1537   : > { %v9095_v47 = vpop.eup %9094  ;;  %v3325_v50 = vadd.f32 1.0, %v9093_v53  ;;  %v8829_v53 = vld [vmem:[%s11160_s4 + $0x1a0] ss:$12 sps:$4 sm:$0xff]  }
0x1538   : > { %v9097_v51 = vpop.eup %9096  ;;  %v3324_v54 = vadd.f32 1.0, %v9095_v47  ;;  %v3327_v58 = vmul.f32 %v3323_v46, %v3295_v48  ;;  %v8832_v46 = vld [vmem:[%s11160_s4 + $0x184] ss:$12 sps:$4 sm:$0xff]   ;;  %v8830_v47 = vld [vmem:[%s11160_s4 + $0x180] ss:$12 sps:$4 sm:$0xff]  }
0x1539   : > { %v3326_v57 = vadd.f32 1.0, %v9097_v51  ;;  %v3329_v36 = vmul.f32 %v3325_v50, %v3297_v55  ;;  %v8833_v48 = vld [vmem:[%s11160_s4 + $0x188] ss:$12 sps:$4 sm:$0xff]   ;;  %v7323_v55 = vld [vmem:[%s11170_s14 + $0x1] ss:$0 sm:$0xff] }
0x153a   : > { %v3328_v59 = vmul.f32 %v3324_v54, %v3296_v52  ;;  %v3331_v0 = vpack.c.bf16 %v3327_v58, %v3327_v58 }
0x153b   : > { %v3330_v60 = vmul.f32 %v3326_v57, %v3298_v56  ;;  %v3333_v1 = vpack.c.bf16 %v3329_v36, %v3329_v36  ;;  %v7324_v57 = vld [vmem:[%s11171_s15 + $0x1] ss:$0 sm:$0xff] }
0x153c   : > { %v3332_v61 = vpack.c.bf16 %v3328_v59, %v3328_v59 }
0x153d   : > { %v3334_v62 = vpack.c.bf16 %v3330_v60, %v3330_v60  ;;  %v7357_v60 = vld [vmem:[%s11161_s5 + $0x6] sm:$0x7] }
0x153e   : > { %3632 = vmatprep.mubr.bf16.mxu1 %v3332_v61  ;;  %v3755_v61 = vrot.slane %v7357_v60, %v9471_v43 }
0x153f   : > { %3672 = vmatprep.mubr.bf16.mxu0 %v3334_v62  ;;  %3633 = vmatmul.mubr.bf16.vlgmr.msra.gmra.mxu1 %v3331_v0 }
0x1540   : > { %3673 = vmatmul.mubr.bf16.vlgmr.msra.gmra.mxu0 %v3333_v1  ;;  %3923 = vmatprep.mubr.bf16.mxu1 %v9222_v25 }
0x1541   : > { %8357 = vmatprep.mubr.msk.bf16.mxu0 %vm9223_vm0, %v9221_v3  ;;  %8342 = vmatpush3.bf16.msra.mxu0 %v8805_v19  ;;  %v10367_v19 = vld [vmem:[%s9501_s23] ss:$0 sm:$0xff] }
0x1542   : > { %3892 = vmatpush1.bf16.msra.mxu1 %v8802_v17  ;;  %8343 = vmatprep.subr.bf16.mxu0 %v9221_v3 }
0x1543   : > { %3893 = vmatprep.subr.bf16.mxu1 %v8808_v63 }
0x1546   : > { %3894 = vmatpush1.bf16.msra.mxu1 %v8806_v20 }
0x1547   : > { %3895 = vmatprep.subr.bf16.mxu1 %v8812_v28 }
0x154a   : > { %3896 = vmatpush1.bf16.msra.mxu1 %v8810_v29 }
0x154b   : > { %3897 = vmatprep.subr.bf16.mxu1 %v8816_v32 }
0x154e   : > { %3898 = vmatpush1.bf16.msra.mxu1 %v8814_v33 }
0x154f   : > { %3899 = vmatprep.subr.bf16.mxu1 %v8820_v35 }
0x1552   : > { %3900 = vmatpush1.bf16.msra.mxu1 %v8818_v37 }
0x1553   : > { %3901 = vmatprep.subr.bf16.mxu1 %v8824_v40 }
0x1556   : > { %3902 = vmatpush1.bf16.msra.mxu1 %v8822_v7 }
0x1557   : > { %3903 = vmatprep.subr.bf16.mxu1 %v8828_v41 }
0x155a   : > { %3904 = vmatpush1.bf16.msra.mxu1 %v8826_v44 }
0x155b   : > { %3905 = vmatprep.subr.bf16.mxu1 %v8832_v46 }
0x155e   : > { %3906 = vmatpush1.bf16.msra.mxu1 %v8830_v47 }
0x155f   : > { %8361 = vmatprep.subr.bf16.mxu1 %v9221_v3 }
0x15ff   : > { %v7981_v2 = vpop.f32.mrf.mxu1 }
0x1600   : > { %v8003_v31 = vpop.f32.mrf.mxu0 }
0x1601   : > { %v7982_v5 = vpop.f32.mrf.mxu1 }
0x1602   : > { %v7983_v6 = vadd.f32 %v7982_v5, %v7981_v2  ;;  %v8004_v39 = vpop.f32.mrf.mxu0 }
0x1603   : > { %v7984_v8 = vpop.f32.mrf.mxu1  ;;  %v8005_v10 = vadd.f32 %v8004_v39, %v8003_v31  ;;  %v3759_v31 = vrot.slane %v7357_v60, %v9477_v45  ;;  %v3751_v39 = vrot.slane %v7357_v60, %v9481_v49 }
0x1604   : > { %v3635_v9 = vadd.f32 %v7983_v6, %v7288_v4  ;;  %v8006_v11 = vpop.f32.mrf.mxu0 }
0x1605   : > { %v7985_v12 = vpop.f32.mrf.mxu1 }
0x1606   : > { %v3675_v13 = vadd.f32 %v8005_v10, %v3635_v9  ;;  %v8007_v14 = vpop.f32.mrf.mxu0 }
0x1608   : > { %v3680_v16 = vadd.f32 %v3675_v13, %v10140_v26  ;;  %v8809_v26 = vld [vmem:[%s11160_s4 + $0x218] ss:$12 sps:$4 sm:$0xff]  }
0x1609   : > { %8344 = vmatpush3.bf16.msra.mxu0 %v8809_v26 }
0x160a   : > { %3685 = vadd.xlane.f32.xlu0 %v3680_v16  ;;  %8345 = vmatprep.subr.bf16.mxu0 %v9221_v3 }
0x160d   : > { %8346 = vmatpush3.bf16.msra.mxu0 %v8813_v30 }
0x160e   : > { %8347 = vmatprep.subr.bf16.mxu0 %v9221_v3 }
0x1611   : > { %8348 = vmatpush3.bf16.msra.mxu0 %v8817_v34 }
0x1612   : > { %8349 = vmatprep.subr.bf16.mxu0 %v9221_v3 }
0x1615   : > { %8350 = vmatpush3.bf16.msra.mxu0 %v8821_v38 }
0x1616   : > { %8351 = vmatprep.subr.bf16.mxu0 %v9221_v3 }
0x1619   : > { %8352 = vmatpush3.bf16.msra.mxu0 %v8825_v42 }
0x161a   : > { %8353 = vmatprep.subr.bf16.mxu0 %v9221_v3 }
0x161d   : > { %8354 = vmatpush3.bf16.msra.mxu0 %v8829_v53 }
0x161e   : > { %8355 = vmatprep.subr.bf16.mxu0 %v9221_v3 }
0x1621   : > { %8356 = vmatpush3.bf16.msra.mxu0 %v8833_v48 }
0x1622   : > { %8385 = vmatprep.subr.bf16.mxu0 %v9221_v3 }
0x1693   : > { %v3686_v21 = vpop.xlane.xlu0 %3685 }
0x1694   : > { %v3687_v22 = vmul.f32 0.0078125, %v3686_v21 }
0x1696   : > { %v3688_v24 = vsub.f32 %v3680_v16, %v3687_v22 }
0x1698   : > { %v3689_v27 = vmul.f32 %v3688_v24, %v3688_v24 }
0x169a   : > { %3690 = vadd.xlane.f32.xlu0 %v3689_v27 }
0x1723   : > { %v3691_v50 = vpop.xlane.xlu0 %3690 }
0x1724   : > { %v3692_v51 = vmul.f32 0.0078125, %v3691_v50 }
0x1726   : > { %v3693_v52 = vadd.f32 1e-12, %v3692_v51 }
0x1728   : > { %9098 = vrsqrt.f32 %v3693_v52 }
0x1735   : > { %v9099_v54 = vpop.eup %9098 }
0x1736   : > { %v3695_v56 = vmul.f32 %v9099_v54, %v3688_v24 }
0x1738   : > { %v3702_v58 = vmul.f32 %v7323_v55, %v3695_v56 }
0x173a   : > { %v10342_v59 = vadd.f32 %v7324_v57, %v3702_v58 }
0x173c   : > { %v3711_v36 = vpack.c.bf16 %v10342_v59, %v10342_v59 }
0x173e   : > { %3924 = vmatmul.mubr.bf16.vlgmr.msra.gmra.mxu1 %v3711_v36  ;;  %8358 = vmatmul.mubr.bf16.vlgmr.msra.gmra.mxu0 %v3711_v36 }
0x173f   : > { %8363 = vmatprep.mubr.msk.bf16.mxu1 %vm9223_vm0, %v9221_v3  ;;  %8387 = vmatprep.mubr.msk.bf16.mxu0 %vm9223_vm0, %v9221_v3 }
0x17fe   : > { %v3925_v62 = vpop.f32.mrf.mxu1  ;;  %v3966_v0 = vpop.f32.mrf.mxu0 }
0x17ff   : > { %v3967_v11 = vadd.f32 %v3966_v0, %v3759_v31  ;;  %v3926_v13 = vadd.f32 %v3925_v62, %v3751_v39 }
0x1800   : > { %v3927_v1 = vpop.f32.mrf.mxu1  ;;  %v8359_v2 = vpop.f32.mrf.mxu0 }
0x1801   : > { %v3928_v4 = vadd.f32 %v3927_v1, %v3755_v61  ;;  %v10358_v14 = vpack.c.bf16 %v3967_v11, %v3967_v11  ;;  %v3972_v16 = vpack.c.bf16 %v3926_v13, %v3926_v13 }
0x1802   : > { %v3929_v5 = vpop.f32.mrf.mxu1  ;;  %v3969_v6 = vpop.f32.mrf.mxu0 }
0x1803   : > { %v3973_v8 = vpack.c.bf16 %v3928_v4, %v3928_v4  ;;  %v4037_v17 = vsel %vm893_vm2, %v10358_v14, 0 }
0x1804   : > { %v3930_v9 = vpop.f32.mrf.mxu1  ;;  %v8360_v10 = vpop.f32.mrf.mxu0 }
0x1805   : > { %v3979_v12 = vsel %vm830_vm1, %v3973_v8, 0 }
0x1806   : > { %8362 = vmatpush3.bf16.xpose.msra.mxu1 %v3979_v12 }
0x1807   : > { %8367 = vmatprep.subr.bf16.mxu1 %v9221_v3 }
0x180d   : > { %8364 = vmatmul.mubr.msk.bf16.vlgmr.msra.gmra.mxu1 %vm830_vm1, %v3972_v16 }
0x180e   : > { %8368 = vmatpush3.bf16.msra.mxu1 %v4037_v17  ;;  %8369 = vmatprep.mubr.msk.bf16.mxu1 %vm9223_vm0, %v9221_v3 }
0x180f   : > { %8373 = vmatprep.subr.bf16.mxu1 %v9221_v3 }
0x18cd   : > { %v4015_v18 = vpop.f32.mrf.mxu1 }
0x18ce   : > { %v4016_v63 = vadd.f32 %v10367_v19, %v4015_v18 }
0x18cf   : > { %v8365_v26 = vpop.f32.mrf.mxu1 }
0x18d0   : > { %v4021_v20 = vsel %vm877_vm3, %v4016_v63, -inf }
0x18d1   : > { %4022 = vmax.xlane.f32.xlu0 %v4021_v20  ;;  %v4018_v21 = vpop.f32.mrf.mxu1 }
0x18d3   : > { %v8366_v22 = vpop.f32.mrf.mxu1 }
0x18e7   : > { %4083 = vrot.lane.b32.xlu0 %v3973_v8, %s11203_s20 }
0x18eb   : > { %4304 = vrot.lane.b32.xlu0 %v3973_v8, %s11204_s18 }
0x195a   : > { %v4023_v24 = vpop.xlane.xlu0 %4022 }
0x195b   : > { %v4024_v27 = vsub.f32 %v4016_v63, %v4023_v24 }
0x195d   : > { %v4025_v28 = vmul.f32 1.442695, %v4024_v27 }
0x195e   : > { %v4084_v34 = vpop.permute.xlu0 %4083 }
0x195f   : > { %9100 = vpow2.f32 %v4025_v28  ;;  %v4089_v53 = vsel %vm830_vm1, %v4084_v34, 0 }
0x1962   : > { %v4305_v40 = vpop.permute.xlu0 %4304 }
0x1963   : > { %v4310_v41 = vsel %vm830_vm1, %v4305_v40, 0 }
0x196c   : > { %v9101_v29 = vpop.eup %9100 }
0x196d   : > { %v4027_v30 = vsel %vm877_vm3, %v9101_v29, 0.0 }
0x196e   : > { %4028 = vadd.xlane.f32.xlu1 %v4027_v30 }
0x197f   : > { %4080 = vrot.lane.b32.xlu1 %v3972_v16, %s11203_s20 }
0x1983   : > { %4194 = vrot.lane.b32.xlu1 %v3973_v8, %s11205_s17 }
0x1987   : > { %4192 = vrot.lane.b32.xlu1 %v3972_v16, %s11205_s17 }
0x198b   : > { %4302 = vrot.lane.b32.xlu1 %v3972_v16, %s11204_s18 }
0x19f7   : > { %v4029_v32 = vpop.xlane.xlu1 %4028 }
0x19f8   : > { %9102 = vrcp.f32 %v4029_v32 }
0x19fb   : > { %v4081_v33 = vpop.permute.xlu1 %4080 }
0x19ff   : > { %v4195_v35 = vpop.permute.xlu1 %4194 }
0x1a00   : > { %v4200_v37 = vsel %vm830_vm1, %v4195_v35, 0 }
0x1a01   : > { %8386 = vmatpush3.bf16.xpose.msra.mxu0 %v4200_v37 }
0x1a02   : > { %8397 = vmatprep.subr.bf16.mxu0 %v9221_v3 }
0x1a03   : > { %v4193_v42 = vpop.permute.xlu1 %4192 }
0x1a05   : > { %v9103_v38 = vpop.eup %9102 }
0x1a06   : > { %v4031_v7 = vmul.f32 %v9103_v38, %v9101_v29 }
0x1a07   : > { %v4303_v46 = vpop.permute.xlu1 %4302 }
0x1a08   : > { %8388 = vmatmul.mubr.msk.bf16.vlgmr.msra.gmra.mxu0 %vm830_vm1, %v4193_v42  ;;  %v4032_v44 = vpack.c.bf16 %v4031_v7, %v4031_v7 }
0x1a09   : > { %8398 = vmatpush3.bf16.xpose.msra.mxu0 %v4310_v41  ;;  %8399 = vmatprep.mubr.msk.bf16.mxu0 %vm9223_vm0, %v9221_v3 }
0x1a0a   : > { %8370 = vmatmul.mubr.msk.bf16.vlgmr.msra.gmra.mxu1 %vm877_vm3, %v4032_v44  ;;  %8409 = vmatprep.subr.bf16.mxu0 %v9221_v3 }
0x1a0b   : > { %8374 = vmatpush3.bf16.xpose.msra.mxu1 %v4089_v53  ;;  %8375 = vmatprep.mubr.msk.bf16.mxu1 %vm9223_vm0, %v9221_v3 }
0x1a0c   : > { %8379 = vmatprep.subr.bf16.mxu1 %v9221_v3 }
0x1a10   : > { %8400 = vmatmul.mubr.msk.bf16.vlgmr.msra.gmra.mxu0 %vm830_vm1, %v4303_v46  ;;  %v8834_v46 = vld [vmem:[%s11162_s6 + $0xb8] sm:$0xff]  }
0x1a11   : > { %8425 = vmatprep.mubr.msk.bf16.mxu0 %vm9223_vm0, %v9221_v3  ;;  %8410 = vmatpush3.bf16.msra.mxu0 %v8834_v46  ;;  %v8866_v46 = vld [vmem:[%s11166_s10 + $0x260] ss:$16 sps:$4 sm:$0xff]  }
0x1a12   : > { %8376 = vmatmul.mubr.msk.bf16.vlgmr.msra.gmra.mxu1 %vm830_vm1, %v4081_v33  ;;  %8411 = vmatprep.subr.bf16.mxu0 %v9221_v3 }
0x1a13   : > { %8381 = vmatprep.mubr.msk.bf16.mxu1 %vm9223_vm0, %v9221_v3 }
0x1ac8   : > { %v4236_v47 = vpop.f32.mrf.mxu0 }
0x1ac9   : > { %v4237_v48 = vadd.f32 %v10367_v19, %v4236_v47  ;;  %v8835_v47 = vld [vmem:[%s11162_s6 + $0xb0] sm:$0xff]  }
0x1aca   : > { %v10397_v50 = vpop.f32.mrf.mxu1  ;;  %v8389_v51 = vpop.f32.mrf.mxu0  ;;  %8412 = vmatpush3.bf16.msra.mxu0 %v8835_v47  ;;  %v8869_v47 = vld [vmem:[%s11166_s10 + $0x268] ss:$16 sps:$4 sm:$0xff]  }
0x1acb   : > { %v4242_v52 = vsel %vm877_vm3, %v4237_v48, -inf  ;;  %8413 = vmatprep.subr.bf16.mxu0 %v9221_v3  ;;  %v8837_v51 = vld [vmem:[%s11162_s6 + $0xa0] sm:$0xff]  }
0x1acc   : > { %4243 = vmax.xlane.f32.xlu1 %v4242_v52  ;;  %v8371_v54 = vpop.f32.mrf.mxu1  ;;  %v4239_v55 = vpop.f32.mrf.mxu0  ;;  %v8838_v52 = vld [vmem:[%s11162_s6 + $0x98] sm:$0xff]  }
0x1acd   : > { %v8839_v54 = vld [vmem:[%s11162_s6 + $0x90] sm:$0xff]   ;;  %v8840_v55 = vld [vmem:[%s11162_s6 + $0x88] sm:$0xff]  }
0x1ace   : > { %v4076_v56 = vpop.f32.mrf.mxu1  ;;  %v8390_v57 = vpop.f32.mrf.mxu0 }
0x1ad0   : > { %v8372_v58 = vpop.f32.mrf.mxu1  ;;  %v4346_v36 = vpop.f32.mrf.mxu0 }
0x1ad1   : > { %v4347_v2 = vadd.f32 %v10367_v19, %v4346_v36  ;;  %v8841_v58 = vld [vmem:[%s11162_s6 + $0x80] sm:$0xff]  }
0x1ad2   : > { %v4125_v60 = vpop.f32.mrf.mxu1  ;;  %v8401_v61 = vpop.f32.mrf.mxu0 }
0x1ad3   : > { %v4126_v62 = vadd.f32 %v10367_v19, %v4125_v60  ;;  %v4352_v39 = vsel %vm877_vm3, %v4347_v2, -inf }
0x1ad4   : > { %v8377_v0 = vpop.f32.mrf.mxu1  ;;  %v4349_v1 = vpop.f32.mrf.mxu0 }
0x1ad5   : > { %v4131_v31 = vsel %vm877_vm3, %v4126_v62, -inf }
0x1ad6   : > { %v8402_v4 = vpop.f32.mrf.mxu0  ;;  %4132 = vmax.xlane.f32.xlu0 %v4131_v31  ;;  %v4128_v5 = vpop.f32.mrf.mxu1 }
0x1ad8   : > { %v8378_v6 = vpop.f32.mrf.mxu1 }
0x1ada   : > { %4353 = vmax.xlane.f32.xlu0 %v4352_v39 }
0x1b55   : > { %v4244_v8 = vpop.xlane.xlu1 %4243 }
0x1b56   : > { %v4245_v9 = vsub.f32 %v4237_v48, %v4244_v8  ;;  %v8836_v48 = vld [vmem:[%s11162_s6 + $0xa8] sm:$0xff]  }
0x1b57   : > { %8414 = vmatpush3.bf16.msra.mxu0 %v8836_v48  ;;  %v8874_v48 = vld [vmem:[%s11166_s10 + $0x244] ss:$16 sps:$4 sm:$0xff]  }
0x1b58   : > { %v4246_v10 = vmul.f32 1.442695, %v4245_v9  ;;  %8415 = vmatprep.subr.bf16.mxu0 %v9221_v3 }
0x1b5a   : > { %9104 = vpow2.f32 %v4246_v10 }
0x1b5b   : > { %8416 = vmatpush3.bf16.msra.mxu0 %v8837_v51  ;;  %v8877_v51 = vld [vmem:[%s11166_s10 + $0x24c] ss:$16 sps:$4 sm:$0xff]  }
0x1b5c   : > { %8417 = vmatprep.subr.bf16.mxu0 %v9221_v3 }
0x1b5f   : > { %v4133_v11 = vpop.xlane.xlu0 %4132  ;;  %8418 = vmatpush3.bf16.msra.mxu0 %v8838_v52  ;;  %v8872_v52 = vld [vmem:[%s11166_s10 + $0x240] ss:$16 sps:$4 sm:$0xff]  }
0x1b60   : > { %v4134_v12 = vsub.f32 %v4126_v62, %v4133_v11  ;;  %8419 = vmatprep.subr.bf16.mxu0 %v9221_v3 }
0x1b62   : > { %v4135_v13 = vmul.f32 1.442695, %v4134_v12 }
0x1b63   : > { %v4354_v16 = vpop.xlane.xlu0 %4353  ;;  %8420 = vmatpush3.bf16.msra.mxu0 %v8839_v54  ;;  %v8875_v54 = vld [vmem:[%s11166_s10 + $0x248] ss:$16 sps:$4 sm:$0xff]  }
0x1b64   : > { %9106 = vpow2.f32 %v4135_v13  ;;  %v4355_v17 = vsub.f32 %v4347_v2, %v4354_v16  ;;  %8421 = vmatprep.subr.bf16.mxu0 %v9221_v3  ;;  %v7407_v13 = vld [vmem:[%s11163_s7 + $0x2] ss:$0 sm:$0xff] }
0x1b66   : > { %v4356_v18 = vmul.f32 1.442695, %v4355_v17 }
0x1b67   : > { %v9105_v19 = vpop.eup %9104  ;;  %8422 = vmatpush3.bf16.msra.mxu0 %v8840_v55  ;;  %v8880_v55 = vld [vmem:[%s11166_s10 + $0x224] ss:$16 sps:$4 sm:$0xff]  }
0x1b68   : > { %9108 = vpow2.f32 %v4356_v18  ;;  %v4248_v63 = vsel %vm877_vm3, %v9105_v19, 0.0  ;;  %8423 = vmatprep.subr.bf16.mxu0 %v9221_v3 }
0x1b69   : > { %4249 = vadd.xlane.f32.xlu0 %v4248_v63 }
0x1b6b   : > { %8424 = vmatpush3.bf16.msra.mxu0 %v8841_v58  ;;  %v8881_v58 = vld [vmem:[%s11166_s10 + $0x228] ss:$16 sps:$4 sm:$0xff]  }
0x1b71   : > { %v9107_v26 = vpop.eup %9106 }
0x1b72   : > { %v4137_v20 = vsel %vm877_vm3, %v9107_v26, 0.0 }
0x1b73   : > { %4138 = vadd.xlane.f32.xlu0 %v4137_v20  ;;  %v8844_v20 = vld [vmem:[%s11166_s10 + $0x2e4] ss:$16 sps:$4 sm:$0xff]  }
0x1b75   : > { %v9109_v21 = vpop.eup %9108 }
0x1b76   : > { %v4358_v22 = vsel %vm877_vm3, %v9109_v21, 0.0 }
0x1b77   : > { %4359 = vadd.xlane.f32.xlu1 %v4358_v22  ;;  %v8847_v22 = vld [vmem:[%s11166_s10 + $0x2ec] ss:$16 sps:$4 sm:$0xff]  }
0x1b78   : > { %4829 = vmatprep.subr.bf16.mxu0 %v8847_v22  ;;  %v8903_v22 = vld [vmem:[%s11168_s12 + $0x2e0] sm:$0xff]  }
0x1b88   : > { %4254 = vrot.lane.b32.xlu1 %v10358_v14, %s11205_s17 }
0x1b89   : > { %4144 = vrot.lane.b32.xlu0 %v10358_v14, %s11203_s20 }
0x1b8c   : > { %4364 = vrot.lane.b32.xlu1 %v10358_v14, %s11204_s18 }
0x1bf2   : > { %v4250_v24 = vpop.xlane.xlu0 %4249 }
0x1bfc   : > { %v4139_v27 = vpop.xlane.xlu0 %4138 }
0x1bfd   : > { %9110 = vrcp.f32 %v4139_v27  ;;  %v8853_v27 = vld [vmem:[%s11166_s10 + $0x2cc] ss:$16 sps:$4 sm:$0xff]  }
0x1bfe   : > { %9112 = vrcp.f32 %v4250_v24  ;;  %v8850_v24 = vld [vmem:[%s11166_s10 + $0x2c4] ss:$16 sps:$4 sm:$0xff]  }
0x1c00   : > { %v4145_v28 = vpop.permute.xlu0 %4144  ;;  %v4360_v30 = vpop.xlane.xlu1 %4359 }
0x1c01   : > { %v4150_v29 = vsel %vm893_vm2, %v4145_v28, 0  ;;  %9114 = vrcp.f32 %v4360_v30  ;;  %v8848_v28 = vld [vmem:[%s11166_s10 + $0x2c0] ss:$16 sps:$4 sm:$0xff]  }
0x1c02   : > { %8380 = vmatpush3.bf16.msra.mxu1 %v4150_v29  ;;  %v8851_v29 = vld [vmem:[%s11166_s10 + $0x2c8] ss:$16 sps:$4 sm:$0xff]  }
0x1c03   : > { %8391 = vmatprep.subr.bf16.mxu1 %v9221_v3 }
0x1c04   : > { %v4255_v34 = vpop.permute.xlu1 %4254 }
0x1c05   : > { %v4260_v38 = vsel %vm893_vm2, %v4255_v34, 0 }
0x1c08   : > { %v4365_v40 = vpop.permute.xlu1 %4364 }
0x1c09   : > { %v4370_v41 = vsel %vm893_vm2, %v4365_v40, 0  ;;  %v8860_v40 = vld [vmem:[%s11166_s10 + $0x280] ss:$16 sps:$4 sm:$0xff]  }
0x1c0a   : > { %v9111_v32 = vpop.eup %9110 }
0x1c0b   : > { %v4141_v33 = vmul.f32 %v9111_v32, %v9107_v26  ;;  %v9113_v37 = vpop.eup %9112  ;;  %v8842_v26 = vld [vmem:[%s11166_s10 + $0x2e0] ss:$16 sps:$4 sm:$0xff]  }
0x1c0c   : > { %v4252_v14 = vmul.f32 %v9113_v37, %v9105_v19  ;;  %v8859_v37 = vld [vmem:[%s11166_s10 + $0x2ac] ss:$16 sps:$4 sm:$0xff]  }
0x1c0d   : > { %v4142_v35 = vpack.c.bf16 %v4141_v33, %v4141_v33 }
0x1c0e   : > { %v4253_v7 = vpack.c.bf16 %v4252_v14, %v4252_v14  ;;  %v9115_v42 = vpop.eup %9114  ;;  %v8857_v14 = vld [vmem:[%s11166_s10 + $0x2a8] ss:$16 sps:$4 sm:$0xff]  }
0x1c0f   : > { %8382 = vmatmul.mubr.msk.bf16.vlgmr.msra.gmra.mxu1 %vm877_vm3, %v4142_v35  ;;  %v4362_v44 = vmul.f32 %v9115_v42, %v9109_v21  ;;  %v8845_v21 = vld [vmem:[%s11166_s10 + $0x2e8] ss:$16 sps:$4 sm:$0xff]   ;;  %v8856_v35 = vld [vmem:[%s11166_s10 + $0x2a4] ss:$16 sps:$4 sm:$0xff]  }
0x1c10   : > { %8392 = vmatpush3.bf16.msra.mxu1 %v4260_v38  ;;  %8393 = vmatprep.mubr.msk.bf16.mxu1 %vm9223_vm0, %v9221_v3  ;;  %v8854_v38 = vld [vmem:[%s11166_s10 + $0x2a0] ss:$16 sps:$4 sm:$0xff]   ;;  %v8863_v42 = vld [vmem:[%s11166_s10 + $0x288] ss:$16 sps:$4 sm:$0xff]  }
0x1c11   : > { %8403 = vmatprep.subr.bf16.mxu1 %v9221_v3  ;;  %v4363_v53 = vpack.c.bf16 %v4362_v44, %v4362_v44  ;;  %v8868_v44 = vld [vmem:[%s11166_s10 + $0x264] ss:$16 sps:$4 sm:$0xff]  }
0x1c17   : > { %8394 = vmatmul.mubr.msk.bf16.vlgmr.msra.gmra.mxu1 %vm877_vm3, %v4253_v7  ;;  %v8862_v7 = vld [vmem:[%s11166_s10 + $0x284] ss:$16 sps:$4 sm:$0xff]  }
0x1c18   : > { %8404 = vmatpush3.bf16.msra.mxu1 %v4370_v41  ;;  %8405 = vmatprep.mubr.msk.bf16.mxu1 %vm9223_vm0, %v9221_v3  ;;  %v8865_v41 = vld [vmem:[%s11166_s10 + $0x28c] ss:$16 sps:$4 sm:$0xff]  }
0x1c19   : > { %4788 = vmatprep.subr.bf16.mxu1 %v8844_v20  ;;  %v8901_v20 = vld [vmem:[%s11168_s12 + $0x2a8] sm:$0xff]  }
0x1c1f   : > { %8406 = vmatmul.mubr.msk.bf16.vlgmr.msra.gmra.mxu1 %vm877_vm3, %v4363_v53  ;;  %v8871_v53 = vld [vmem:[%s11166_s10 + $0x26c] ss:$16 sps:$4 sm:$0xff]  }
0x1c20   : > { %4820 = vmatprep.mubr.bf16.mxu1 %v9222_v25  ;;  %4789 = vmatpush1.bf16.msra.mxu1 %v8842_v26  ;;  %v8900_v26 = vld [vmem:[%s11168_s12 + $0x228] sm:$0xff]  }
0x1c21   : > { %4790 = vmatprep.subr.bf16.mxu1 %v8850_v24  ;;  %v8904_v24 = vld [vmem:[%s11168_s12 + $0x220] sm:$0xff]  }
0x1c24   : > { %4791 = vmatpush1.bf16.msra.mxu1 %v8848_v28  ;;  %v8906_v28 = vld [vmem:[%s11168_s12 + $0x258] sm:$0xff]  }
0x1c25   : > { %4792 = vmatprep.subr.bf16.mxu1 %v8856_v35  ;;  %v8912_v35 = vld [vmem:[%s11168_s12 + $0x210] sm:$0xff]  }
0x1c28   : > { %4793 = vmatpush1.bf16.msra.mxu1 %v8854_v38  ;;  %v8914_v38 = vld [vmem:[%s11168_s12 + $0x248] sm:$0xff]  }
0x1c29   : > { %4794 = vmatprep.subr.bf16.mxu1 %v8862_v7  ;;  %v8917_v7 = vld [vmem:[%s11168_s12 + $0x288] sm:$0xff]  }
0x1c2c   : > { %4795 = vmatpush1.bf16.msra.mxu1 %v8860_v40  ;;  %v8916_v40 = vld [vmem:[%s11168_s12 + $0x208] sm:$0xff]  }
0x1c2d   : > { %4796 = vmatprep.subr.bf16.mxu1 %v8868_v44  ;;  %v8920_v44 = vld [vmem:[%s11168_s12 + $0x200] sm:$0xff]  }
0x1c30   : > { %4797 = vmatpush1.bf16.msra.mxu1 %v8866_v46  ;;  %v7452_v46 = vld [vmem:[%s11167_s11 + $0x8] sm:$0xf] }
0x1c31   : > { %4798 = vmatprep.subr.bf16.mxu1 %v8874_v48  ;;  %v4619_v48 = vrot.slane %v7452_v46, %v9477_v45 }
0x1c34   : > { %4799 = vmatpush1.bf16.msra.mxu1 %v8872_v52  ;;  %v4623_v52 = vrot.slane %v7452_v46, %v9811_v23 }
0x1c35   : > { %4800 = vmatprep.subr.bf16.mxu1 %v8880_v55 }
0x1ccf   : > { %v4186_v56 = vpop.f32.mrf.mxu1 }
0x1cd0   : > { %4413 = vrot.lane.b32.xlu1 %v4186_v56, %s11204_s18  ;;  %v8883_v56 = vld [vmem:[%s11166_s10 + $0x22c] ss:$16 sps:$4 sm:$0xff]  }
0x1cd1   : > { %v8383_v57 = vpop.f32.mrf.mxu1 }
0x1cd2   : > { %v8878_v57 = vld [vmem:[%s11166_s10 + $0x220] ss:$16 sps:$4 sm:$0xff]  }
0x1cd3   : > { %v4189_v36 = vpop.f32.mrf.mxu1  ;;  %4801 = vmatpush1.bf16.msra.mxu1 %v8878_v57 }
0x1cd4   : > { %v8886_v36 = vld [vmem:[%s11166_s10 + $0x204] ss:$16 sps:$4 sm:$0xff]  }
0x1cd5   : > { %v8384_v60 = vpop.f32.mrf.mxu1  ;;  %4802 = vmatprep.subr.bf16.mxu1 %v8886_v36 }
0x1cd6   : > { %v8889_v60 = vld [vmem:[%s11166_s10 + $0x20c] ss:$16 sps:$4 sm:$0xff]  }
0x1cd7   : > { %v4296_v61 = vpop.f32.mrf.mxu1 }
0x1cd8   : > { %4417 = vrot.lane.b32.xlu0 %v4296_v61, %s11205_s17  ;;  %v8884_v61 = vld [vmem:[%s11166_s10 + $0x200] ss:$16 sps:$4 sm:$0xff]  }
0x1cd9   : > { %v8395_v62 = vpop.f32.mrf.mxu1  ;;  %4803 = vmatpush1.bf16.msra.mxu1 %v8884_v61 }
0x1cda   : > { %v8887_v62 = vld [vmem:[%s11166_s10 + $0x208] ss:$16 sps:$4 sm:$0xff]  }
0x1cdb   : > { %v4299_v0 = vpop.f32.mrf.mxu1 }
0x1cdd   : > { %v8396_v1 = vpop.f32.mrf.mxu1 }
0x1cdf   : > { %v4406_v2 = vpop.f32.mrf.mxu1 }
0x1ce0   : > { %4421 = vrot.lane.b32.xlu1 %v4406_v2, %s11203_s20 }
0x1ce1   : > { %v8407_v31 = vpop.f32.mrf.mxu1 }
0x1ce3   : > { %v4409_v4 = vpop.f32.mrf.mxu1 }
0x1ce4   : > { %v7418_v4 = vld [vmem:[%s11164_s8 + $0x2] ss:$0 sm:$0xff] }
0x1ce5   : > { %v8408_v5 = vpop.f32.mrf.mxu1 }
0x1d42   : > { %v4414_v6 = vpop.permute.xlu1 %4413 }
0x1d43   : > { %v4424_v8 = vsel %vm830_vm1, %v10397_v50, %v4414_v6  ;;  %v7419_v6 = vld [vmem:[%s11165_s9 + $0x2] ss:$0 sm:$0xff] }
0x1d4a   : > { %v4418_v39 = vpop.permute.xlu0 %4417 }
0x1d4b   : > { %v4425_v9 = vsel %vm1283_vm4, %v4424_v8, %v4418_v39 }
0x1d52   : > { %v4422_v10 = vpop.permute.xlu1 %4421 }
0x1d53   : > { %v4426_v11 = vsel %vm1285_vm5, %v4425_v9, %v4422_v10  ;;  %v8890_v10 = vld [vmem:[%s11168_s12 + $0x278] sm:$0xff]  }
0x1d54   : > { %v4427_v12 = vpack.c.bf16 %v4426_v11, %v4426_v11  ;;  %v8891_v11 = vld [vmem:[%s11168_s12 + $0x2f8] sm:$0xff]   ;;  %8043 = vmatprep.subr.bf16.mxu1 %v8890_v10 }
0x1d56   : > { %8426 = vmatmul.mubr.bf16.vlgmr.msra.gmra.mxu0 %v4427_v12  ;;  %v8892_v12 = vld [vmem:[%s11168_s12 + $0x238] sm:$0xff]  }
0x1d57   : > { %4861 = vmatprep.mubr.bf16.mxu0 %v9222_v25  ;;  %4830 = vmatpush1.bf16.msra.mxu0 %v8845_v21  ;;  %v8902_v21 = vld [vmem:[%s11168_s12 + $0x260] sm:$0xff]  }
0x1d58   : > { %4831 = vmatprep.subr.bf16.mxu0 %v8853_v27  ;;  %v8905_v27 = vld [vmem:[%s11168_s12 + $0x2a0] sm:$0xff]  }
0x1d5b   : > { %4832 = vmatpush1.bf16.msra.mxu0 %v8851_v29  ;;  %v8907_v29 = vld [vmem:[%s11168_s12 + $0x2d8] sm:$0xff]  }
0x1d5c   : > { %4833 = vmatprep.subr.bf16.mxu0 %v8859_v37  ;;  %v8913_v37 = vld [vmem:[%s11168_s12 + $0x290] sm:$0xff]  }
0x1d5f   : > { %4834 = vmatpush1.bf16.msra.mxu0 %v8857_v14  ;;  %v8915_v14 = vld [vmem:[%s11168_s12 + $0x2c8] sm:$0xff]  }
0x1d60   : > { %4835 = vmatprep.subr.bf16.mxu0 %v8865_v41  ;;  %v8919_v41 = vld [vmem:[%s11168_s12 + $0x2c0] sm:$0xff]  }
0x1d63   : > { %4836 = vmatpush1.bf16.msra.mxu0 %v8863_v42  ;;  %v8918_v42 = vld [vmem:[%s11168_s12 + $0x240] sm:$0xff]  }
0x1d64   : > { %4837 = vmatprep.subr.bf16.mxu0 %v8871_v53  ;;  %v8921_v53 = vld [vmem:[%s11168_s12 + $0x280] sm:$0xff]  }
0x1d67   : > { %4838 = vmatpush1.bf16.msra.mxu0 %v8869_v47  ;;  %v4611_v47 = vrot.slane %v7452_v46, %v9481_v49 }
0x1d68   : > { %4839 = vmatprep.subr.bf16.mxu0 %v8877_v51  ;;  %v4615_v51 = vrot.slane %v7452_v46, %v9471_v43 }
0x1d6b   : > { %4840 = vmatpush1.bf16.msra.mxu0 %v8875_v54 }
0x1d6c   : > { %4841 = vmatprep.subr.bf16.mxu0 %v8883_v56 }
0x1d6f   : > { %4842 = vmatpush1.bf16.msra.mxu0 %v8881_v58 }
0x1d70   : > { %4843 = vmatprep.subr.bf16.mxu0 %v8889_v60 }
0x1d73   : > { %4844 = vmatpush1.bf16.msra.mxu0 %v8887_v62 }
0x1d74   : > { %8065 = vmatprep.subr.bf16.mxu0 %v8891_v11 }
0x1e16   : > { %v4535_v16 = vpop.f32.mrf.mxu0 }
0x1e17   : > { %v4536_v17 = vadd.f32 %v7407_v13, %v4535_v16  ;;  %v8893_v13 = vld [vmem:[%s11168_s12 + $0x2b8] sm:$0xff]   ;;  %v8894_v16 = vld [vmem:[%s11168_s12 + $0x270] sm:$0xff]  }
0x1e18   : > { %v8427_v18 = vpop.f32.mrf.mxu0 }
0x1e19   : > { %v4541_v19 = vadd.f32 %v4536_v17, %v10342_v59  ;;  %v8895_v17 = vld [vmem:[%s11168_s12 + $0x2f0] sm:$0xff]  }
0x1e1a   : > { %v4538_v63 = vpop.f32.mrf.mxu0  ;;  %v8896_v18 = vld [vmem:[%s11168_s12 + $0x230] sm:$0xff]  }
0x1e1b   : > { %4546 = vadd.xlane.f32.xlu0 %v4541_v19  ;;  %v8898_v63 = vld [vmem:[%s11168_s12 + $0x268] sm:$0xff]  }
0x1e1c   : > { %v8428_v50 = vpop.f32.mrf.mxu0 }
0x1e1d   : > { %v8899_v50 = vld [vmem:[%s11168_s12 + $0x2e8] sm:$0xff]  }
0x1ea4   : > { %v4547_v30 = vpop.xlane.xlu0 %4546 }
0x1ea5   : > { %v4548_v32 = vmul.f32 0.0078125, %v4547_v30  ;;  %v8908_v30 = vld [vmem:[%s11168_s12 + $0x218] sm:$0xff]  }
0x1ea7   : > { %v4549_v33 = vsub.f32 %v4541_v19, %v4548_v32  ;;  %v8897_v19 = vld [vmem:[%s11168_s12 + $0x2b0] sm:$0xff]   ;;  %v8909_v32 = vld [vmem:[%s11168_s12 + $0x298] sm:$0xff]  }
0x1ea9   : > { %v4550_v34 = vmul.f32 %v4549_v33, %v4549_v33 }
0x1eab   : > { %4551 = vadd.xlane.f32.xlu1 %v4550_v34  ;;  %v8911_v34 = vld [vmem:[%s11168_s12 + $0x2d0] sm:$0xff]  }
0x1f34   : > { %v4552_v0 = vpop.xlane.xlu1 %4551 }
0x1f35   : > { %v4553_v1 = vmul.f32 0.0078125, %v4552_v0 }
0x1f37   : > { %v4554_v2 = vadd.f32 1e-12, %v4553_v1 }
0x1f39   : > { %9116 = vrsqrt.f32 %v4554_v2 }
0x1f46   : > { %v9117_v31 = vpop.eup %9116 }
0x1f47   : > { %v4556_v5 = vmul.f32 %v9117_v31, %v4549_v33  ;;  %v8910_v33 = vld [vmem:[%s11168_s12 + $0x250] sm:$0xff]  }
0x1f49   : > { %v4563_v39 = vmul.f32 %v7418_v4, %v4556_v5 }
0x1f4b   : > { %v10571_v8 = vadd.f32 %v7419_v6, %v4563_v39 }
0x1f4d   : > { %v4571_v9 = vpack.c.bf16 %v10571_v8, %v10571_v8 }
0x1f4f   : > { %4821 = vmatmul.mubr.bf16.vlgmr.msra.gmra.mxu1 %v4571_v9  ;;  %4862 = vmatmul.mubr.bf16.vlgmr.msra.gmra.mxu0 %v4571_v9 }
0x1f50   : > { %8044 = vmatpush3.bf16.msra.mxu1 %v8892_v12  ;;  %8066 = vmatpush3.bf16.msra.mxu0 %v8893_v13 }
0x1f51   : > { %8045 = vmatprep.subr.bf16.mxu1 %v8894_v16  ;;  %8067 = vmatprep.subr.bf16.mxu0 %v8895_v17 }
0x1f54   : > { %8046 = vmatpush3.bf16.msra.mxu1 %v8896_v18  ;;  %8068 = vmatpush3.bf16.msra.mxu0 %v8897_v19 }
0x1f55   : > { %8047 = vmatprep.subr.bf16.mxu1 %v8898_v63  ;;  %8069 = vmatprep.subr.bf16.mxu0 %v8899_v50 }
0x1f58   : > { %8048 = vmatpush3.bf16.msra.mxu1 %v8900_v26  ;;  %8070 = vmatpush3.bf16.msra.mxu0 %v8901_v20 }
0x1f59   : > { %8049 = vmatprep.subr.bf16.mxu1 %v8902_v21  ;;  %8071 = vmatprep.subr.bf16.mxu0 %v8903_v22 }
0x1f5c   : > { %8050 = vmatpush3.bf16.msra.mxu1 %v8904_v24  ;;  %8072 = vmatpush3.bf16.msra.mxu0 %v8905_v27 }
0x1f5d   : > { %8051 = vmatprep.subr.bf16.mxu1 %v8906_v28  ;;  %8073 = vmatprep.subr.bf16.mxu0 %v8907_v29 }
0x1f60   : > { %8052 = vmatpush3.bf16.msra.mxu1 %v8908_v30  ;;  %8074 = vmatpush3.bf16.msra.mxu0 %v8909_v32 }
0x1f61   : > { %8053 = vmatprep.subr.bf16.mxu1 %v8910_v33  ;;  %8075 = vmatprep.subr.bf16.mxu0 %v8911_v34 }
0x1f64   : > { %8054 = vmatpush3.bf16.msra.mxu1 %v8912_v35  ;;  %8076 = vmatpush3.bf16.msra.mxu0 %v8913_v37 }
0x1f65   : > { %8055 = vmatprep.subr.bf16.mxu1 %v8914_v38  ;;  %8077 = vmatprep.subr.bf16.mxu0 %v8915_v14 }
0x1f68   : > { %8056 = vmatpush3.bf16.msra.mxu1 %v8916_v40  ;;  %8078 = vmatpush3.bf16.msra.mxu0 %v8917_v7 }
0x1f69   : > { %8057 = vmatprep.subr.bf16.mxu1 %v8918_v42  ;;  %8079 = vmatprep.subr.bf16.mxu0 %v8919_v41 }
0x1f6c   : > { %8058 = vmatpush3.bf16.msra.mxu1 %v8920_v44  ;;  %8080 = vmatpush3.bf16.msra.mxu0 %v8921_v53 }
0x1f6d   : > { %8429 = vmatprep.subr.bf16.mxu0 %v9221_v3 }
0x200f   : > { %v4822_v54 = vpop.f32.mrf.mxu1  ;;  %v4863_v55 = vpop.f32.mrf.mxu0 }
0x2010   : > { %v4823_v56 = vadd.f32 %v4822_v54, %v4611_v47  ;;  %v4864_v57 = vadd.f32 %v4863_v55, %v4619_v48 }
0x2011   : > { %v4824_v58 = vpop.f32.mrf.mxu1  ;;  %v4865_v36 = vpop.f32.mrf.mxu0 }
0x2012   : > { %v4874_v60 = vmul.f32 0.044715, %v4823_v56  ;;  %v4876_v61 = vmul.f32 0.044715, %v4864_v57  ;;  %v4825_v62 = vadd.f32 %v4824_v58, %v4615_v51  ;;  %v4866_v0 = vadd.f32 %v4865_v36, %v4623_v52  ;;  %v7550_v52 = vld [vmem:[%s11169_s13 + $0x2] ss:$0 sm:$0xff] }
0x2013   : > { %v4826_v1 = vpop.f32.mrf.mxu1  ;;  %v4867_v2 = vpop.f32.mrf.mxu0  ;;  %v4870_v30 = vmul.f32 0.5, %v4823_v56  ;;  %v4872_v37 = vmul.f32 0.5, %v4864_v57 }
0x2014   : > { %v4878_v31 = vmul.f32 %v4874_v60, %v4823_v56  ;;  %v4880_v4 = vmul.f32 %v4876_v61, %v4864_v57  ;;  %v4875_v5 = vmul.f32 0.044715, %v4825_v62  ;;  %v4877_v6 = vmul.f32 0.044715, %v4866_v0  ;;  %v8922_v2 = vld [vmem:[%s11160_s4 + $0x2e8] ss:$12 sps:$4 sm:$0xff]  }
0x2015   : > { %v4827_v39 = vpop.f32.mrf.mxu1  ;;  %v4868_v9 = vpop.f32.mrf.mxu0  ;;  %v4871_v34 = vmul.f32 0.5, %v4825_v62  ;;  %v4873_v38 = vmul.f32 0.5, %v4866_v0 }
0x2016   : > { %v4882_v10 = vmul.f32 %v4878_v31, %v4823_v56  ;;  %v4884_v11 = vmul.f32 %v4880_v4, %v4864_v57  ;;  %v4879_v12 = vmul.f32 %v4875_v5, %v4825_v62  ;;  %v4881_v13 = vmul.f32 %v4877_v6, %v4866_v0  ;;  %v8924_v31 = vld [vmem:[%s11160_s4 + $0x2ec] ss:$12 sps:$4 sm:$0xff]   ;;  %v8925_v4 = vld [vmem:[%s11160_s4 + $0x2f0] ss:$12 sps:$4 sm:$0xff]   ;;  %v8928_v5 = vld [vmem:[%s11160_s4 + $0x2d4] ss:$12 sps:$4 sm:$0xff]  }
0x2017   : > { %5466 = vmatprep.subr.bf16.mxu1 %v8924_v31  ;;  %v8926_v6 = vld [vmem:[%s11160_s4 + $0x2d0] ss:$12 sps:$4 sm:$0xff]  }
0x2018   : > { %v4886_v16 = vadd.f32 %v4882_v10, %v4823_v56  ;;  %v4888_v17 = vadd.f32 %v4884_v11, %v4864_v57  ;;  %v4883_v18 = vmul.f32 %v4879_v12, %v4825_v62  ;;  %v4885_v19 = vmul.f32 %v4881_v13, %v4866_v0  ;;  %v8932_v12 = vld [vmem:[%s11160_s4 + $0x2bc] ss:$12 sps:$4 sm:$0xff]   ;;  %v8930_v13 = vld [vmem:[%s11160_s4 + $0x2b8] ss:$12 sps:$4 sm:$0xff]  }
0x201a   : > { %v4890_v63 = vmul.f32 0.7978846, %v4886_v16  ;;  %v4892_v50 = vmul.f32 0.7978846, %v4888_v17  ;;  %v4887_v26 = vadd.f32 %v4883_v18, %v4825_v62  ;;  %v4889_v20 = vadd.f32 %v4885_v19, %v4866_v0  ;;  %v8933_v16 = vld [vmem:[%s11160_s4 + $0x2c0] ss:$12 sps:$4 sm:$0xff]  }
0x201b   : > { %v8936_v17 = vld [vmem:[%s11160_s4 + $0x2a4] ss:$12 sps:$4 sm:$0xff]   ;;  %v8934_v18 = vld [vmem:[%s11160_s4 + $0x2a0] ss:$12 sps:$4 sm:$0xff]   ;;  %v8937_v19 = vld [vmem:[%s11160_s4 + $0x2a8] ss:$12 sps:$4 sm:$0xff]  }
0x201c   : > { %v4891_v21 = vmul.f32 0.7978846, %v4887_v26  ;;  %v4893_v22 = vmul.f32 0.7978846, %v4889_v20  ;;  %9118 = vtanh.f32 %v4890_v63  ;;  %v8940_v63 = vld [vmem:[%s11160_s4 + $0x28c] ss:$12 sps:$4 sm:$0xff]  }
0x201d   : > { %9120 = vtanh.f32 %v4892_v50  ;;  %v8938_v50 = vld [vmem:[%s11160_s4 + $0x288] ss:$12 sps:$4 sm:$0xff]   ;;  %v8941_v26 = vld [vmem:[%s11160_s4 + $0x290] ss:$12 sps:$4 sm:$0xff]  }
0x201e   : > { %9122 = vtanh.f32 %v4891_v21  ;;  %v8944_v20 = vld [vmem:[%s11160_s4 + $0x274] ss:$12 sps:$4 sm:$0xff]   ;;  %v8942_v21 = vld [vmem:[%s11160_s4 + $0x270] ss:$12 sps:$4 sm:$0xff]  }
0x201f   : > { %9124 = vtanh.f32 %v4893_v22  ;;  %v8945_v22 = vld [vmem:[%s11160_s4 + $0x278] ss:$12 sps:$4 sm:$0xff]  }
0x2029   : > { %v9119_v24 = vpop.eup %9118 }
0x202a   : > { %v9121_v27 = vpop.eup %9120  ;;  %v4898_v28 = vadd.f32 1.0, %v9119_v24  ;;  %v8948_v24 = vld [vmem:[%s11160_s4 + $0x25c] ss:$12 sps:$4 sm:$0xff]  }
0x202b   : > { %v9123_v29 = vpop.eup %9122  ;;  %v4900_v32 = vadd.f32 1.0, %v9121_v27  ;;  %v8946_v27 = vld [vmem:[%s11160_s4 + $0x258] ss:$12 sps:$4 sm:$0xff]  }
0x202c   : > { %v9125_v33 = vpop.eup %9124  ;;  %v4899_v35 = vadd.f32 1.0, %v9123_v29  ;;  %v4902_v40 = vmul.f32 %v4898_v28, %v4870_v30  ;;  %v8949_v28 = vld [vmem:[%s11160_s4 + $0x260] ss:$12 sps:$4 sm:$0xff]   ;;  %v8952_v29 = vld [vmem:[%s11160_s4 + $0x244] ss:$12 sps:$4 sm:$0xff]  }
0x202d   : > { %v4901_v14 = vadd.f32 1.0, %v9125_v33  ;;  %v4904_v42 = vmul.f32 %v4900_v32, %v4872_v37  ;;  %v8950_v30 = vld [vmem:[%s11160_s4 + $0x240] ss:$12 sps:$4 sm:$0xff]   ;;  %v8953_v32 = vld [vmem:[%s11160_s4 + $0x248] ss:$12 sps:$4 sm:$0xff]  }
0x202e   : > { %v4903_v7 = vmul.f32 %v4899_v35, %v4871_v34  ;;  %v4906_v46 = vpack.c.bf16 %v4902_v40, %v4902_v40  ;;  %v7586_v40 = vld [vmem:[%s11171_s15 + $0x2] ss:$0 sm:$0xff] }
0x202f   : > { %v4905_v41 = vmul.f32 %v4901_v14, %v4873_v38  ;;  %v4908_v47 = vpack.c.bf16 %v4904_v42, %v4904_v42  ;;  %v7585_v38 = vld [vmem:[%s11170_s14 + $0x2] ss:$0 sm:$0xff] }
0x2030   : > { %v4907_v44 = vpack.c.bf16 %v4903_v7, %v4903_v7 }
0x2031   : > { %v4909_v53 = vpack.c.bf16 %v4905_v41, %v4905_v41 }
0x2032   : > { %5207 = vmatprep.mubr.bf16.mxu1 %v4907_v44  ;;  %v7619_v44 = vld [vmem:[%s11161_s5 + $0x9] sm:$0x7] }
0x2033   : > { %5247 = vmatprep.mubr.bf16.mxu0 %v4909_v53  ;;  %5208 = vmatmul.mubr.bf16.vlgmr.msra.gmra.mxu1 %v4906_v46  ;;  %v5330_v53 = vrot.slane %v7619_v44, %v9471_v43 }
0x2034   : > { %5248 = vmatmul.mubr.bf16.vlgmr.msra.gmra.mxu0 %v4908_v47  ;;  %5498 = vmatprep.mubr.bf16.mxu1 %v9222_v25 }
0x2035   : > { %8445 = vmatprep.mubr.msk.bf16.mxu0 %vm9223_vm0, %v9221_v3  ;;  %8430 = vmatpush3.bf16.msra.mxu0 %v8925_v4 }
0x2036   : > { %5467 = vmatpush1.bf16.msra.mxu1 %v8922_v2  ;;  %8431 = vmatprep.subr.bf16.mxu0 %v9221_v3 }
0x2037   : > { %5468 = vmatprep.subr.bf16.mxu1 %v8928_v5  ;;  %v10798_v5 = vld [vmem:[%s9501_s23] ss:$0 sm:$0xff] }
0x203a   : > { %5469 = vmatpush1.bf16.msra.mxu1 %v8926_v6 }
0x203b   : > { %5470 = vmatprep.subr.bf16.mxu1 %v8932_v12 }
0x203e   : > { %5471 = vmatpush1.bf16.msra.mxu1 %v8930_v13 }
0x203f   : > { %5472 = vmatprep.subr.bf16.mxu1 %v8936_v17 }
0x2042   : > { %5473 = vmatpush1.bf16.msra.mxu1 %v8934_v18 }
0x2043   : > { %5474 = vmatprep.subr.bf16.mxu1 %v8940_v63 }
0x2046   : > { %5475 = vmatpush1.bf16.msra.mxu1 %v8938_v50 }
0x2047   : > { %5476 = vmatprep.subr.bf16.mxu1 %v8944_v20 }
0x204a   : > { %5477 = vmatpush1.bf16.msra.mxu1 %v8942_v21 }
0x204b   : > { %5478 = vmatprep.subr.bf16.mxu1 %v8948_v24 }
0x204e   : > { %5479 = vmatpush1.bf16.msra.mxu1 %v8946_v27 }
0x204f   : > { %5480 = vmatprep.subr.bf16.mxu1 %v8952_v29 }
0x2052   : > { %5481 = vmatpush1.bf16.msra.mxu1 %v8950_v30 }
0x2053   : > { %8449 = vmatprep.subr.bf16.mxu1 %v9221_v3 }
0x20f3   : > { %v8059_v48 = vpop.f32.mrf.mxu1 }
0x20f4   : > { %v8081_v51 = vpop.f32.mrf.mxu0 }
0x20f5   : > { %v8060_v54 = vpop.f32.mrf.mxu1 }
0x20f6   : > { %v8061_v55 = vadd.f32 %v8060_v54, %v8059_v48  ;;  %v8082_v56 = vpop.f32.mrf.mxu0 }
0x20f7   : > { %v8062_v57 = vpop.f32.mrf.mxu1  ;;  %v8083_v36 = vadd.f32 %v8082_v56, %v8081_v51 }
0x20f8   : > { %v5210_v58 = vadd.f32 %v8061_v55, %v7550_v52  ;;  %v8084_v60 = vpop.f32.mrf.mxu0  ;;  %v5334_v52 = vrot.slane %v7619_v44, %v9477_v45  ;;  %v5326_v57 = vrot.slane %v7619_v44, %v9481_v49 }
0x20f9   : > { %v8063_v61 = vpop.f32.mrf.mxu1 }
0x20fa   : > { %v5250_v62 = vadd.f32 %v8083_v36, %v5210_v58  ;;  %v8085_v0 = vpop.f32.mrf.mxu0 }
0x20fc   : > { %v5255_v1 = vadd.f32 %v5250_v62, %v10571_v8  ;;  %v8929_v8 = vld [vmem:[%s11160_s4 + $0x2d8] ss:$12 sps:$4 sm:$0xff]  }
0x20fd   : > { %8432 = vmatpush3.bf16.msra.mxu0 %v8929_v8 }
0x20fe   : > { %5260 = vadd.xlane.f32.xlu0 %v5255_v1  ;;  %8433 = vmatprep.subr.bf16.mxu0 %v9221_v3 }
0x2101   : > { %8434 = vmatpush3.bf16.msra.mxu0 %v8933_v16 }
0x2102   : > { %8435 = vmatprep.subr.bf16.mxu0 %v9221_v3 }
0x2105   : > { %8436 = vmatpush3.bf16.msra.mxu0 %v8937_v19 }
0x2106   : > { %8437 = vmatprep.subr.bf16.mxu0 %v9221_v3 }
0x2109   : > { %8438 = vmatpush3.bf16.msra.mxu0 %v8941_v26 }
0x210a   : > { %8439 = vmatprep.subr.bf16.mxu0 %v9221_v3 }
0x210d   : > { %8440 = vmatpush3.bf16.msra.mxu0 %v8945_v22 }
0x210e   : > { %8441 = vmatprep.subr.bf16.mxu0 %v9221_v3 }
0x2111   : > { %8442 = vmatpush3.bf16.msra.mxu0 %v8949_v28 }
0x2112   : > { %8443 = vmatprep.subr.bf16.mxu0 %v9221_v3 }
0x2115   : > { %8444 = vmatpush3.bf16.msra.mxu0 %v8953_v32 }
0x2116   : > { %8473 = vmatprep.subr.bf16.mxu0 %v9221_v3 }
0x2187   : > { %v5261_v39 = vpop.xlane.xlu0 %5260 }
0x2188   : > { %v5262_v9 = vmul.f32 0.0078125, %v5261_v39 }
0x218a   : > { %v5263_v10 = vsub.f32 %v5255_v1, %v5262_v9 }
0x218c   : > { %v5264_v11 = vmul.f32 %v5263_v10, %v5263_v10 }
0x218e   : > { %5265 = vadd.xlane.f32.xlu0 %v5264_v11 }
0x2217   : > { %v5266_v33 = vpop.xlane.xlu0 %5265 }
0x2218   : > { %v5267_v34 = vmul.f32 0.0078125, %v5266_v33 }
0x221a   : > { %v5268_v35 = vadd.f32 1e-12, %v5267_v34 }
0x221c   : > { %9126 = vrsqrt.f32 %v5268_v35 }
0x2229   : > { %v9127_v37 = vpop.eup %9126 }
0x222a   : > { %v5270_v14 = vmul.f32 %v9127_v37, %v5263_v10 }
0x222c   : > { %v5277_v7 = vmul.f32 %v7585_v38, %v5270_v14 }
0x222e   : > { %v10773_v42 = vadd.f32 %v7586_v40, %v5277_v7 }
0x2230   : > { %v5286_v41 = vpack.c.bf16 %v10773_v42, %v10773_v42 }
0x2232   : > { %5499 = vmatmul.mubr.bf16.vlgmr.msra.gmra.mxu1 %v5286_v41  ;;  %8446 = vmatmul.mubr.bf16.vlgmr.msra.gmra.mxu0 %v5286_v41 }
0x2233   : > { %8451 = vmatprep.mubr.msk.bf16.mxu1 %vm9223_vm0, %v9221_v3  ;;  %8475 = vmatprep.mubr.msk.bf16.mxu0 %vm9223_vm0, %v9221_v3 }
0x22f2   : > { %v5500_v46 = vpop.f32.mrf.mxu1  ;;  %v5541_v47 = vpop.f32.mrf.mxu0 }
0x22f3   : > { %v5542_v61 = vadd.f32 %v5541_v47, %v5334_v52  ;;  %v5501_v0 = vadd.f32 %v5500_v46, %v5326_v57 }
0x22f4   : > { %v5502_v48 = vpop.f32.mrf.mxu1  ;;  %v8447_v51 = vpop.f32.mrf.mxu0 }
0x22f5   : > { %v5503_v54 = vadd.f32 %v5502_v48, %v5330_v53  ;;  %v10789_v1 = vpack.c.bf16 %v5542_v61, %v5542_v61  ;;  %v5547_v2 = vpack.c.bf16 %v5501_v0, %v5501_v0 }
0x22f6   : > { %v5504_v55 = vpop.f32.mrf.mxu1  ;;  %v5544_v56 = vpop.f32.mrf.mxu0 }
0x22f7   : > { %v5548_v58 = vpack.c.bf16 %v5503_v54, %v5503_v54  ;;  %v5612_v31 = vsel %vm893_vm2, %v10789_v1, 0 }
0x22f8   : > { %v5505_v36 = vpop.f32.mrf.mxu1  ;;  %v8448_v60 = vpop.f32.mrf.mxu0 }
0x22f9   : > { %v5554_v62 = vsel %vm830_vm1, %v5548_v58, 0 }
0x22fa   : > { %8450 = vmatpush3.bf16.xpose.msra.mxu1 %v5554_v62 }
0x22fb   : > { %8455 = vmatprep.subr.bf16.mxu1 %v9221_v3 }
0x2301   : > { %8452 = vmatmul.mubr.msk.bf16.vlgmr.msra.gmra.mxu1 %vm830_vm1, %v5547_v2 }
0x2302   : > { %8456 = vmatpush3.bf16.msra.mxu1 %v5612_v31  ;;  %8457 = vmatprep.mubr.msk.bf16.mxu1 %vm9223_vm0, %v9221_v3 }
0x2303   : > { %8461 = vmatprep.subr.bf16.mxu1 %v9221_v3 }
0x23c1   : > { %v5590_v4 = vpop.f32.mrf.mxu1 }
0x23c2   : > { %v5591_v8 = vadd.f32 %v10798_v5, %v5590_v4 }
0x23c3   : > { %v8453_v6 = vpop.f32.mrf.mxu1 }
0x23c4   : > { %v5596_v39 = vsel %vm877_vm3, %v5591_v8, -inf }
0x23c5   : > { %5597 = vmax.xlane.f32.xlu0 %v5596_v39  ;;  %v5593_v9 = vpop.f32.mrf.mxu1 }
0x23c7   : > { %v8454_v10 = vpop.f32.mrf.mxu1 }
0x23db   : > { %5658 = vrot.lane.b32.xlu0 %v5548_v58, %s11203_s20 }
0x23df   : > { %5879 = vrot.lane.b32.xlu0 %v5548_v58, %s11204_s18 }
0x244e   : > { %v5598_v11 = vpop.xlane.xlu0 %5597 }
0x244f   : > { %v5599_v12 = vsub.f32 %v5591_v8, %v5598_v11 }
0x2451   : > { %v5600_v13 = vmul.f32 1.442695, %v5599_v12 }
0x2452   : > { %v5659_v63 = vpop.permute.xlu0 %5658 }
0x2453   : > { %9128 = vpow2.f32 %v5600_v13  ;;  %v5664_v29 = vsel %vm830_vm1, %v5659_v63, 0 }
0x2456   : > { %v5880_v21 = vpop.permute.xlu0 %5879 }
0x2457   : > { %v5885_v27 = vsel %vm830_vm1, %v5880_v21, 0 }
0x2460   : > { %v9129_v16 = vpop.eup %9128 }
0x2461   : > { %v5602_v17 = vsel %vm877_vm3, %v9129_v16, 0.0 }
0x2462   : > { %5603 = vadd.xlane.f32.xlu1 %v5602_v17 }
0x2473   : > { %5655 = vrot.lane.b32.xlu1 %v5547_v2, %s11203_s20 }
0x2477   : > { %5769 = vrot.lane.b32.xlu1 %v5548_v58, %s11205_s17 }
0x247b   : > { %5767 = vrot.lane.b32.xlu1 %v5547_v2, %s11205_s17 }
0x247f   : > { %5877 = vrot.lane.b32.xlu1 %v5547_v2, %s11204_s18 }
0x24eb   : > { %v5604_v18 = vpop.xlane.xlu1 %5603 }
0x24ec   : > { %9130 = vrcp.f32 %v5604_v18 }
0x24ef   : > { %v5656_v19 = vpop.permute.xlu1 %5655 }
0x24f3   : > { %v5770_v50 = vpop.permute.xlu1 %5769 }
0x24f4   : > { %v5775_v26 = vsel %vm830_vm1, %v5770_v50, 0 }
0x24f5   : > { %8474 = vmatpush3.bf16.xpose.msra.mxu0 %v5775_v26 }
0x24f6   : > { %8485 = vmatprep.subr.bf16.mxu0 %v9221_v3 }
0x24f7   : > { %v5768_v24 = vpop.permute.xlu1 %5767 }
0x24f9   : > { %v9131_v20 = vpop.eup %9130 }
0x24fa   : > { %v5606_v22 = vmul.f32 %v9131_v20, %v9129_v16 }
0x24fb   : > { %v5878_v30 = vpop.permute.xlu1 %5877 }
0x24fc   : > { %v5607_v28 = vpack.c.bf16 %v5606_v22, %v5606_v22  ;;  %8476 = vmatmul.mubr.msk.bf16.vlgmr.msra.gmra.mxu0 %vm830_vm1, %v5768_v24 }
0x24fd   : > { %8486 = vmatpush3.bf16.xpose.msra.mxu0 %v5885_v27  ;;  %8487 = vmatprep.mubr.msk.bf16.mxu0 %vm9223_vm0, %v9221_v3 }
0x24fe   : > { %8458 = vmatmul.mubr.msk.bf16.vlgmr.msra.gmra.mxu1 %vm877_vm3, %v5607_v28  ;;  %8497 = vmatprep.subr.bf16.mxu0 %v9221_v3 }
0x24ff   : > { %8462 = vmatpush3.bf16.xpose.msra.mxu1 %v5664_v29  ;;  %8463 = vmatprep.mubr.msk.bf16.mxu1 %vm9223_vm0, %v9221_v3 }
0x2500   : > { %8467 = vmatprep.subr.bf16.mxu1 %v9221_v3 }
0x2504   : > { %8488 = vmatmul.mubr.msk.bf16.vlgmr.msra.gmra.mxu0 %vm830_vm1, %v5878_v30 }
0x2505   : > { %8513 = vmatprep.mubr.msk.bf16.mxu0 %vm9223_vm0, %v9221_v3 }
0x2506   : > { %8464 = vmatmul.mubr.msk.bf16.vlgmr.msra.gmra.mxu1 %vm830_vm1, %v5656_v19 }
0x2507   : > { %8469 = vmatprep.mubr.msk.bf16.mxu1 %vm9223_vm0, %v9221_v3 }
0x25bc   : > { %v5811_v32 = vpop.f32.mrf.mxu0 }
0x25bd   : > { %v5812_v33 = vadd.f32 %v10798_v5, %v5811_v32  ;;  %v8954_v32 = vld [vmem:[%s11162_s6 + $0xf8] sm:$0xff]  }
0x25be   : > { %v10828_v34 = vpop.f32.mrf.mxu1  ;;  %v8477_v35 = vpop.f32.mrf.mxu0  ;;  %8498 = vmatpush3.bf16.msra.mxu0 %v8954_v32  ;;  %v8989_v32 = vld [vmem:[%s11166_s10 + $0x368] ss:$16 sps:$4 sm:$0xff]  }
0x25bf   : > { %v5817_v37 = vsel %vm877_vm3, %v5812_v33, -inf  ;;  %8499 = vmatprep.subr.bf16.mxu0 %v9221_v3  ;;  %v8956_v35 = vld [vmem:[%s11162_s6 + $0xe8] sm:$0xff]  }
0x25c0   : > { %5818 = vmax.xlane.f32.xlu1 %v5817_v37  ;;  %v8459_v38 = vpop.f32.mrf.mxu1  ;;  %v5814_v14 = vpop.f32.mrf.mxu0  ;;  %v8957_v37 = vld [vmem:[%s11162_s6 + $0xe0] sm:$0xff]  }
0x25c1   : > { %v8958_v38 = vld [vmem:[%s11162_s6 + $0xd8] sm:$0xff]   ;;  %v8959_v14 = vld [vmem:[%s11162_s6 + $0xd0] sm:$0xff]  }
0x25c2   : > { %v5651_v40 = vpop.f32.mrf.mxu1  ;;  %v8478_v7 = vpop.f32.mrf.mxu0 }
0x25c3   : > { %v8960_v40 = vld [vmem:[%s11162_s6 + $0xc8] sm:$0xff]  }
0x25c4   : > { %v8460_v41 = vpop.f32.mrf.mxu1  ;;  %v5921_v44 = vpop.f32.mrf.mxu0 }
0x25c5   : > { %v5922_v52 = vadd.f32 %v10798_v5, %v5921_v44  ;;  %v8961_v44 = vld [vmem:[%s11162_s6 + $0xc0] sm:$0xff]  }
0x25c6   : > { %v5700_v53 = vpop.f32.mrf.mxu1  ;;  %v8489_v46 = vpop.f32.mrf.mxu0 }
0x25c7   : > { %v5701_v47 = vadd.f32 %v10798_v5, %v5700_v53  ;;  %v5927_v58 = vsel %vm877_vm3, %v5922_v52, -inf }
0x25c8   : > { %v8465_v48 = vpop.f32.mrf.mxu1  ;;  %v5924_v51 = vpop.f32.mrf.mxu0 }
0x25c9   : > { %v5706_v54 = vsel %vm877_vm3, %v5701_v47, -inf }
0x25ca   : > { %v8490_v55 = vpop.f32.mrf.mxu0  ;;  %5707 = vmax.xlane.f32.xlu0 %v5706_v54  ;;  %v5703_v56 = vpop.f32.mrf.mxu1 }
0x25cc   : > { %v8466_v57 = vpop.f32.mrf.mxu1 }
0x25ce   : > { %5928 = vmax.xlane.f32.xlu0 %v5927_v58 }
0x2649   : > { %v5819_v36 = vpop.xlane.xlu1 %5818 }
0x264a   : > { %v5820_v60 = vsub.f32 %v5812_v33, %v5819_v36  ;;  %v8955_v33 = vld [vmem:[%s11162_s6 + $0xf0] sm:$0xff]  }
0x264b   : > { %8500 = vmatpush3.bf16.msra.mxu0 %v8955_v33  ;;  %v8994_v33 = vld [vmem:[%s11166_s10 + $0x344] ss:$16 sps:$4 sm:$0xff]  }
0x264c   : > { %v5821_v61 = vmul.f32 1.442695, %v5820_v60  ;;  %8501 = vmatprep.subr.bf16.mxu0 %v9221_v3 }
0x264e   : > { %9132 = vpow2.f32 %v5821_v61 }
0x264f   : > { %8502 = vmatpush3.bf16.msra.mxu0 %v8956_v35  ;;  %v8997_v35 = vld [vmem:[%s11166_s10 + $0x34c] ss:$16 sps:$4 sm:$0xff]  }
0x2650   : > { %8503 = vmatprep.subr.bf16.mxu0 %v9221_v3 }
0x2653   : > { %v5708_v62 = vpop.xlane.xlu0 %5707  ;;  %8504 = vmatpush3.bf16.msra.mxu0 %v8957_v37  ;;  %v8992_v37 = vld [vmem:[%s11166_s10 + $0x340] ss:$16 sps:$4 sm:$0xff]  }
0x2654   : > { %v5709_v0 = vsub.f32 %v5701_v47, %v5708_v62  ;;  %8505 = vmatprep.subr.bf16.mxu0 %v9221_v3 }
0x2656   : > { %v5710_v2 = vmul.f32 1.442695, %v5709_v0 }
0x2657   : > { %v5929_v31 = vpop.xlane.xlu0 %5928  ;;  %8506 = vmatpush3.bf16.msra.mxu0 %v8958_v38  ;;  %v8995_v38 = vld [vmem:[%s11166_s10 + $0x348] ss:$16 sps:$4 sm:$0xff]  }
0x2658   : > { %9134 = vpow2.f32 %v5710_v2  ;;  %v5930_v4 = vsub.f32 %v5922_v52, %v5929_v31  ;;  %8507 = vmatprep.subr.bf16.mxu0 %v9221_v3  ;;  %v7669_v2 = vld [vmem:[%s11163_s7 + $0x3] ss:$0 sm:$0xff] }
0x265a   : > { %v5931_v5 = vmul.f32 1.442695, %v5930_v4 }
0x265b   : > { %v9133_v8 = vpop.eup %9132  ;;  %8508 = vmatpush3.bf16.msra.mxu0 %v8959_v14  ;;  %v9000_v14 = vld [vmem:[%s11166_s10 + $0x324] ss:$16 sps:$4 sm:$0xff]  }
0x265c   : > { %9136 = vpow2.f32 %v5931_v5  ;;  %v5823_v6 = vsel %vm877_vm3, %v9133_v8, 0.0  ;;  %8509 = vmatprep.subr.bf16.mxu0 %v9221_v3 }
0x265d   : > { %5824 = vadd.xlane.f32.xlu0 %v5823_v6 }
0x265f   : > { %8510 = vmatpush3.bf16.msra.mxu0 %v8960_v40  ;;  %v9003_v40 = vld [vmem:[%s11166_s10 + $0x32c] ss:$16 sps:$4 sm:$0xff]  }
0x2660   : > { %8511 = vmatprep.subr.bf16.mxu0 %v9221_v3 }
0x2663   : > { %8512 = vmatpush3.bf16.msra.mxu0 %v8961_v44  ;;  %v9006_v44 = vld [vmem:[%s11166_s10 + $0x304] ss:$16 sps:$4 sm:$0xff]  }
0x2665   : > { %v9135_v39 = vpop.eup %9134 }
0x2666   : > { %v5712_v9 = vsel %vm877_vm3, %v9135_v39, 0.0 }
0x2667   : > { %5713 = vadd.xlane.f32.xlu0 %v5712_v9  ;;  %v8965_v9 = vld [vmem:[%s11166_s10 + $0x3e8] ss:$16 sps:$4 sm:$0xff]  }
0x2669   : > { %v9137_v10 = vpop.eup %9136 }
0x266a   : > { %v5933_v11 = vsel %vm877_vm3, %v9137_v10, 0.0 }
0x266b   : > { %5934 = vadd.xlane.f32.xlu1 %v5933_v11  ;;  %v8970_v11 = vld [vmem:[%s11166_s10 + $0x3c4] ss:$16 sps:$4 sm:$0xff]  }
0x267c   : > { %5829 = vrot.lane.b32.xlu1 %v10789_v1, %s11205_s17 }
0x267d   : > { %5719 = vrot.lane.b32.xlu0 %v10789_v1, %s11203_s20 }
0x2680   : > { %5939 = vrot.lane.b32.xlu1 %v10789_v1, %s11204_s18 }
0x26e6   : > { %v5825_v12 = vpop.xlane.xlu0 %5824 }
0x26f0   : > { %v5714_v13 = vpop.xlane.xlu0 %5713 }
0x26f1   : > { %9138 = vrcp.f32 %v5714_v13  ;;  %v8968_v13 = vld [vmem:[%s11166_s10 + $0x3c0] ss:$16 sps:$4 sm:$0xff]  }
0x26f2   : > { %9140 = vrcp.f32 %v5825_v12  ;;  %v8973_v12 = vld [vmem:[%s11166_s10 + $0x3cc] ss:$16 sps:$4 sm:$0xff]  }
0x26f4   : > { %v5720_v16 = vpop.permute.xlu0 %5719  ;;  %v5935_v18 = vpop.xlane.xlu1 %5934 }
0x26f5   : > { %v5725_v17 = vsel %vm893_vm2, %v5720_v16, 0  ;;  %9142 = vrcp.f32 %v5935_v18  ;;  %v8971_v16 = vld [vmem:[%s11166_s10 + $0x3c8] ss:$16 sps:$4 sm:$0xff]  }
0x26f6   : > { %8468 = vmatpush3.bf16.msra.mxu1 %v5725_v17 }
0x26f7   : > { %8479 = vmatprep.subr.bf16.mxu1 %v9221_v3 }
0x26f8   : > { %v5830_v50 = vpop.permute.xlu1 %5829 }
0x26f9   : > { %v5835_v21 = vsel %vm893_vm2, %v5830_v50, 0  ;;  %v8976_v50 = vld [vmem:[%s11166_s10 + $0x3a4] ss:$16 sps:$4 sm:$0xff]  }
0x26fc   : > { %v5940_v22 = vpop.permute.xlu1 %5939 }
0x26fd   : > { %v5945_v28 = vsel %vm893_vm2, %v5940_v22, 0  ;;  %v8985_v22 = vld [vmem:[%s11166_s10 + $0x38c] ss:$16 sps:$4 sm:$0xff]  }
0x26fe   : > { %v9139_v19 = vpop.eup %9138 }
0x26ff   : > { %v5716_v63 = vmul.f32 %v9139_v19, %v9135_v39  ;;  %v9141_v20 = vpop.eup %9140  ;;  %v8962_v39 = vld [vmem:[%s11166_s10 + $0x3e0] ss:$16 sps:$4 sm:$0xff]  }
0x2700   : > { %v5827_v1 = vmul.f32 %v9141_v20, %v9133_v8  ;;  %v8974_v20 = vld [vmem:[%s11166_s10 + $0x3a0] ss:$16 sps:$4 sm:$0xff]  }
0x2701   : > { %v5717_v26 = vpack.c.bf16 %v5716_v63, %v5716_v63 }
0x2702   : > { %v5828_v24 = vpack.c.bf16 %v5827_v1, %v5827_v1  ;;  %v9143_v27 = vpop.eup %9142  ;;  %v8982_v1 = vld [vmem:[%s11166_s10 + $0x384] ss:$16 sps:$4 sm:$0xff]  }
0x2703   : > { %8470 = vmatmul.mubr.msk.bf16.vlgmr.msra.gmra.mxu1 %vm877_vm3, %v5717_v26  ;;  %v5937_v29 = vmul.f32 %v9143_v27, %v9137_v10  ;;  %v8967_v10 = vld [vmem:[%s11166_s10 + $0x3ec] ss:$16 sps:$4 sm:$0xff]   ;;  %v8983_v27 = vld [vmem:[%s11166_s10 + $0x388] ss:$16 sps:$4 sm:$0xff]  }
0x2704   : > { %8480 = vmatpush3.bf16.msra.mxu1 %v5835_v21  ;;  %8481 = vmatprep.mubr.msk.bf16.mxu1 %vm9223_vm0, %v9221_v3  ;;  %v8979_v26 = vld [vmem:[%s11166_s10 + $0x3ac] ss:$16 sps:$4 sm:$0xff]   ;;  %v8977_v21 = vld [vmem:[%s11166_s10 + $0x3a8] ss:$16 sps:$4 sm:$0xff]  }
0x2705   : > { %8491 = vmatprep.subr.bf16.mxu1 %v9221_v3  ;;  %v5938_v30 = vpack.c.bf16 %v5937_v29, %v5937_v29  ;;  %6404 = vmatprep.subr.bf16.mxu0 %v8967_v10  ;;  %v8991_v29 = vld [vmem:[%s11166_s10 + $0x36c] ss:$16 sps:$4 sm:$0xff]   ;;  %v9024_v10 = vld [vmem:[%s11168_s12 + $0x320] sm:$0xff]  }
0x270b   : > { %8482 = vmatmul.mubr.msk.bf16.vlgmr.msra.gmra.mxu1 %vm877_vm3, %v5828_v24  ;;  %v8980_v24 = vld [vmem:[%s11166_s10 + $0x380] ss:$16 sps:$4 sm:$0xff]  }
0x270c   : > { %8492 = vmatpush3.bf16.msra.mxu1 %v5945_v28  ;;  %8493 = vmatprep.mubr.msk.bf16.mxu1 %vm9223_vm0, %v9221_v3  ;;  %v8988_v28 = vld [vmem:[%s11166_s10 + $0x364] ss:$16 sps:$4 sm:$0xff]  }
0x2713   : > { %8494 = vmatmul.mubr.msk.bf16.vlgmr.msra.gmra.mxu1 %vm877_vm3, %v5938_v30  ;;  %v8986_v30 = vld [vmem:[%s11166_s10 + $0x360] ss:$16 sps:$4 sm:$0xff]  }
0x2714   : > { %6395 = vmatprep.mubr.bf16.mxu1 %v9222_v25 }
0x27c3   : > { %v5761_v7 = vpop.f32.mrf.mxu1 }
0x27c4   : > { %5988 = vrot.lane.b32.xlu1 %v5761_v7, %s11204_s18  ;;  %v8998_v7 = vld [vmem:[%s11166_s10 + $0x320] ss:$16 sps:$4 sm:$0xff]   ;;  %s7850_s18 = sshll.u32 %s9334_s25, 7  ;;  %s9163_s25 = sshll.u32 %s9227_s1, 4  ;;  %s9164_s25 = int_to_ptr.vmem [resolvable:$false] %s9163_s25 }
0x27c5   : > { %v8471_v41 = vpop.f32.mrf.mxu1  ;;  %s6874_s26 = scalar_lea.hbm %s11206_s3, %s7850_s18 }
0x27c6   : > { %v9001_v41 = vld [vmem:[%s11166_s10 + $0x328] ss:$16 sps:$4 sm:$0xff]  }
0x27c7   : > { %v5764_v53 = vpop.f32.mrf.mxu1 }
0x27c8   : > { %v9009_v53 = vld [vmem:[%s11166_s10 + $0x30c] ss:$16 sps:$4 sm:$0xff]  }
0x27c9   : > { %v8472_v46 = vpop.f32.mrf.mxu1 }
0x27ca   : > { %v9004_v46 = vld [vmem:[%s11166_s10 + $0x300] ss:$16 sps:$4 sm:$0xff]  }
0x27cb   : > { %v5871_v47 = vpop.f32.mrf.mxu1 }
0x27cc   : > { %5992 = vrot.lane.b32.xlu0 %v5871_v47, %s11205_s17  ;;  %v9007_v47 = vld [vmem:[%s11166_s10 + $0x308] ss:$16 sps:$4 sm:$0xff]   ;;  %s523_s17 = scalar_lea.vmem [#allocation2], %s6948_s29  ;;  %s9165_s29 = scalar_lea.vmem %s9164_s25, 256 }
0x27cd   : > { %v8483_v48 = vpop.f32.mrf.mxu1 }
0x27cf   : > { %v5874_v51 = vpop.f32.mrf.mxu1 }
0x27d1   : > { %v8484_v52 = vpop.f32.mrf.mxu1 }
0x27d3   : > { %v5981_v54 = vpop.f32.mrf.mxu1 }
0x27d4   : > { %5996 = vrot.lane.b32.xlu1 %v5981_v54, %s11203_s20  ;;  %s6876_s20 = sshll.u32 %s523_s17, 4  ;;  %s6877_s20 = int_to_ptr.vmem [resolvable:$true] %s6876_s20 }
0x27d5   : > { %v8495_v55 = vpop.f32.mrf.mxu1  ;;  %s9159_s16 = scalar_lea.vmem %s6877_s20, 128  ;;  %p9166_p0 = scmp.lt.s32.totalorder %s6877_s20, %s9164_s25 }
0x27d6   : > { %v7680_v55 = vld [vmem:[%s11164_s8 + $0x3] ss:$0 sm:$0xff]  ;;  %p9160_p11 = scmp.ne.s32.totalorder %s6877_s20, %s9159_s16  ;;  %p9167_p1 = scmp.lt.s32.totalorder %s9165_s29, %s9159_s16 }
0x27d7   : > { %v5984_v56 = vpop.f32.mrf.mxu1 }
0x27d8   : > { %p9161_p12 = pnand %p9160_p11, %p9351_p5  ;;  %p9168_p2 = por %p9167_p1, %p9166_p0 }
0x27d9   : > { %v8496_v57 = vpop.f32.mrf.mxu1 }
0x27da   : > { %v7681_v57 = vld [vmem:[%s11165_s9 + $0x3] ss:$0 sm:$0xff]  ;;  %p9162_p13 = pneg %p9161_p12 }
0x27dc   : > { %p9169_p3 = pnand %p9168_p2, %p9162_p13 }
0x2836   : > { %v5989_v3 = vpop.permute.xlu1 %5988 }
0x2837   : > { %v5999_v36 = vsel %vm830_vm1, %v10828_v34, %v5989_v3 }
0x283e   : > { %v5993_v58 = vpop.permute.xlu0 %5992 }
0x283f   : > { %v6000_v60 = vsel %vm1283_vm4, %v5999_v36, %v5993_v58 }
0x2846   : > { %v5997_v61 = vpop.permute.xlu1 %5996 }
0x2847   : > { %v6001_v62 = vsel %vm1285_vm5, %v6000_v60, %v5997_v61  ;;  %v9010_v60 = vld [vmem:[%s11168_s12 + $0x378] sm:$0xff]  }
0x2848   : > { %v6002_v0 = vpack.c.bf16 %v6001_v62, %v6001_v62  ;;  %v9011_v61 = vld [vmem:[%s11168_s12 + $0x3f8] sm:$0xff]  }
0x2849   : > { %v9012_v62 = vld [vmem:[%s11168_s12 + $0x338] sm:$0xff]  }
0x284a   : > { %8514 = vmatmul.mubr.bf16.vlgmr.msra.gmra.mxu0 %v6002_v0  ;;  %v9013_v0 = vld [vmem:[%s11168_s12 + $0x3b8] sm:$0xff]  }
0x284b   : > { %6436 = vmatprep.mubr.bf16.mxu0 %v9222_v25  ;;  %v8964_v25 = vld [vmem:[%s11166_s10 + $0x3e4] ss:$16 sps:$4 sm:$0xff]   ;;  %6405 = vmatpush1.bf16.msra.mxu0 %v8965_v9 }
0x284c   : > { %6363 = vmatprep.subr.bf16.mxu1 %v8964_v25  ;;  %6406 = vmatprep.subr.bf16.mxu0 %v8973_v12  ;;  %v9022_v25 = vld [vmem:[%s11168_s12 + $0x360] sm:$0xff]   ;;  %v9026_v12 = vld [vmem:[%s11168_s12 + $0x358] sm:$0xff]  }
0x284d   : > { %6364 = vmatpush1.bf16.msra.mxu1 %v8962_v39  ;;  %v9021_v39 = vld [vmem:[%s11168_s12 + $0x3a8] sm:$0xff]   ;;  %v9023_v9 = vld [vmem:[%s11168_s12 + $0x3e0] sm:$0xff]  }
0x284e   : > { %6365 = vmatprep.subr.bf16.mxu1 %v8970_v11  ;;  %v9025_v11 = vld [vmem:[%s11168_s12 + $0x3a0] sm:$0xff]  }
0x284f   : > { %6407 = vmatpush1.bf16.msra.mxu0 %v8971_v16  ;;  %v9028_v16 = vld [vmem:[%s11168_s12 + $0x318] sm:$0xff]  }
0x2850   : > { %6408 = vmatprep.subr.bf16.mxu0 %v8979_v26  ;;  %v9034_v26 = vld [vmem:[%s11168_s12 + $0x348] sm:$0xff]  }
0x2851   : > { %6366 = vmatpush1.bf16.msra.mxu1 %v8968_v13  ;;  %v9027_v13 = vld [vmem:[%s11168_s12 + $0x3d8] sm:$0xff]  }
0x2852   : > { %6367 = vmatprep.subr.bf16.mxu1 %v8976_v50  ;;  %v9033_v50 = vld [vmem:[%s11168_s12 + $0x390] sm:$0xff]  }
0x2853   : > { %6409 = vmatpush1.bf16.msra.mxu0 %v8977_v21  ;;  %v9036_v21 = vld [vmem:[%s11168_s12 + $0x308] sm:$0xff]  }
0x2854   : > { %6410 = vmatprep.subr.bf16.mxu0 %v8985_v22  ;;  %v9038_v22 = vld [vmem:[%s11168_s12 + $0x340] sm:$0xff]  }
0x2855   : > { %6368 = vmatpush1.bf16.msra.mxu1 %v8974_v20  ;;  %v9035_v20 = vld [vmem:[%s11168_s12 + $0x3c8] sm:$0xff]  }
0x2856   : > { %6369 = vmatprep.subr.bf16.mxu1 %v8982_v1  ;;  %v9037_v1 = vld [vmem:[%s11168_s12 + $0x388] sm:$0xff]  }
0x2857   : > { %6411 = vmatpush1.bf16.msra.mxu0 %v8983_v27  ;;  %v9040_v27 = vld [vmem:[%s11168_s12 + $0x300] sm:$0xff]  }
0x2858   : > { %6412 = vmatprep.subr.bf16.mxu0 %v8991_v29  ;;  %v7714_v29 = vld [vmem:[%s11167_s11 + $0xc] sm:$0xf] }
0x2859   : > { %6370 = vmatpush1.bf16.msra.mxu1 %v8980_v24  ;;  %v9039_v24 = vld [vmem:[%s11168_s12 + $0x3c0] sm:$0xff]  }
0x285a   : > { %6371 = vmatprep.subr.bf16.mxu1 %v8988_v28  ;;  %v9041_v28 = vld [vmem:[%s11168_s12 + $0x380] sm:$0xff]  }
0x285b   : > { %6413 = vmatpush1.bf16.msra.mxu0 %v8989_v32  ;;  %v6194_v32 = vrot.slane %v7714_v29, %v9477_v45 }
0x285c   : > { %6414 = vmatprep.subr.bf16.mxu0 %v8997_v35 }
0x285d   : > { %6372 = vmatpush1.bf16.msra.mxu1 %v8986_v30  ;;  %v6186_v30 = vrot.slane %v7714_v29, %v9481_v49 }
0x285e   : > { %6373 = vmatprep.subr.bf16.mxu1 %v8994_v33  ;;  %v6190_v33 = vrot.slane %v7714_v29, %v9471_v43 }
0x285f   : > { %6415 = vmatpush1.bf16.msra.mxu0 %v8995_v38  ;;  %v6198_v38 = vrot.slane %v7714_v29, %v9811_v23 }
0x2860   : > { %6416 = vmatprep.subr.bf16.mxu0 %v9003_v40 }
0x2861   : > { %6374 = vmatpush1.bf16.msra.mxu1 %v8992_v37 }
0x2862   : > { %6375 = vmatprep.subr.bf16.mxu1 %v9000_v14 }
0x2863   : > { %6417 = vmatpush1.bf16.msra.mxu0 %v9001_v41 }
0x2864   : > { %6418 = vmatprep.subr.bf16.mxu0 %v9009_v53 }
0x2865   : > { %6376 = vmatpush1.bf16.msra.mxu1 %v8998_v7 }
0x2866   : > { %6377 = vmatprep.subr.bf16.mxu1 %v9006_v44 }
0x2867   : > { %6419 = vmatpush1.bf16.msra.mxu0 %v9007_v47 }
0x2868   : > { %8143 = vmatprep.subr.bf16.mxu0 %v9011_v61 }
0x2869   : > { %6378 = vmatpush1.bf16.msra.mxu1 %v9004_v46 }
0x286a   : > { %8121 = vmatprep.subr.bf16.mxu1 %v9010_v60 }
0x290a   : > { %v6110_v31 = vpop.f32.mrf.mxu0 }
0x290b   : > { %v6111_v4 = vadd.f32 %v7669_v2, %v6110_v31  ;;  %v9014_v2 = vld [vmem:[%s11168_s12 + $0x370] sm:$0xff]  }
0x290c   : > { %v8515_v5 = vpop.f32.mrf.mxu0  ;;  %v9015_v31 = vld [vmem:[%s11168_s12 + $0x3f0] sm:$0xff]  }
0x290d   : > { %v6116_v8 = vadd.f32 %v6111_v4, %v10773_v42  ;;  %v9016_v4 = vld [vmem:[%s11168_s12 + $0x330] sm:$0xff]  }
0x290e   : > { %v6113_v6 = vpop.f32.mrf.mxu0  ;;  %v9017_v5 = vld [vmem:[%s11168_s12 + $0x3b0] sm:$0xff]  }
0x290f   : > { %6121 = vadd.xlane.f32.xlu0 %v6116_v8  ;;  %v9019_v6 = vld [vmem:[%s11168_s12 + $0x3e8] sm:$0xff]  }
0x2910   : > { %v8516_v34 = vpop.f32.mrf.mxu0 }
0x2911   : > { %v9020_v34 = vld [vmem:[%s11168_s12 + $0x328] sm:$0xff]  }
0x2998   : > { %v6122_v17 = vpop.xlane.xlu0 %6121 }
0x2999   : > { %v6123_v18 = vmul.f32 0.0078125, %v6122_v17  ;;  %v9029_v17 = vld [vmem:[%s11168_s12 + $0x398] sm:$0xff]  }
0x299b   : > { %v6124_v19 = vsub.f32 %v6116_v8, %v6123_v18  ;;  %v9018_v8 = vld [vmem:[%s11168_s12 + $0x368] sm:$0xff]   ;;  %v9030_v18 = vld [vmem:[%s11168_s12 + $0x350] sm:$0xff]  }
0x299d   : > { %v6125_v63 = vmul.f32 %v6124_v19, %v6124_v19 }
0x299f   : > { %6126 = vadd.xlane.f32.xlu1 %v6125_v63  ;;  %v9032_v63 = vld [vmem:[%s11168_s12 + $0x310] sm:$0xff]  }
0x2a28   : > { %v6127_v48 = vpop.xlane.xlu1 %6126 }
0x2a29   : > { %v6128_v51 = vmul.f32 0.0078125, %v6127_v48 }
0x2a2b   : > { %v6129_v52 = vadd.f32 1e-12, %v6128_v51 }
0x2a2d   : > { %9144 = vrsqrt.f32 %v6129_v52 }
0x2a3a   : > { %v9145_v54 = vpop.eup %9144 }
0x2a3b   : > { %v6131_v56 = vmul.f32 %v9145_v54, %v6124_v19  ;;  %v9031_v19 = vld [vmem:[%s11168_s12 + $0x3d0] sm:$0xff]  }
0x2a3d   : > { %v6138_v3 = vmul.f32 %v7680_v55, %v6131_v56 }
0x2a3f   : > { %v11002_v58 = vadd.f32 %v7681_v57, %v6138_v3 }
0x2a41   : > { %v6146_v36 = vpack.c.bf16 %v11002_v58, %v11002_v58 }
0x2a43   : > { %6396 = vmatmul.mubr.bf16.vlgmr.msra.gmra.mxu1 %v6146_v36  ;;  %6437 = vmatmul.mubr.bf16.vlgmr.msra.gmra.mxu0 %v6146_v36 }
0x2a44   : > { %8122 = vmatpush3.bf16.msra.mxu1 %v9012_v62  ;;  %8144 = vmatpush3.bf16.msra.mxu0 %v9013_v0 }
0x2a45   : > { %8123 = vmatprep.subr.bf16.mxu1 %v9014_v2  ;;  %8145 = vmatprep.subr.bf16.mxu0 %v9015_v31 }
0x2a48   : > { %8124 = vmatpush3.bf16.msra.mxu1 %v9016_v4  ;;  %8146 = vmatpush3.bf16.msra.mxu0 %v9017_v5 }
0x2a49   : > { %8125 = vmatprep.subr.bf16.mxu1 %v9018_v8  ;;  %8147 = vmatprep.subr.bf16.mxu0 %v9019_v6 }
0x2a4c   : > { %8126 = vmatpush3.bf16.msra.mxu1 %v9020_v34  ;;  %8148 = vmatpush3.bf16.msra.mxu0 %v9021_v39 }
0x2a4d   : > { %8127 = vmatprep.subr.bf16.mxu1 %v9022_v25  ;;  %8149 = vmatprep.subr.bf16.mxu0 %v9023_v9 }
0x2a50   : > { %8128 = vmatpush3.bf16.msra.mxu1 %v9024_v10  ;;  %8150 = vmatpush3.bf16.msra.mxu0 %v9025_v11 }
0x2a51   : > { %8129 = vmatprep.subr.bf16.mxu1 %v9026_v12  ;;  %8151 = vmatprep.subr.bf16.mxu0 %v9027_v13 }
0x2a54   : > { %8130 = vmatpush3.bf16.msra.mxu1 %v9028_v16  ;;  %8152 = vmatpush3.bf16.msra.mxu0 %v9029_v17 }
0x2a55   : > { %8131 = vmatprep.subr.bf16.mxu1 %v9030_v18  ;;  %8153 = vmatprep.subr.bf16.mxu0 %v9031_v19 }
0x2a58   : > { %8132 = vmatpush3.bf16.msra.mxu1 %v9032_v63  ;;  %8154 = vmatpush3.bf16.msra.mxu0 %v9033_v50 }
0x2a59   : > { %8133 = vmatprep.subr.bf16.mxu1 %v9034_v26  ;;  %8155 = vmatprep.subr.bf16.mxu0 %v9035_v20 }
0x2a5c   : > { %8134 = vmatpush3.bf16.msra.mxu1 %v9036_v21  ;;  %8156 = vmatpush3.bf16.msra.mxu0 %v9037_v1 }
0x2a5d   : > { %8135 = vmatprep.subr.bf16.mxu1 %v9038_v22  ;;  %8157 = vmatprep.subr.bf16.mxu0 %v9039_v24 }
0x2a60   : > { %8136 = vmatpush3.bf16.msra.mxu1 %v9040_v27  ;;  %8158 = vmatpush3.bf16.msra.mxu0 %v9041_v28  ;;  %v7812_v28 = vld [vmem:[%s11169_s13 + $0x3] ss:$0 sm:$0xff] }
0x2b03   : > { %v6397_v35 = vpop.f32.mrf.mxu1  ;;  %v6438_v37 = vpop.f32.mrf.mxu0 }
0x2b04   : > { %v6398_v14 = vadd.f32 %v6397_v35, %v6186_v30  ;;  %v6439_v40 = vadd.f32 %v6438_v37, %v6194_v32 }
0x2b05   : > { %v6399_v7 = vpop.f32.mrf.mxu1  ;;  %v6440_v41 = vpop.f32.mrf.mxu0 }
0x2b06   : > { %v6449_v44 = vmul.f32 0.044715, %v6398_v14  ;;  %v6451_v53 = vmul.f32 0.044715, %v6439_v40  ;;  %v6400_v46 = vadd.f32 %v6399_v7, %v6190_v33  ;;  %v6441_v47 = vadd.f32 %v6440_v41, %v6198_v38 }
0x2b07   : > { %v6401_v48 = vpop.f32.mrf.mxu1  ;;  %v6442_v51 = vpop.f32.mrf.mxu0  ;;  %v6445_v9 = vmul.f32 0.5, %v6398_v14  ;;  %v6447_v16 = vmul.f32 0.5, %v6439_v40 }
0x2b08   : > { %v6453_v52 = vmul.f32 %v6449_v44, %v6398_v14  ;;  %v6455_v49 = vmul.f32 %v6451_v53, %v6439_v40  ;;  %v6450_v54 = vmul.f32 0.044715, %v6400_v46  ;;  %v6452_v45 = vmul.f32 0.044715, %v6441_v47 }
0x2b09   : > { %v6402_v55 = vpop.f32.mrf.mxu1  ;;  %v6443_v43 = vpop.f32.mrf.mxu0  ;;  %v6446_v12 = vmul.f32 0.5, %v6400_v46  ;;  %v6448_v17 = vmul.f32 0.5, %v6441_v47 }
0x2b0a   : > { %v6457_v56 = vmul.f32 %v6453_v52, %v6398_v14  ;;  %v6459_v57 = vmul.f32 %v6455_v49, %v6439_v40  ;;  %v6454_v3 = vmul.f32 %v6450_v54, %v6400_v46  ;;  %v6456_v23 = vmul.f32 %v6452_v45, %v6441_v47  ;;  %v7847_v54 = vld [vmem:[%s11170_s14 + $0x3] ss:$0 sm:$0xff] }
0x2b0b   : > { %v3710_v55 = vadd.f32 %v10342_v59, %v9911_v15 }
0x2b0c   : > { %v6461_v36 = vadd.f32 %v6457_v56, %v6398_v14  ;;  %v6463_v60 = vadd.f32 %v6459_v57, %v6439_v40  ;;  %v6458_v61 = vmul.f32 %v6454_v3, %v6400_v46  ;;  %v6460_v62 = vmul.f32 %v6456_v23, %v6441_v47 }
0x2b0d   : > { %v5285_v56 = vadd.f32 %v10773_v42, %v3710_v55 }
0x2b0e   : > { %v6465_v0 = vmul.f32 0.7978846, %v6461_v36  ;;  %v6467_v2 = vmul.f32 0.7978846, %v6463_v60  ;;  %v6462_v31 = vadd.f32 %v6458_v61, %v6400_v46  ;;  %v6464_v4 = vadd.f32 %v6460_v62, %v6441_v47 }
0x2b10   : > { %9146 = vtanh.f32 %v6465_v0  ;;  %v6466_v5 = vmul.f32 0.7978846, %v6462_v31  ;;  %v6468_v8 = vmul.f32 0.7978846, %v6464_v4 }
0x2b11   : > { %9148 = vtanh.f32 %v6467_v2 }
0x2b12   : > { %9150 = vtanh.f32 %v6466_v5 }
0x2b13   : > { %9152 = vtanh.f32 %v6468_v8 }
0x2b1d   : > { %v9147_v6 = vpop.eup %9146 }
0x2b1e   : > { %v9149_v34 = vpop.eup %9148  ;;  %v6473_v39 = vadd.f32 1.0, %v9147_v6 }
0x2b1f   : > { %v9151_v25 = vpop.eup %9150  ;;  %v6475_v10 = vadd.f32 1.0, %v9149_v34 }
0x2b20   : > { %v9153_v11 = vpop.eup %9152  ;;  %v6474_v13 = vadd.f32 1.0, %v9151_v25  ;;  %v6477_v19 = vmul.f32 %v6473_v39, %v6445_v9 }
0x2b21   : > { %v6476_v18 = vadd.f32 1.0, %v9153_v11  ;;  %v6479_v50 = vmul.f32 %v6475_v10, %v6447_v16 }
0x2b22   : > { %v6478_v63 = vmul.f32 %v6474_v13, %v6446_v12  ;;  %v6481_v1 = vpack.c.bf16 %v6477_v19, %v6477_v19 }
0x2b23   : > { %v6480_v26 = vmul.f32 %v6476_v18, %v6448_v17  ;;  %v6483_v22 = vpack.c.bf16 %v6479_v50, %v6479_v50 }
0x2b24   : > { %v6482_v20 = vpack.c.bf16 %v6478_v63, %v6478_v63 }
0x2b25   : > { %v6484_v21 = vpack.c.bf16 %v6480_v26, %v6480_v26 }
0x2b26   : > { %6782 = vmatprep.mubr.bf16.mxu1 %v6482_v20 }
0x2b27   : > { %6822 = vmatprep.mubr.bf16.mxu0 %v6484_v21  ;;  %6783 = vmatmul.mubr.bf16.vlgmr.msra.gmra.mxu1 %v6481_v1 }
0x2b28   : > { %6823 = vmatmul.mubr.bf16.vlgmr.msra.gmra.mxu0 %v6483_v22 }
0x2be7   : > { %v8137_v24 = vpop.f32.mrf.mxu1 }
0x2be8   : > { %v8159_v27 = vpop.f32.mrf.mxu0 }
0x2be9   : > { %v8138_v29 = vpop.f32.mrf.mxu1 }
0x2bea   : > { %v8139_v30 = vadd.f32 %v8138_v29, %v8137_v24  ;;  %v8160_v32 = vpop.f32.mrf.mxu0 }
0x2beb   : > { %v8140_v33 = vpop.f32.mrf.mxu1  ;;  %v8161_v37 = vadd.f32 %v8160_v32, %v8159_v27 }
0x2bec   : > { %v6785_v35 = vadd.f32 %v8139_v30, %v7812_v28  ;;  %v8162_v38 = vpop.f32.mrf.mxu0 }
0x2bed   : > { %v8141_v14 = vpop.f32.mrf.mxu1 }
0x2bee   : > { %v6825_v40 = vadd.f32 %v8161_v37, %v6785_v35  ;;  %v8163_v7 = vpop.f32.mrf.mxu0 }
0x2bf0   : > { %v6830_v41 = vadd.f32 %v6825_v40, %v11002_v58  ;;  %v7848_v58 = vld [vmem:[%s11171_s15 + $0x3] ss:$0 sm:$0xff] }
0x2bf2   : > { %6835 = vadd.xlane.f32.xlu0 %v6830_v41 }
0x2c7b   : > { %v6836_v44 = vpop.xlane.xlu0 %6835 }
0x2c7c   : > { %v6837_v53 = vmul.f32 0.0078125, %v6836_v44 }
0x2c7e   : > { %v6838_v46 = vsub.f32 %v6830_v41, %v6837_v53 }
0x2c80   : > { %v6839_v47 = vmul.f32 %v6838_v46, %v6838_v46 }
0x2c82   : > { %6840 = vadd.xlane.f32.xlu0 %v6839_v47 }
0x2d0b   : > { %v6841_v48 = vpop.xlane.xlu0 %6840 }
0x2d0c   : > { %v6842_v51 = vmul.f32 0.0078125, %v6841_v48 }
0x2d0e   : > { %v6843_v52 = vadd.f32 1e-12, %v6842_v51 }
0x2d10   : > { %9154 = vrsqrt.f32 %v6843_v52 }
0x2d1d   : > { %v9155_v49 = vpop.eup %9154 }
0x2d1e   : > { %v6845_v45 = vmul.f32 %v9155_v49, %v6838_v46 }
0x2d20   : > { %v6852_v43 = vmul.f32 %v7847_v54, %v6845_v45 }
0x2d22   : > { %v6859_v57 = vadd.f32 %v7848_v58, %v6852_v43 }
0x2d24   : > { %v6860_v3 = vadd.f32 %v6859_v57, %v5285_v56 }
0x2d26   : > { %6861 = vst [vmem:[%s523_s17] sm:$0xff] %v6860_v3 }
0x2d27   : > { %9172 = shalt.err (!%p9169_p3)
}
0x2d28   : > { %s9173_s21 = scalar_lea.hbm %s6874_s26, 128  ;;  %s9177_s24 = scalar_lea.hbm %s11206_s3, 256 }
0x2d29   : > { %p9174_p4 = scmp.ne.s32.totalorder %s6874_s26, %s9173_s21  ;;  %p9178_p9 = scmp.lt.s32.totalorder %s6874_s26, %s11206_s3 }
0x2d2a   : > { %p9179_p10 = scmp.lt.s32.totalorder %s9177_s24, %s9173_s21 }
0x2d2b   : > { %p9175_p7 = pnand %p9174_p4, %p9351_p5 }
0x2d2c   : > { %p9180_p11 = por %p9179_p10, %p9178_p9 }
0x2d2d   : > { %p9176_p8 = pneg %p9175_p7 }
0x2d2f   : > { %p9181_p12 = pnand %p9180_p11, %p9176_p8 }
0x2d31   : > { %9184 = shalt.err (!%p9181_p12)
}
0x2d32   : > { %8517 = dma.vmem_to_hbm [thread:$0]  (%p9351_p5), %s6877_s20, 128, %s6874_s26, %s6863_s30  }
0x2d33 PF: > { %s11207_s17 = sld [smem:[#allocation7_spill]] }
0x2d34   : > { %s11208_s28 = sld [smem:[#allocation5_spill]] }
0x2d39   : > { %p8523_p13 = scmp.ge.s32.totalorder %s11207_s17, 2 }
0x2d3a   : > { %s6888_s16 = sand.u32 1, %s11208_s28  }
0x2d3b   : > { %p8520_p0 = pnand %p8523_p13, %p9355_p6  ;;  %s6889_s1 = scalar_lea.sflag [#allocation3], %s6888_s16 }
0x2d3d   : > { %p8521_p1 = pneg %p8520_p0 }
0x2d3f   : > { %9202 = dma.done.wait (%p8521_p1), %s6889_s1, 128  }
0x2d40   : > { %9204 = vsyncadd (%p8521_p1), %s6889_s1, 4294967168  ;;  %s11210_s24 = sld [smem:[#allocation8_spill]]  ;;  %s11213_s21 = smov %s9211_s22 }
0x2d41   : > { %s11211_s25 = sld [smem:[#allocation6_spill]] }
0x2d42   : > { %s11212_s23 = sld [smem:[#allocation9_spill]] }
0x2d46   : > { %p26_p2 = scmp.ge.s32.totalorder %s11210_s24, 4  }
0x2d47   : > { %s11214_s22 = smov %s11211_s25 }
0x2d48   :  { %28 = sbr.rel (!%p26_p2) target bundleno = 9 (0x9), region = 158 }
0x2d4d   :  { %6894 = vsyncpa [#allocation3], 1 }
0x2d4e   :  { %6896 = vsyncpa [#allocation3 + $0x1], 1 }

</bundles_post_ra>
